<compile_context>
chip_gen: v5e
topology: v5e:2x2
jax: 0.10.0
libtpu: 0.0.40
codegen_flags: <defaults>
</compile_context>

<pallas_src>
import functools
import math

import jax
import jax.numpy as jnp
from jax.experimental import pallas as pl
from jax.experimental.pallas import tpu as pltpu

# ----------------------------- hyper-parameters (small & deterministic) -----
PARAMS = dict(
    seq_len=8, label_len=4, pred_len=4,
    enc_in=4, dec_in=4, d_model=32, n_heads=4, d_ff=64,
    e_layers=2, d_layers=1, factor=5, dropout=0.0,
    embed='fixed', freq='h', activation='relu',
    output_attention=False, distil=False, num_class=3,
)

LN_EPS = 1e-5
_INV_SQRT2 = 0.7071067811865476
C_PAD = 128          # lane-dense padded class width (review #6)


# ----------------------------- in-kernel helpers ------------------------------
def _layer_norm(x, gamma, beta):
    mu = jnp.mean(x, axis=-1, keepdims=True)
    xc = x - mu
    var = jnp.mean(xc * xc, axis=-1, keepdims=True)
    return xc * jax.lax.rsqrt(var + LN_EPS) * gamma + beta


def _erf_approx(z):
    # Abramowitz & Stegun 7.1.26, |err| <= 1.5e-7 -- exact-GELU grade (NOT tanh GELU).
    az = jnp.abs(z)
    t = 1.0 / (1.0 + 0.3275911 * az)
    poly = t * (0.254829592 + t * (-0.284496736 + t * (1.421413741
               + t * (-1.453152027 + t * 1.061405429))))
    e = 1.0 - poly * jnp.exp(-az * az)
    return jnp.where(z < 0.0, -e, e)


def _gelu_exact(x):
    return 0.5 * x * (1.0 + _erf_approx(x * _INV_SQRT2))


# ----------------------------- fused kernel -----------------------------------
def informer_kernel(x_ref, m_ref,
                    wconv_ref, pe_ref,
                    wqkv_ref, bqkv_ref, wo_ref, dvec_ref,
                    w1_ref, bff_ref, w2_ref,
                    gbE_ref, wht_ref, eyec_ref, bhead_ref,
                    o_ref, *, n_heads, seq_len):
    R = x_ref.shape[0]                       # Bt * L folded rows
    L = seq_len
    Bt = R // L
    D = pe_ref.shape[-1]
    dh = D // n_heads
    scale = 1.0 / math.sqrt(dh)
    E = wqkv_ref.shape[0]
    C = wht_ref.shape[0]

    # ---- DataEmbedding: circular Conv1d(k=3) == ONE matmul on host im2col rows
    x = x_ref[...]                                                   # (R, 3*Cin)
    h = (jnp.dot(x, wconv_ref[...], preferred_element_type=jnp.float32)
         + pe_ref[...])                                              # (R, D)

    # ---- Encoder: e_layers EncoderLayers (ProbSparse == full attention here)
    for l in range(E):
        # fused QKV projection on folded batch rows: (R, D) @ (D, 3D)
        qkv = (jnp.dot(h, wqkv_ref[l], preferred_element_type=jnp.float32)
               + bqkv_ref[l])
        qkv3 = qkv.reshape(Bt, L, 3 * D)                             # per-batch view

        wo = wo_ref[l]
        attn = None
        for hh in range(n_heads):
            lo = hh * dh
            qh = qkv3[:, :, lo:lo + dh]                              # (Bt, L, dh)
            kh = qkv3[:, :, D + lo:D + lo + dh]
            vh = qkv3[:, :, 2 * D + lo:2 * D + lo + dh]
            # batched-over-Bt score / context matmuls (leading-batch einsums)
            s = jnp.einsum('bld,bsd->bls', qh, kh,
                           preferred_element_type=jnp.float32) * scale
            s = s - jnp.max(s, axis=-1, keepdims=True)
            p = jnp.exp(s)
            p = p / jnp.sum(p, axis=-1, keepdims=True)               # exact softmax
            ctx = jnp.einsum('bls,bsd->bld', p, vh,
                             preferred_element_type=jnp.float32)     # (Bt, L, dh)
            # out-projection folded per head: sum_h ctx_h @ Wo[rows_h] == concat @ Wo
            part = jnp.dot(ctx.reshape(R, dh), wo[lo:lo + dh, :],
                           preferred_element_type=jnp.float32)       # (R, D)
            attn = part if attn is None else attn + part
        attn = attn + dvec_ref[l, 0:1, :]                            # bo

        # norm1(x + attn)
        x1 = _layer_norm(h + attn, dvec_ref[l, 2:3, :], dvec_ref[l, 3:4, :])

        # FFN (1x1 convs): relu(x1 @ W1 + b1) @ W2 + b2 on folded rows
        y = jnp.dot(x1, w1_ref[l], preferred_element_type=jnp.float32) + bff_ref[l]
        y = jnp.maximum(y, 0.0)                                      # activation='relu'
        y = (jnp.dot(y, w2_ref[l], preferred_element_type=jnp.float32)
             + dvec_ref[l, 1:2, :])                                  # b2

        h = _layer_norm(x1 + y, dvec_ref[l, 4:5, :], dvec_ref[l, 5:6, :])   # norm2

    # ---- Encoder's final LayerNorm
    h = _layer_norm(h, gbE_ref[0:1, :], gbE_ref[1:2, :])

    # ---- classification head: gelu -> mask -> Linear(L*D, C) -> sigmoid
    g = _gelu_exact(h) * m_ref[...]                                  # (R, D)
    g3 = g.reshape(Bt, L, D)

    # logits[:, c] = sum_{l,d} g3 * Whead_t[c]  -- C independent VPU mult+reduce,
    # assembled into a 128-lane padded slab via one-hot columns (no serial matmuls).
    logits = None
    for c in range(C):
        prod = g3 * wht_ref[c]                                       # (Bt, L, D)
        col = jnp.sum(prod, axis=2, keepdims=True)                   # (Bt, L, 1)
        col = jnp.sum(col, axis=1, keepdims=True)                    # (Bt, 1, 1)
        term = col * eyec_ref[c:c + 1, :]                            # (Bt, 1, C_PAD)
        logits = term if logits is None else logits + term
    logits = logits + bhead_ref[...]                                 # (1, C_PAD) bcast
    o_ref[...] = jax.nn.sigmoid(logits)                              # (Bt, 1, C_PAD)


# ----------------------------- wrapper -----------------------------------------
@functools.partial(jax.jit, static_argnames=("n_blocks",))
def informer_forward(x_enc, x_mark_enc, params, n_blocks=2):
    (w_conv, pe, wqkv, bqkv, wo, dvec, w1, bff, w2, gbE, w_head, b_head) = params
    B, L, Cin = x_enc.shape
    D = pe.shape[1]
    C = b_head.shape[-1]
    H = PARAMS['n_heads']

    # ---- batch blocking: >=2 grid steps keeps both v7x TensorCores busy
    n_blocks = max(1, min(n_blocks, B))
    Bt = -(-B // n_blocks)                    # ceil
    Bpad = Bt * n_blocks
    R = Bt * L

    # ---- host-side layout prep (no compute hoisting beyond im2col padding)
    # circular k=3 im2col == PyTorch's circular padding; makes the conv ONE matmul.
    x_cat = jnp.concatenate([jnp.roll(x_enc, 1, axis=1), x_enc,
                             jnp.roll(x_enc, -1, axis=1)], axis=-1)   # (B, L, 3*Cin)
    mask3 = x_mark_enc[..., None].astype(jnp.float32)                 # (B, L, 1)
    if Bpad != B:
        x_cat = jnp.pad(x_cat, ((0, Bpad - B), (0, 0), (0, 0)))
        mask3 = jnp.pad(mask3, ((0, Bpad - B), (0, 0), (0, 0)))
    x_flat = x_cat.reshape(Bpad * L, 3 * Cin)
    m_flat = mask3.reshape(Bpad * L, 1)

    wconv_f = w_conv.reshape(3 * Cin, D)                  # fused 3-tap conv weight
    pe_b = jnp.tile(pe, (Bt, 1))                          # (Bt*L, D) positional emb
    w_head_t = jnp.transpose(w_head, (2, 0, 1))           # (C, L, D)
    eyeC = jnp.eye(C, C_PAD, dtype=jnp.float32)           # one-hot column assembler
    b_head_p = jnp.pad(b_head, ((0, 0), (0, C_PAD - C)))  # (1, C_PAD)

    weights = [wconv_f, pe_b, wqkv, bqkv, wo, dvec, w1, bff, w2,
               gbE, w_head_t, eyeC, b_head_p]

    def full_spec(shape):
        nz = (0,) * len(shape)
        return pl.BlockSpec(shape, lambda b, _z=nz: _z)

    out = pl.pallas_call(
        functools.partial(informer_kernel, n_heads=H, seq_len=L),
        out_shape=jax.ShapeDtypeStruct((Bpad, 1, C_PAD), jnp.float32),
        grid=(n_blocks,),
        in_specs=([pl.BlockSpec((R, 3 * Cin), lambda b: (b, 0)),
                   pl.BlockSpec((R, 1), lambda b: (b, 0))]
                  + [full_spec(w.shape) for w in weights]),
        out_specs=pl.BlockSpec((Bt, 1, C_PAD), lambda b: (b, 0, 0)),
        compiler_params=pltpu.CompilerParams(dimension_semantics=("parallel",)),
    )(x_flat, m_flat, *weights)
    return out[:B, 0, :C]


# ----------------------------- pure-JAX reference (self check) ------------------
def reference_forward(x_enc, x_mark_enc, params, n_heads, e_layers):
    (w_conv, pe, wqkv, bqkv, wo, dvec, w1, bff, w2, gbE, w_head, b_head) = params
    B, L, Cin = x_enc.shape
    D = pe.shape[1]
    dh = D // n_heads
    scale = 1.0 / math.sqrt(dh)

    def ln(x, g, b):
        mu = x.mean(-1, keepdims=True)
        var = ((x - mu) ** 2).mean(-1, keepdims=True)
        return (x - mu) / jnp.sqrt(var + LN_EPS) * g + b

    xsh = jnp.concatenate([jnp.roll(x_enc, 1, axis=1), x_enc,
                           jnp.roll(x_enc, -1, axis=1)], axis=-1)
    h = xsh @ w_conv.reshape(3 * Cin, D) + pe[None]

    for l in range(e_layers):
        qkv = h @ wqkv[l] + bqkv[l]
        q, k, v = qkv[..., :D], qkv[..., D:2 * D], qkv[..., 2 * D:]
        qh = q.reshape(B, L, n_heads, dh)
        kh = k.reshape(B, L, n_heads, dh)
        vh = v.reshape(B, L, n_heads, dh)
        s = jnp.einsum('blhd,bshd->bhls', qh, kh) * scale
        a = jax.nn.softmax(s, axis=-1)
        ctx = jnp.einsum('bhls,bshd->blhd', a, vh).reshape(B, L, D)
        attn = ctx @ wo[l] + dvec[l, 0]
        x1 = ln(h + attn, dvec[l, 2], dvec[l, 3])
        y = jnp.maximum(x1 @ w1[l] + bff[l], 0.0)
        y = y @ w2[l] + dvec[l, 1]
        h = ln(x1 + y, dvec[l, 4], dvec[l, 5])

    h = ln(h, gbE[0], gbE[1])
    g = jax.nn.gelu(h, approximate=False) * x_mark_enc[..., None]
    logits = jnp.einsum('bld,ldc->bc', g, w_head) + b_head
    return jax.nn.sigmoid(logits)


# ----------------------------- setup helpers ------------------------------------
def positional_embedding(L, d_model):
    pos = jnp.arange(L, dtype=jnp.float32)[:, None]
    div = jnp.exp(jnp.arange(0, d_model, 2, dtype=jnp.float32)
                  * -(math.log(10000.0) / d_model))
    pe = jnp.zeros((L, d_model), jnp.float32)
    pe = pe.at[:, 0::2].set(jnp.sin(pos * div))
    pe = pe.at[:, 1::2].set(jnp.cos(pos * div))
    return pe


if __name__ == "__main__":
    B = 4
    L, Cin, D = PARAMS['seq_len'], PARAMS['enc_in'], PARAMS['d_model']
    H, Dff, C = PARAMS['n_heads'], PARAMS['d_ff'], PARAMS['num_class']
    E = PARAMS['e_layers']

    # config chosen so ProbSparse attention degenerates to exact full attention
    assert PARAMS['factor'] * math.ceil(math.log(L)) >= L

    key = jax.random.PRNGKey(0)
    keys = iter(jax.random.split(key, 64))

    def nrm(shape, scale=0.05):
        return scale * jax.random.normal(next(keys), shape, jnp.float32)

    # inputs
    x_enc = jax.random.normal(next(keys), (B, L, Cin), jnp.float32)
    x_mark_enc = (jax.random.uniform(next(keys), (B, L)) > 0.25).astype(jnp.float32)

    # DataEmbedding params: Conv1d(enc_in, d_model, k=3, circular, bias=False)
    # stored as (tap, Cin, D) with tap order [x[t-1], x[t], x[t+1]].
    w_conv = nrm((3, Cin, D), 0.2)
    pe = positional_embedding(L, D)

    # Encoder layer params, stacked over layers.
    wqkv = nrm((E, D, 3 * D))             # [Wq | Wk | Wv]
    bqkv = nrm((E, 1, 3 * D))             # [bq | bk | bv]
    wo = nrm((E, D, D))
    w1 = nrm((E, D, Dff))
    bff = nrm((E, 1, Dff))                # b1
    w2 = nrm((E, Dff, D))
    bo = nrm((E, 1, D))
    b2 = nrm((E, 1, D))
    g1 = jnp.ones((E, 1, D), jnp.float32)
    be1 = jnp.zeros((E, 1, D), jnp.float32)
    g2 = jnp.ones((E, 1, D), jnp.float32)
    be2 = jnp.zeros((E, 1, D), jnp.float32)
    # dvec rows: [bo, b2, gamma1, beta1, gamma2, beta2]
    dvec = jnp.concatenate([bo, b2, g1, be1, g2, be2], axis=1)   # (E, 6, D)

    # final encoder LayerNorm gamma/beta
    gbE = jnp.concatenate([jnp.ones((1, D), jnp.float32),
                           jnp.zeros((1, D), jnp.float32)], axis=0)   # (2, D)

    # classification head: Linear(d_model * seq_len, num_class), reshaped to (L, D, C)
    w_head = nrm((L, D, C))
    b_head = nrm((1, C))

    params = (w_conv, pe, wqkv, bqkv, wo, dvec, w1, bff, w2, gbE, w_head, b_head)

    out = informer_forward(x_enc, x_mark_enc, params, n_blocks=2)
    out = jax.block_until_ready(out)
    assert out.shape == (B, C)

    ref = reference_forward(x_enc, x_mark_enc, params, H, E)
    assert jnp.allclose(out, ref, atol=2e-3, rtol=2e-3), (out, ref)

    print("KERNEL_OK")
</pallas_src>

<mosaic_0001>
module attributes {stable_mosaic.version = 11 : i64} {
  func.func @informer_kernel(%arg0: i32, %arg1: memref<16x12xf32, #tpu.memory_space<vmem>>, %arg2: memref<16x1xf32, #tpu.memory_space<vmem>>, %arg3: memref<12x32xf32, #tpu.memory_space<vmem>>, %arg4: memref<16x32xf32, #tpu.memory_space<vmem>>, %arg5: memref<2x32x96xf32, #tpu.memory_space<vmem>>, %arg6: memref<2x1x96xf32, #tpu.memory_space<vmem>>, %arg7: memref<2x32x32xf32, #tpu.memory_space<vmem>>, %arg8: memref<2x6x32xf32, #tpu.memory_space<vmem>>, %arg9: memref<2x32x64xf32, #tpu.memory_space<vmem>>, %arg10: memref<2x1x64xf32, #tpu.memory_space<vmem>>, %arg11: memref<2x64x32xf32, #tpu.memory_space<vmem>>, %arg12: memref<2x32xf32, #tpu.memory_space<vmem>>, %arg13: memref<3x8x32xf32, #tpu.memory_space<vmem>>, %arg14: memref<3x128xf32, #tpu.memory_space<vmem>>, %arg15: memref<1x128xf32, #tpu.memory_space<vmem>>, %arg16: memref<2x1x128xf32, #tpu.memory_space<vmem>>) attributes {dimension_semantics = [#tpu.dimension_semantics<parallel>], iteration_bounds = array<i64: 2>, scalar_prefetch = 0 : i64, scratch_operands = 0 : i64, tpu.core_type = #tpu.core_type<tc>, window_params = [{transform_indices = @transform_0, window_bounds = array<i64: 16, 12>}, {transform_indices = @transform_1, window_bounds = array<i64: 16, 1>}, {pipeline_mode = #tpu.pipeline_mode<synchronous>, transform_indices = @transform_2, window_bounds = array<i64: 12, 32>}, {pipeline_mode = #tpu.pipeline_mode<synchronous>, transform_indices = @transform_3, window_bounds = array<i64: 16, 32>}, {pipeline_mode = #tpu.pipeline_mode<synchronous>, transform_indices = @transform_4, window_bounds = array<i64: 2, 32, 96>}, {pipeline_mode = #tpu.pipeline_mode<synchronous>, transform_indices = @transform_5, window_bounds = array<i64: 2, 1, 96>}, {pipeline_mode = #tpu.pipeline_mode<synchronous>, transform_indices = @transform_6, window_bounds = array<i64: 2, 32, 32>}, {pipeline_mode = #tpu.pipeline_mode<synchronous>, transform_indices = @transform_7, window_bounds = array<i64: 2, 6, 32>}, {pipeline_mode = #tpu.pipeline_mode<synchronous>, transform_indices = @transform_8, window_bounds = array<i64: 2, 32, 64>}, {pipeline_mode = #tpu.pipeline_mode<synchronous>, transform_indices = @transform_9, window_bounds = array<i64: 2, 1, 64>}, {pipeline_mode = #tpu.pipeline_mode<synchronous>, transform_indices = @transform_10, window_bounds = array<i64: 2, 64, 32>}, {pipeline_mode = #tpu.pipeline_mode<synchronous>, transform_indices = @transform_11, window_bounds = array<i64: 2, 32>}, {pipeline_mode = #tpu.pipeline_mode<synchronous>, transform_indices = @transform_12, window_bounds = array<i64: 3, 8, 32>}, {pipeline_mode = #tpu.pipeline_mode<synchronous>, transform_indices = @transform_13, window_bounds = array<i64: 3, 128>}, {pipeline_mode = #tpu.pipeline_mode<synchronous>, transform_indices = @transform_14, window_bounds = array<i64: 1, 128>}, {transform_indices = @transform_15, window_bounds = array<i64: 2, 1, 128>}]} {
    %c0 = arith.constant 0 : index
    %c0_0 = arith.constant 0 : index
    %0 = vector.load %arg1[%c0, %c0_0] : memref<16x12xf32, #tpu.memory_space<vmem>>, vector<16x12xf32>
    %c0_1 = arith.constant 0 : index
    %c0_2 = arith.constant 0 : index
    %1 = vector.load %arg3[%c0_1, %c0_2] : memref<12x32xf32, #tpu.memory_space<vmem>>, vector<12x32xf32>
    %cst = arith.constant dense<0.000000e+00> : vector<16x32xf32>
    %2 = tpu.matmul %0, %1, %cst {dimension_numbers = #tpu.dot_dimension_numbers<[1], [0], [0], [1], [0, 0, 1, 1], [], []>} : vector<16x12xf32>, vector<12x32xf32>, vector<16x32xf32> -> vector<16x32xf32>
    %c0_3 = arith.constant 0 : index
    %c0_4 = arith.constant 0 : index
    %3 = vector.load %arg4[%c0_3, %c0_4] : memref<16x32xf32, #tpu.memory_space<vmem>>, vector<16x32xf32>
    %4 = arith.addf %2, %3 : vector<16x32xf32>
    %c0_5 = arith.constant 0 : index
    %c0_6 = arith.constant 0 : index
    %c0_7 = arith.constant 0 : index
    %5 = vector.load %arg5[%c0_5, %c0_6, %c0_7] : memref<2x32x96xf32, #tpu.memory_space<vmem>>, vector<1x32x96xf32>
    %6 = vector.shape_cast %5 : vector<1x32x96xf32> to vector<32x96xf32>
    %cst_8 = arith.constant dense<0.000000e+00> : vector<16x96xf32>
    %7 = tpu.matmul %4, %6, %cst_8 {dimension_numbers = #tpu.dot_dimension_numbers<[1], [0], [0], [1], [0, 0, 1, 1], [], []>} : vector<16x32xf32>, vector<32x96xf32>, vector<16x96xf32> -> vector<16x96xf32>
    %c0_9 = arith.constant 0 : index
    %c0_10 = arith.constant 0 : index
    %c0_11 = arith.constant 0 : index
    %8 = vector.load %arg6[%c0_9, %c0_10, %c0_11] : memref<2x1x96xf32, #tpu.memory_space<vmem>>, vector<1x1x96xf32>
    %9 = vector.shape_cast %8 : vector<1x1x96xf32> to vector<1x96xf32>
    %10 = vector.broadcast %9 : vector<1x96xf32> to vector<16x96xf32>
    %11 = arith.addf %7, %10 : vector<16x96xf32>
    %12 = vector.shape_cast %11 : vector<16x96xf32> to vector<2x8x96xf32>
    %c0_12 = arith.constant 0 : index
    %c0_13 = arith.constant 0 : index
    %c0_14 = arith.constant 0 : index
    %13 = vector.load %arg7[%c0_12, %c0_13, %c0_14] : memref<2x32x32xf32, #tpu.memory_space<vmem>>, vector<1x32x32xf32>
    %14 = vector.shape_cast %13 : vector<1x32x32xf32> to vector<32x32xf32>
    %15 = vector.extract_strided_slice %12 {offsets = [0, 0, 0], sizes = [2, 8, 8], strides = [1, 1, 1]} : vector<2x8x96xf32> to vector<2x8x8xf32>
    %16 = vector.extract_strided_slice %12 {offsets = [0, 0, 32], sizes = [2, 8, 8], strides = [1, 1, 1]} : vector<2x8x96xf32> to vector<2x8x8xf32>
    %17 = vector.extract_strided_slice %12 {offsets = [0, 0, 64], sizes = [2, 8, 8], strides = [1, 1, 1]} : vector<2x8x96xf32> to vector<2x8x8xf32>
    "tpu.trace_start"() <{level = 10 : i32, message = "bld,bsd->bls"}> : () -> ()
    %cst_15 = arith.constant dense<0.000000e+00> : vector<2x8x8xf32>
    %18 = tpu.matmul %15, %16, %cst_15 {dimension_numbers = #tpu.dot_dimension_numbers<[2], [2], [1], [1], [0, 0, 0, 1, 1, 1], [0], [0]>} : vector<2x8x8xf32>, vector<2x8x8xf32>, vector<2x8x8xf32> -> vector<2x8x8xf32>
    "tpu.trace_stop"() : () -> ()
    %cst_16 = arith.constant 0.353553385 : f32
    %19 = vector.broadcast %cst_16 : f32 to vector<2x8x8xf32>
    %20 = arith.mulf %18, %19 : vector<2x8x8xf32>
    %cst_17 = arith.constant dense<0xFF800000> : vector<2x8xf32>
    %21 = vector.multi_reduction <maximumf>, %20, %cst_17 [2] : vector<2x8x8xf32> to vector<2x8xf32>
    %22 = vector.shape_cast %21 : vector<2x8xf32> to vector<2x8x1xf32>
    %23 = vector.broadcast %22 : vector<2x8x1xf32> to vector<2x8x8xf32>
    %24 = arith.subf %20, %23 : vector<2x8x8xf32>
    %25 = math.exp %24 : vector<2x8x8xf32>
    %cst_18 = arith.constant dense<0.000000e+00> : vector<2x8xf32>
    %26 = vector.multi_reduction <add>, %25, %cst_18 [2] : vector<2x8x8xf32> to vector<2x8xf32>
    %27 = vector.shape_cast %26 : vector<2x8xf32> to vector<2x8x1xf32>
    %28 = vector.broadcast %27 : vector<2x8x1xf32> to vector<2x8x8xf32>
    %29 = arith.divf %25, %28 : vector<2x8x8xf32>
    "tpu.trace_start"() <{level = 10 : i32, message = "bls,bsd->bld"}> : () -> ()
    %cst_19 = arith.constant dense<0.000000e+00> : vector<2x8x8xf32>
    %30 = tpu.matmul %29, %17, %cst_19 {dimension_numbers = #tpu.dot_dimension_numbers<[2], [1], [1], [2], [0, 0, 0, 1, 1, 2], [0], [0]>} : vector<2x8x8xf32>, vector<2x8x8xf32>, vector<2x8x8xf32> -> vector<2x8x8xf32>
    "tpu.trace_stop"() : () -> ()
    %31 = vector.shape_cast %30 : vector<2x8x8xf32> to vector<16x8xf32>
    %32 = vector.extract_strided_slice %14 {offsets = [0, 0], sizes = [8, 32], strides = [1, 1]} : vector<32x32xf32> to vector<8x32xf32>
    %cst_20 = arith.constant dense<0.000000e+00> : vector<16x32xf32>
    %33 = tpu.matmul %31, %32, %cst_20 {dimension_numbers = #tpu.dot_dimension_numbers<[1], [0], [0], [1], [0, 0, 1, 1], [], []>} : vector<16x8xf32>, vector<8x32xf32>, vector<16x32xf32> -> vector<16x32xf32>
    %34 = vector.extract_strided_slice %12 {offsets = [0, 0, 8], sizes = [2, 8, 8], strides = [1, 1, 1]} : vector<2x8x96xf32> to vector<2x8x8xf32>
    %35 = vector.extract_strided_slice %12 {offsets = [0, 0, 40], sizes = [2, 8, 8], strides = [1, 1, 1]} : vector<2x8x96xf32> to vector<2x8x8xf32>
    %36 = vector.extract_strided_slice %12 {offsets = [0, 0, 72], sizes = [2, 8, 8], strides = [1, 1, 1]} : vector<2x8x96xf32> to vector<2x8x8xf32>
    "tpu.trace_start"() <{level = 10 : i32, message = "bld,bsd->bls"}> : () -> ()
    %cst_21 = arith.constant dense<0.000000e+00> : vector<2x8x8xf32>
    %37 = tpu.matmul %34, %35, %cst_21 {dimension_numbers = #tpu.dot_dimension_numbers<[2], [2], [1], [1], [0, 0, 0, 1, 1, 1], [0], [0]>} : vector<2x8x8xf32>, vector<2x8x8xf32>, vector<2x8x8xf32> -> vector<2x8x8xf32>
    "tpu.trace_stop"() : () -> ()
    %cst_22 = arith.constant 0.353553385 : f32
    %38 = vector.broadcast %cst_22 : f32 to vector<2x8x8xf32>
    %39 = arith.mulf %37, %38 : vector<2x8x8xf32>
    %cst_23 = arith.constant dense<0xFF800000> : vector<2x8xf32>
    %40 = vector.multi_reduction <maximumf>, %39, %cst_23 [2] : vector<2x8x8xf32> to vector<2x8xf32>
    %41 = vector.shape_cast %40 : vector<2x8xf32> to vector<2x8x1xf32>
    %42 = vector.broadcast %41 : vector<2x8x1xf32> to vector<2x8x8xf32>
    %43 = arith.subf %39, %42 : vector<2x8x8xf32>
    %44 = math.exp %43 : vector<2x8x8xf32>
    %cst_24 = arith.constant dense<0.000000e+00> : vector<2x8xf32>
    %45 = vector.multi_reduction <add>, %44, %cst_24 [2] : vector<2x8x8xf32> to vector<2x8xf32>
    %46 = vector.shape_cast %45 : vector<2x8xf32> to vector<2x8x1xf32>
    %47 = vector.broadcast %46 : vector<2x8x1xf32> to vector<2x8x8xf32>
    %48 = arith.divf %44, %47 : vector<2x8x8xf32>
    "tpu.trace_start"() <{level = 10 : i32, message = "bls,bsd->bld"}> : () -> ()
    %cst_25 = arith.constant dense<0.000000e+00> : vector<2x8x8xf32>
    %49 = tpu.matmul %48, %36, %cst_25 {dimension_numbers = #tpu.dot_dimension_numbers<[2], [1], [1], [2], [0, 0, 0, 1, 1, 2], [0], [0]>} : vector<2x8x8xf32>, vector<2x8x8xf32>, vector<2x8x8xf32> -> vector<2x8x8xf32>
    "tpu.trace_stop"() : () -> ()
    %50 = vector.shape_cast %49 : vector<2x8x8xf32> to vector<16x8xf32>
    %51 = vector.extract_strided_slice %14 {offsets = [8, 0], sizes = [8, 32], strides = [1, 1]} : vector<32x32xf32> to vector<8x32xf32>
    %cst_26 = arith.constant dense<0.000000e+00> : vector<16x32xf32>
    %52 = tpu.matmul %50, %51, %cst_26 {dimension_numbers = #tpu.dot_dimension_numbers<[1], [0], [0], [1], [0, 0, 1, 1], [], []>} : vector<16x8xf32>, vector<8x32xf32>, vector<16x32xf32> -> vector<16x32xf32>
    %53 = arith.addf %33, %52 : vector<16x32xf32>
    %54 = vector.extract_strided_slice %12 {offsets = [0, 0, 16], sizes = [2, 8, 8], strides = [1, 1, 1]} : vector<2x8x96xf32> to vector<2x8x8xf32>
    %55 = vector.extract_strided_slice %12 {offsets = [0, 0, 48], sizes = [2, 8, 8], strides = [1, 1, 1]} : vector<2x8x96xf32> to vector<2x8x8xf32>
    %56 = vector.extract_strided_slice %12 {offsets = [0, 0, 80], sizes = [2, 8, 8], strides = [1, 1, 1]} : vector<2x8x96xf32> to vector<2x8x8xf32>
    "tpu.trace_start"() <{level = 10 : i32, message = "bld,bsd->bls"}> : () -> ()
    %cst_27 = arith.constant dense<0.000000e+00> : vector<2x8x8xf32>
    %57 = tpu.matmul %54, %55, %cst_27 {dimension_numbers = #tpu.dot_dimension_numbers<[2], [2], [1], [1], [0, 0, 0, 1, 1, 1], [0], [0]>} : vector<2x8x8xf32>, vector<2x8x8xf32>, vector<2x8x8xf32> -> vector<2x8x8xf32>
    "tpu.trace_stop"() : () -> ()
    %cst_28 = arith.constant 0.353553385 : f32
    %58 = vector.broadcast %cst_28 : f32 to vector<2x8x8xf32>
    %59 = arith.mulf %57, %58 : vector<2x8x8xf32>
    %cst_29 = arith.constant dense<0xFF800000> : vector<2x8xf32>
    %60 = vector.multi_reduction <maximumf>, %59, %cst_29 [2] : vector<2x8x8xf32> to vector<2x8xf32>
    %61 = vector.shape_cast %60 : vector<2x8xf32> to vector<2x8x1xf32>
    %62 = vector.broadcast %61 : vector<2x8x1xf32> to vector<2x8x8xf32>
    %63 = arith.subf %59, %62 : vector<2x8x8xf32>
    %64 = math.exp %63 : vector<2x8x8xf32>
    %cst_30 = arith.constant dense<0.000000e+00> : vector<2x8xf32>
    %65 = vector.multi_reduction <add>, %64, %cst_30 [2] : vector<2x8x8xf32> to vector<2x8xf32>
    %66 = vector.shape_cast %65 : vector<2x8xf32> to vector<2x8x1xf32>
    %67 = vector.broadcast %66 : vector<2x8x1xf32> to vector<2x8x8xf32>
    %68 = arith.divf %64, %67 : vector<2x8x8xf32>
    "tpu.trace_start"() <{level = 10 : i32, message = "bls,bsd->bld"}> : () -> ()
    %cst_31 = arith.constant dense<0.000000e+00> : vector<2x8x8xf32>
    %69 = tpu.matmul %68, %56, %cst_31 {dimension_numbers = #tpu.dot_dimension_numbers<[2], [1], [1], [2], [0, 0, 0, 1, 1, 2], [0], [0]>} : vector<2x8x8xf32>, vector<2x8x8xf32>, vector<2x8x8xf32> -> vector<2x8x8xf32>
    "tpu.trace_stop"() : () -> ()
    %70 = vector.shape_cast %69 : vector<2x8x8xf32> to vector<16x8xf32>
    %71 = vector.extract_strided_slice %14 {offsets = [16, 0], sizes = [8, 32], strides = [1, 1]} : vector<32x32xf32> to vector<8x32xf32>
    %cst_32 = arith.constant dense<0.000000e+00> : vector<16x32xf32>
    %72 = tpu.matmul %70, %71, %cst_32 {dimension_numbers = #tpu.dot_dimension_numbers<[1], [0], [0], [1], [0, 0, 1, 1], [], []>} : vector<16x8xf32>, vector<8x32xf32>, vector<16x32xf32> -> vector<16x32xf32>
    %73 = arith.addf %53, %72 : vector<16x32xf32>
    %74 = vector.extract_strided_slice %12 {offsets = [0, 0, 24], sizes = [2, 8, 8], strides = [1, 1, 1]} : vector<2x8x96xf32> to vector<2x8x8xf32>
    %75 = vector.extract_strided_slice %12 {offsets = [0, 0, 56], sizes = [2, 8, 8], strides = [1, 1, 1]} : vector<2x8x96xf32> to vector<2x8x8xf32>
    %76 = vector.extract_strided_slice %12 {offsets = [0, 0, 88], sizes = [2, 8, 8], strides = [1, 1, 1]} : vector<2x8x96xf32> to vector<2x8x8xf32>
    "tpu.trace_start"() <{level = 10 : i32, message = "bld,bsd->bls"}> : () -> ()
    %cst_33 = arith.constant dense<0.000000e+00> : vector<2x8x8xf32>
    %77 = tpu.matmul %74, %75, %cst_33 {dimension_numbers = #tpu.dot_dimension_numbers<[2], [2], [1], [1], [0, 0, 0, 1, 1, 1], [0], [0]>} : vector<2x8x8xf32>, vector<2x8x8xf32>, vector<2x8x8xf32> -> vector<2x8x8xf32>
    "tpu.trace_stop"() : () -> ()
    %cst_34 = arith.constant 0.353553385 : f32
    %78 = vector.broadcast %cst_34 : f32 to vector<2x8x8xf32>
    %79 = arith.mulf %77, %78 : vector<2x8x8xf32>
    %cst_35 = arith.constant dense<0xFF800000> : vector<2x8xf32>
    %80 = vector.multi_reduction <maximumf>, %79, %cst_35 [2] : vector<2x8x8xf32> to vector<2x8xf32>
    %81 = vector.shape_cast %80 : vector<2x8xf32> to vector<2x8x1xf32>
    %82 = vector.broadcast %81 : vector<2x8x1xf32> to vector<2x8x8xf32>
    %83 = arith.subf %79, %82 : vector<2x8x8xf32>
    %84 = math.exp %83 : vector<2x8x8xf32>
    %cst_36 = arith.constant dense<0.000000e+00> : vector<2x8xf32>
    %85 = vector.multi_reduction <add>, %84, %cst_36 [2] : vector<2x8x8xf32> to vector<2x8xf32>
    %86 = vector.shape_cast %85 : vector<2x8xf32> to vector<2x8x1xf32>
    %87 = vector.broadcast %86 : vector<2x8x1xf32> to vector<2x8x8xf32>
    %88 = arith.divf %84, %87 : vector<2x8x8xf32>
    "tpu.trace_start"() <{level = 10 : i32, message = "bls,bsd->bld"}> : () -> ()
    %cst_37 = arith.constant dense<0.000000e+00> : vector<2x8x8xf32>
    %89 = tpu.matmul %88, %76, %cst_37 {dimension_numbers = #tpu.dot_dimension_numbers<[2], [1], [1], [2], [0, 0, 0, 1, 1, 2], [0], [0]>} : vector<2x8x8xf32>, vector<2x8x8xf32>, vector<2x8x8xf32> -> vector<2x8x8xf32>
    "tpu.trace_stop"() : () -> ()
    %90 = vector.shape_cast %89 : vector<2x8x8xf32> to vector<16x8xf32>
    %91 = vector.extract_strided_slice %14 {offsets = [24, 0], sizes = [8, 32], strides = [1, 1]} : vector<32x32xf32> to vector<8x32xf32>
    %cst_38 = arith.constant dense<0.000000e+00> : vector<16x32xf32>
    %92 = tpu.matmul %90, %91, %cst_38 {dimension_numbers = #tpu.dot_dimension_numbers<[1], [0], [0], [1], [0, 0, 1, 1], [], []>} : vector<16x8xf32>, vector<8x32xf32>, vector<16x32xf32> -> vector<16x32xf32>
    %93 = arith.addf %73, %92 : vector<16x32xf32>
    %c0_39 = arith.constant 0 : index
    %c0_40 = arith.constant 0 : index
    %c0_41 = arith.constant 0 : index
    %94 = vector.load %arg8[%c0_39, %c0_40, %c0_41] : memref<2x6x32xf32, #tpu.memory_space<vmem>>, vector<1x1x32xf32>
    %95 = vector.shape_cast %94 : vector<1x1x32xf32> to vector<1x32xf32>
    %96 = vector.broadcast %95 : vector<1x32xf32> to vector<16x32xf32>
    %97 = arith.addf %93, %96 : vector<16x32xf32>
    %98 = arith.addf %4, %97 : vector<16x32xf32>
    %c0_42 = arith.constant 0 : index
    %c2 = arith.constant 2 : index
    %c0_43 = arith.constant 0 : index
    %99 = vector.load %arg8[%c0_42, %c2, %c0_43] : memref<2x6x32xf32, #tpu.memory_space<vmem>>, vector<1x1x32xf32>
    %100 = vector.shape_cast %99 : vector<1x1x32xf32> to vector<1x32xf32>
    %c0_44 = arith.constant 0 : index
    %c3 = arith.constant 3 : index
    %c0_45 = arith.constant 0 : index
    %101 = vector.load %arg8[%c0_44, %c3, %c0_45] : memref<2x6x32xf32, #tpu.memory_space<vmem>>, vector<1x1x32xf32>
    %102 = vector.shape_cast %101 : vector<1x1x32xf32> to vector<1x32xf32>
    %cst_46 = arith.constant dense<0.000000e+00> : vector<16xf32>
    %103 = vector.multi_reduction <add>, %98, %cst_46 [1] : vector<16x32xf32> to vector<16xf32>
    %104 = vector.shape_cast %103 : vector<16xf32> to vector<16x1xf32>
    %cst_47 = arith.constant 3.200000e+01 : f32
    %105 = vector.broadcast %cst_47 : f32 to vector<16x1xf32>
    %106 = arith.divf %104, %105 : vector<16x1xf32>
    %107 = vector.broadcast %106 : vector<16x1xf32> to vector<16x32xf32>
    %108 = arith.subf %98, %107 : vector<16x32xf32>
    %109 = arith.mulf %108, %108 : vector<16x32xf32>
    %cst_48 = arith.constant dense<0.000000e+00> : vector<16xf32>
    %110 = vector.multi_reduction <add>, %109, %cst_48 [1] : vector<16x32xf32> to vector<16xf32>
    %111 = vector.shape_cast %110 : vector<16xf32> to vector<16x1xf32>
    %cst_49 = arith.constant 3.200000e+01 : f32
    %112 = vector.broadcast %cst_49 : f32 to vector<16x1xf32>
    %113 = arith.divf %111, %112 : vector<16x1xf32>
    %cst_50 = arith.constant 9.99999974E-6 : f32
    %114 = vector.broadcast %cst_50 : f32 to vector<16x1xf32>
    %115 = arith.addf %113, %114 : vector<16x1xf32>
    %116 = math.rsqrt %115 : vector<16x1xf32>
    %117 = vector.broadcast %116 : vector<16x1xf32> to vector<16x32xf32>
    %118 = arith.mulf %108, %117 : vector<16x32xf32>
    %119 = vector.broadcast %100 : vector<1x32xf32> to vector<16x32xf32>
    %120 = arith.mulf %118, %119 : vector<16x32xf32>
    %121 = vector.broadcast %102 : vector<1x32xf32> to vector<16x32xf32>
    %122 = arith.addf %120, %121 : vector<16x32xf32>
    %c0_51 = arith.constant 0 : index
    %c0_52 = arith.constant 0 : index
    %c0_53 = arith.constant 0 : index
    %123 = vector.load %arg9[%c0_51, %c0_52, %c0_53] : memref<2x32x64xf32, #tpu.memory_space<vmem>>, vector<1x32x64xf32>
    %124 = vector.shape_cast %123 : vector<1x32x64xf32> to vector<32x64xf32>
    %cst_54 = arith.constant dense<0.000000e+00> : vector<16x64xf32>
    %125 = tpu.matmul %122, %124, %cst_54 {dimension_numbers = #tpu.dot_dimension_numbers<[1], [0], [0], [1], [0, 0, 1, 1], [], []>} : vector<16x32xf32>, vector<32x64xf32>, vector<16x64xf32> -> vector<16x64xf32>
    %c0_55 = arith.constant 0 : index
    %c0_56 = arith.constant 0 : index
    %c0_57 = arith.constant 0 : index
    %126 = vector.load %arg10[%c0_55, %c0_56, %c0_57] : memref<2x1x64xf32, #tpu.memory_space<vmem>>, vector<1x1x64xf32>
    %127 = vector.shape_cast %126 : vector<1x1x64xf32> to vector<1x64xf32>
    %128 = vector.broadcast %127 : vector<1x64xf32> to vector<16x64xf32>
    %129 = arith.addf %125, %128 : vector<16x64xf32>
    %cst_58 = arith.constant 0.000000e+00 : f32
    %130 = vector.broadcast %cst_58 : f32 to vector<16x64xf32>
    %131 = arith.maximumf %129, %130 : vector<16x64xf32>
    %c0_59 = arith.constant 0 : index
    %c0_60 = arith.constant 0 : index
    %c0_61 = arith.constant 0 : index
    %132 = vector.load %arg11[%c0_59, %c0_60, %c0_61] : memref<2x64x32xf32, #tpu.memory_space<vmem>>, vector<1x64x32xf32>
    %133 = vector.shape_cast %132 : vector<1x64x32xf32> to vector<64x32xf32>
    %cst_62 = arith.constant dense<0.000000e+00> : vector<16x32xf32>
    %134 = tpu.matmul %131, %133, %cst_62 {dimension_numbers = #tpu.dot_dimension_numbers<[1], [0], [0], [1], [0, 0, 1, 1], [], []>} : vector<16x64xf32>, vector<64x32xf32>, vector<16x32xf32> -> vector<16x32xf32>
    %c0_63 = arith.constant 0 : index
    %c1 = arith.constant 1 : index
    %c0_64 = arith.constant 0 : index
    %135 = vector.load %arg8[%c0_63, %c1, %c0_64] : memref<2x6x32xf32, #tpu.memory_space<vmem>>, vector<1x1x32xf32>
    %136 = vector.shape_cast %135 : vector<1x1x32xf32> to vector<1x32xf32>
    %137 = vector.broadcast %136 : vector<1x32xf32> to vector<16x32xf32>
    %138 = arith.addf %134, %137 : vector<16x32xf32>
    %139 = arith.addf %122, %138 : vector<16x32xf32>
    %c0_65 = arith.constant 0 : index
    %c4 = arith.constant 4 : index
    %c0_66 = arith.constant 0 : index
    %140 = vector.load %arg8[%c0_65, %c4, %c0_66] : memref<2x6x32xf32, #tpu.memory_space<vmem>>, vector<1x1x32xf32>
    %141 = vector.shape_cast %140 : vector<1x1x32xf32> to vector<1x32xf32>
    %c0_67 = arith.constant 0 : index
    %c5 = arith.constant 5 : index
    %c0_68 = arith.constant 0 : index
    %142 = vector.load %arg8[%c0_67, %c5, %c0_68] : memref<2x6x32xf32, #tpu.memory_space<vmem>>, vector<1x1x32xf32>
    %143 = vector.shape_cast %142 : vector<1x1x32xf32> to vector<1x32xf32>
    %cst_69 = arith.constant dense<0.000000e+00> : vector<16xf32>
    %144 = vector.multi_reduction <add>, %139, %cst_69 [1] : vector<16x32xf32> to vector<16xf32>
    %145 = vector.shape_cast %144 : vector<16xf32> to vector<16x1xf32>
    %cst_70 = arith.constant 3.200000e+01 : f32
    %146 = vector.broadcast %cst_70 : f32 to vector<16x1xf32>
    %147 = arith.divf %145, %146 : vector<16x1xf32>
    %148 = vector.broadcast %147 : vector<16x1xf32> to vector<16x32xf32>
    %149 = arith.subf %139, %148 : vector<16x32xf32>
    %150 = arith.mulf %149, %149 : vector<16x32xf32>
    %cst_71 = arith.constant dense<0.000000e+00> : vector<16xf32>
    %151 = vector.multi_reduction <add>, %150, %cst_71 [1] : vector<16x32xf32> to vector<16xf32>
    %152 = vector.shape_cast %151 : vector<16xf32> to vector<16x1xf32>
    %cst_72 = arith.constant 3.200000e+01 : f32
    %153 = vector.broadcast %cst_72 : f32 to vector<16x1xf32>
    %154 = arith.divf %152, %153 : vector<16x1xf32>
    %cst_73 = arith.constant 9.99999974E-6 : f32
    %155 = vector.broadcast %cst_73 : f32 to vector<16x1xf32>
    %156 = arith.addf %154, %155 : vector<16x1xf32>
    %157 = math.rsqrt %156 : vector<16x1xf32>
    %158 = vector.broadcast %157 : vector<16x1xf32> to vector<16x32xf32>
    %159 = arith.mulf %149, %158 : vector<16x32xf32>
    %160 = vector.broadcast %141 : vector<1x32xf32> to vector<16x32xf32>
    %161 = arith.mulf %159, %160 : vector<16x32xf32>
    %162 = vector.broadcast %143 : vector<1x32xf32> to vector<16x32xf32>
    %163 = arith.addf %161, %162 : vector<16x32xf32>
    %c1_74 = arith.constant 1 : index
    %c0_75 = arith.constant 0 : index
    %c0_76 = arith.constant 0 : index
    %164 = vector.load %arg5[%c1_74, %c0_75, %c0_76] : memref<2x32x96xf32, #tpu.memory_space<vmem>>, vector<1x32x96xf32>
    %165 = vector.shape_cast %164 : vector<1x32x96xf32> to vector<32x96xf32>
    %cst_77 = arith.constant dense<0.000000e+00> : vector<16x96xf32>
    %166 = tpu.matmul %163, %165, %cst_77 {dimension_numbers = #tpu.dot_dimension_numbers<[1], [0], [0], [1], [0, 0, 1, 1], [], []>} : vector<16x32xf32>, vector<32x96xf32>, vector<16x96xf32> -> vector<16x96xf32>
    %c1_78 = arith.constant 1 : index
    %c0_79 = arith.constant 0 : index
    %c0_80 = arith.constant 0 : index
    %167 = vector.load %arg6[%c1_78, %c0_79, %c0_80] : memref<2x1x96xf32, #tpu.memory_space<vmem>>, vector<1x1x96xf32>
    %168 = vector.shape_cast %167 : vector<1x1x96xf32> to vector<1x96xf32>
    %169 = vector.broadcast %168 : vector<1x96xf32> to vector<16x96xf32>
    %170 = arith.addf %166, %169 : vector<16x96xf32>
    %171 = vector.shape_cast %170 : vector<16x96xf32> to vector<2x8x96xf32>
    %c1_81 = arith.constant 1 : index
    %c0_82 = arith.constant 0 : index
    %c0_83 = arith.constant 0 : index
    %172 = vector.load %arg7[%c1_81, %c0_82, %c0_83] : memref<2x32x32xf32, #tpu.memory_space<vmem>>, vector<1x32x32xf32>
    %173 = vector.shape_cast %172 : vector<1x32x32xf32> to vector<32x32xf32>
    %174 = vector.extract_strided_slice %171 {offsets = [0, 0, 0], sizes = [2, 8, 8], strides = [1, 1, 1]} : vector<2x8x96xf32> to vector<2x8x8xf32>
    %175 = vector.extract_strided_slice %171 {offsets = [0, 0, 32], sizes = [2, 8, 8], strides = [1, 1, 1]} : vector<2x8x96xf32> to vector<2x8x8xf32>
    %176 = vector.extract_strided_slice %171 {offsets = [0, 0, 64], sizes = [2, 8, 8], strides = [1, 1, 1]} : vector<2x8x96xf32> to vector<2x8x8xf32>
    "tpu.trace_start"() <{level = 10 : i32, message = "bld,bsd->bls"}> : () -> ()
    %cst_84 = arith.constant dense<0.000000e+00> : vector<2x8x8xf32>
    %177 = tpu.matmul %174, %175, %cst_84 {dimension_numbers = #tpu.dot_dimension_numbers<[2], [2], [1], [1], [0, 0, 0, 1, 1, 1], [0], [0]>} : vector<2x8x8xf32>, vector<2x8x8xf32>, vector<2x8x8xf32> -> vector<2x8x8xf32>
    "tpu.trace_stop"() : () -> ()
    %cst_85 = arith.constant 0.353553385 : f32
    %178 = vector.broadcast %cst_85 : f32 to vector<2x8x8xf32>
    %179 = arith.mulf %177, %178 : vector<2x8x8xf32>
    %cst_86 = arith.constant dense<0xFF800000> : vector<2x8xf32>
    %180 = vector.multi_reduction <maximumf>, %179, %cst_86 [2] : vector<2x8x8xf32> to vector<2x8xf32>
    %181 = vector.shape_cast %180 : vector<2x8xf32> to vector<2x8x1xf32>
    %182 = vector.broadcast %181 : vector<2x8x1xf32> to vector<2x8x8xf32>
    %183 = arith.subf %179, %182 : vector<2x8x8xf32>
    %184 = math.exp %183 : vector<2x8x8xf32>
    %cst_87 = arith.constant dense<0.000000e+00> : vector<2x8xf32>
    %185 = vector.multi_reduction <add>, %184, %cst_87 [2] : vector<2x8x8xf32> to vector<2x8xf32>
    %186 = vector.shape_cast %185 : vector<2x8xf32> to vector<2x8x1xf32>
    %187 = vector.broadcast %186 : vector<2x8x1xf32> to vector<2x8x8xf32>
    %188 = arith.divf %184, %187 : vector<2x8x8xf32>
    "tpu.trace_start"() <{level = 10 : i32, message = "bls,bsd->bld"}> : () -> ()
    %cst_88 = arith.constant dense<0.000000e+00> : vector<2x8x8xf32>
    %189 = tpu.matmul %188, %176, %cst_88 {dimension_numbers = #tpu.dot_dimension_numbers<[2], [1], [1], [2], [0, 0, 0, 1, 1, 2], [0], [0]>} : vector<2x8x8xf32>, vector<2x8x8xf32>, vector<2x8x8xf32> -> vector<2x8x8xf32>
    "tpu.trace_stop"() : () -> ()
    %190 = vector.shape_cast %189 : vector<2x8x8xf32> to vector<16x8xf32>
    %191 = vector.extract_strided_slice %173 {offsets = [0, 0], sizes = [8, 32], strides = [1, 1]} : vector<32x32xf32> to vector<8x32xf32>
    %cst_89 = arith.constant dense<0.000000e+00> : vector<16x32xf32>
    %192 = tpu.matmul %190, %191, %cst_89 {dimension_numbers = #tpu.dot_dimension_numbers<[1], [0], [0], [1], [0, 0, 1, 1], [], []>} : vector<16x8xf32>, vector<8x32xf32>, vector<16x32xf32> -> vector<16x32xf32>
    %193 = vector.extract_strided_slice %171 {offsets = [0, 0, 8], sizes = [2, 8, 8], strides = [1, 1, 1]} : vector<2x8x96xf32> to vector<2x8x8xf32>
    %194 = vector.extract_strided_slice %171 {offsets = [0, 0, 40], sizes = [2, 8, 8], strides = [1, 1, 1]} : vector<2x8x96xf32> to vector<2x8x8xf32>
    %195 = vector.extract_strided_slice %171 {offsets = [0, 0, 72], sizes = [2, 8, 8], strides = [1, 1, 1]} : vector<2x8x96xf32> to vector<2x8x8xf32>
    "tpu.trace_start"() <{level = 10 : i32, message = "bld,bsd->bls"}> : () -> ()
    %cst_90 = arith.constant dense<0.000000e+00> : vector<2x8x8xf32>
    %196 = tpu.matmul %193, %194, %cst_90 {dimension_numbers = #tpu.dot_dimension_numbers<[2], [2], [1], [1], [0, 0, 0, 1, 1, 1], [0], [0]>} : vector<2x8x8xf32>, vector<2x8x8xf32>, vector<2x8x8xf32> -> vector<2x8x8xf32>
    "tpu.trace_stop"() : () -> ()
    %cst_91 = arith.constant 0.353553385 : f32
    %197 = vector.broadcast %cst_91 : f32 to vector<2x8x8xf32>
    %198 = arith.mulf %196, %197 : vector<2x8x8xf32>
    %cst_92 = arith.constant dense<0xFF800000> : vector<2x8xf32>
    %199 = vector.multi_reduction <maximumf>, %198, %cst_92 [2] : vector<2x8x8xf32> to vector<2x8xf32>
    %200 = vector.shape_cast %199 : vector<2x8xf32> to vector<2x8x1xf32>
    %201 = vector.broadcast %200 : vector<2x8x1xf32> to vector<2x8x8xf32>
    %202 = arith.subf %198, %201 : vector<2x8x8xf32>
    %203 = math.exp %202 : vector<2x8x8xf32>
    %cst_93 = arith.constant dense<0.000000e+00> : vector<2x8xf32>
    %204 = vector.multi_reduction <add>, %203, %cst_93 [2] : vector<2x8x8xf32> to vector<2x8xf32>
    %205 = vector.shape_cast %204 : vector<2x8xf32> to vector<2x8x1xf32>
    %206 = vector.broadcast %205 : vector<2x8x1xf32> to vector<2x8x8xf32>
    %207 = arith.divf %203, %206 : vector<2x8x8xf32>
    "tpu.trace_start"() <{level = 10 : i32, message = "bls,bsd->bld"}> : () -> ()
    %cst_94 = arith.constant dense<0.000000e+00> : vector<2x8x8xf32>
    %208 = tpu.matmul %207, %195, %cst_94 {dimension_numbers = #tpu.dot_dimension_numbers<[2], [1], [1], [2], [0, 0, 0, 1, 1, 2], [0], [0]>} : vector<2x8x8xf32>, vector<2x8x8xf32>, vector<2x8x8xf32> -> vector<2x8x8xf32>
    "tpu.trace_stop"() : () -> ()
    %209 = vector.shape_cast %208 : vector<2x8x8xf32> to vector<16x8xf32>
    %210 = vector.extract_strided_slice %173 {offsets = [8, 0], sizes = [8, 32], strides = [1, 1]} : vector<32x32xf32> to vector<8x32xf32>
    %cst_95 = arith.constant dense<0.000000e+00> : vector<16x32xf32>
    %211 = tpu.matmul %209, %210, %cst_95 {dimension_numbers = #tpu.dot_dimension_numbers<[1], [0], [0], [1], [0, 0, 1, 1], [], []>} : vector<16x8xf32>, vector<8x32xf32>, vector<16x32xf32> -> vector<16x32xf32>
    %212 = arith.addf %192, %211 : vector<16x32xf32>
    %213 = vector.extract_strided_slice %171 {offsets = [0, 0, 16], sizes = [2, 8, 8], strides = [1, 1, 1]} : vector<2x8x96xf32> to vector<2x8x8xf32>
    %214 = vector.extract_strided_slice %171 {offsets = [0, 0, 48], sizes = [2, 8, 8], strides = [1, 1, 1]} : vector<2x8x96xf32> to vector<2x8x8xf32>
    %215 = vector.extract_strided_slice %171 {offsets = [0, 0, 80], sizes = [2, 8, 8], strides = [1, 1, 1]} : vector<2x8x96xf32> to vector<2x8x8xf32>
    "tpu.trace_start"() <{level = 10 : i32, message = "bld,bsd->bls"}> : () -> ()
    %cst_96 = arith.constant dense<0.000000e+00> : vector<2x8x8xf32>
    %216 = tpu.matmul %213, %214, %cst_96 {dimension_numbers = #tpu.dot_dimension_numbers<[2], [2], [1], [1], [0, 0, 0, 1, 1, 1], [0], [0]>} : vector<2x8x8xf32>, vector<2x8x8xf32>, vector<2x8x8xf32> -> vector<2x8x8xf32>
    "tpu.trace_stop"() : () -> ()
    %cst_97 = arith.constant 0.353553385 : f32
    %217 = vector.broadcast %cst_97 : f32 to vector<2x8x8xf32>
    %218 = arith.mulf %216, %217 : vector<2x8x8xf32>
    %cst_98 = arith.constant dense<0xFF800000> : vector<2x8xf32>
    %219 = vector.multi_reduction <maximumf>, %218, %cst_98 [2] : vector<2x8x8xf32> to vector<2x8xf32>
    %220 = vector.shape_cast %219 : vector<2x8xf32> to vector<2x8x1xf32>
    %221 = vector.broadcast %220 : vector<2x8x1xf32> to vector<2x8x8xf32>
    %222 = arith.subf %218, %221 : vector<2x8x8xf32>
    %223 = math.exp %222 : vector<2x8x8xf32>
    %cst_99 = arith.constant dense<0.000000e+00> : vector<2x8xf32>
    %224 = vector.multi_reduction <add>, %223, %cst_99 [2] : vector<2x8x8xf32> to vector<2x8xf32>
    %225 = vector.shape_cast %224 : vector<2x8xf32> to vector<2x8x1xf32>
    %226 = vector.broadcast %225 : vector<2x8x1xf32> to vector<2x8x8xf32>
    %227 = arith.divf %223, %226 : vector<2x8x8xf32>
    "tpu.trace_start"() <{level = 10 : i32, message = "bls,bsd->bld"}> : () -> ()
    %cst_100 = arith.constant dense<0.000000e+00> : vector<2x8x8xf32>
    %228 = tpu.matmul %227, %215, %cst_100 {dimension_numbers = #tpu.dot_dimension_numbers<[2], [1], [1], [2], [0, 0, 0, 1, 1, 2], [0], [0]>} : vector<2x8x8xf32>, vector<2x8x8xf32>, vector<2x8x8xf32> -> vector<2x8x8xf32>
    "tpu.trace_stop"() : () -> ()
    %229 = vector.shape_cast %228 : vector<2x8x8xf32> to vector<16x8xf32>
    %230 = vector.extract_strided_slice %173 {offsets = [16, 0], sizes = [8, 32], strides = [1, 1]} : vector<32x32xf32> to vector<8x32xf32>
    %cst_101 = arith.constant dense<0.000000e+00> : vector<16x32xf32>
    %231 = tpu.matmul %229, %230, %cst_101 {dimension_numbers = #tpu.dot_dimension_numbers<[1], [0], [0], [1], [0, 0, 1, 1], [], []>} : vector<16x8xf32>, vector<8x32xf32>, vector<16x32xf32> -> vector<16x32xf32>
    %232 = arith.addf %212, %231 : vector<16x32xf32>
    %233 = vector.extract_strided_slice %171 {offsets = [0, 0, 24], sizes = [2, 8, 8], strides = [1, 1, 1]} : vector<2x8x96xf32> to vector<2x8x8xf32>
    %234 = vector.extract_strided_slice %171 {offsets = [0, 0, 56], sizes = [2, 8, 8], strides = [1, 1, 1]} : vector<2x8x96xf32> to vector<2x8x8xf32>
    %235 = vector.extract_strided_slice %171 {offsets = [0, 0, 88], sizes = [2, 8, 8], strides = [1, 1, 1]} : vector<2x8x96xf32> to vector<2x8x8xf32>
    "tpu.trace_start"() <{level = 10 : i32, message = "bld,bsd->bls"}> : () -> ()
    %cst_102 = arith.constant dense<0.000000e+00> : vector<2x8x8xf32>
    %236 = tpu.matmul %233, %234, %cst_102 {dimension_numbers = #tpu.dot_dimension_numbers<[2], [2], [1], [1], [0, 0, 0, 1, 1, 1], [0], [0]>} : vector<2x8x8xf32>, vector<2x8x8xf32>, vector<2x8x8xf32> -> vector<2x8x8xf32>
    "tpu.trace_stop"() : () -> ()
    %cst_103 = arith.constant 0.353553385 : f32
    %237 = vector.broadcast %cst_103 : f32 to vector<2x8x8xf32>
    %238 = arith.mulf %236, %237 : vector<2x8x8xf32>
    %cst_104 = arith.constant dense<0xFF800000> : vector<2x8xf32>
    %239 = vector.multi_reduction <maximumf>, %238, %cst_104 [2] : vector<2x8x8xf32> to vector<2x8xf32>
    %240 = vector.shape_cast %239 : vector<2x8xf32> to vector<2x8x1xf32>
    %241 = vector.broadcast %240 : vector<2x8x1xf32> to vector<2x8x8xf32>
    %242 = arith.subf %238, %241 : vector<2x8x8xf32>
    %243 = math.exp %242 : vector<2x8x8xf32>
    %cst_105 = arith.constant dense<0.000000e+00> : vector<2x8xf32>
    %244 = vector.multi_reduction <add>, %243, %cst_105 [2] : vector<2x8x8xf32> to vector<2x8xf32>
    %245 = vector.shape_cast %244 : vector<2x8xf32> to vector<2x8x1xf32>
    %246 = vector.broadcast %245 : vector<2x8x1xf32> to vector<2x8x8xf32>
    %247 = arith.divf %243, %246 : vector<2x8x8xf32>
    "tpu.trace_start"() <{level = 10 : i32, message = "bls,bsd->bld"}> : () -> ()
    %cst_106 = arith.constant dense<0.000000e+00> : vector<2x8x8xf32>
    %248 = tpu.matmul %247, %235, %cst_106 {dimension_numbers = #tpu.dot_dimension_numbers<[2], [1], [1], [2], [0, 0, 0, 1, 1, 2], [0], [0]>} : vector<2x8x8xf32>, vector<2x8x8xf32>, vector<2x8x8xf32> -> vector<2x8x8xf32>
    "tpu.trace_stop"() : () -> ()
    %249 = vector.shape_cast %248 : vector<2x8x8xf32> to vector<16x8xf32>
    %250 = vector.extract_strided_slice %173 {offsets = [24, 0], sizes = [8, 32], strides = [1, 1]} : vector<32x32xf32> to vector<8x32xf32>
    %cst_107 = arith.constant dense<0.000000e+00> : vector<16x32xf32>
    %251 = tpu.matmul %249, %250, %cst_107 {dimension_numbers = #tpu.dot_dimension_numbers<[1], [0], [0], [1], [0, 0, 1, 1], [], []>} : vector<16x8xf32>, vector<8x32xf32>, vector<16x32xf32> -> vector<16x32xf32>
    %252 = arith.addf %232, %251 : vector<16x32xf32>
    %c1_108 = arith.constant 1 : index
    %c0_109 = arith.constant 0 : index
    %c0_110 = arith.constant 0 : index
    %253 = vector.load %arg8[%c1_108, %c0_109, %c0_110] : memref<2x6x32xf32, #tpu.memory_space<vmem>>, vector<1x1x32xf32>
    %254 = vector.shape_cast %253 : vector<1x1x32xf32> to vector<1x32xf32>
    %255 = vector.broadcast %254 : vector<1x32xf32> to vector<16x32xf32>
    %256 = arith.addf %252, %255 : vector<16x32xf32>
    %257 = arith.addf %163, %256 : vector<16x32xf32>
    %c1_111 = arith.constant 1 : index
    %c2_112 = arith.constant 2 : index
    %c0_113 = arith.constant 0 : index
    %258 = vector.load %arg8[%c1_111, %c2_112, %c0_113] : memref<2x6x32xf32, #tpu.memory_space<vmem>>, vector<1x1x32xf32>
    %259 = vector.shape_cast %258 : vector<1x1x32xf32> to vector<1x32xf32>
    %c1_114 = arith.constant 1 : index
    %c3_115 = arith.constant 3 : index
    %c0_116 = arith.constant 0 : index
    %260 = vector.load %arg8[%c1_114, %c3_115, %c0_116] : memref<2x6x32xf32, #tpu.memory_space<vmem>>, vector<1x1x32xf32>
    %261 = vector.shape_cast %260 : vector<1x1x32xf32> to vector<1x32xf32>
    %cst_117 = arith.constant dense<0.000000e+00> : vector<16xf32>
    %262 = vector.multi_reduction <add>, %257, %cst_117 [1] : vector<16x32xf32> to vector<16xf32>
    %263 = vector.shape_cast %262 : vector<16xf32> to vector<16x1xf32>
    %cst_118 = arith.constant 3.200000e+01 : f32
    %264 = vector.broadcast %cst_118 : f32 to vector<16x1xf32>
    %265 = arith.divf %263, %264 : vector<16x1xf32>
    %266 = vector.broadcast %265 : vector<16x1xf32> to vector<16x32xf32>
    %267 = arith.subf %257, %266 : vector<16x32xf32>
    %268 = arith.mulf %267, %267 : vector<16x32xf32>
    %cst_119 = arith.constant dense<0.000000e+00> : vector<16xf32>
    %269 = vector.multi_reduction <add>, %268, %cst_119 [1] : vector<16x32xf32> to vector<16xf32>
    %270 = vector.shape_cast %269 : vector<16xf32> to vector<16x1xf32>
    %cst_120 = arith.constant 3.200000e+01 : f32
    %271 = vector.broadcast %cst_120 : f32 to vector<16x1xf32>
    %272 = arith.divf %270, %271 : vector<16x1xf32>
    %cst_121 = arith.constant 9.99999974E-6 : f32
    %273 = vector.broadcast %cst_121 : f32 to vector<16x1xf32>
    %274 = arith.addf %272, %273 : vector<16x1xf32>
    %275 = math.rsqrt %274 : vector<16x1xf32>
    %276 = vector.broadcast %275 : vector<16x1xf32> to vector<16x32xf32>
    %277 = arith.mulf %267, %276 : vector<16x32xf32>
    %278 = vector.broadcast %259 : vector<1x32xf32> to vector<16x32xf32>
    %279 = arith.mulf %277, %278 : vector<16x32xf32>
    %280 = vector.broadcast %261 : vector<1x32xf32> to vector<16x32xf32>
    %281 = arith.addf %279, %280 : vector<16x32xf32>
    %c1_122 = arith.constant 1 : index
    %c0_123 = arith.constant 0 : index
    %c0_124 = arith.constant 0 : index
    %282 = vector.load %arg9[%c1_122, %c0_123, %c0_124] : memref<2x32x64xf32, #tpu.memory_space<vmem>>, vector<1x32x64xf32>
    %283 = vector.shape_cast %282 : vector<1x32x64xf32> to vector<32x64xf32>
    %cst_125 = arith.constant dense<0.000000e+00> : vector<16x64xf32>
    %284 = tpu.matmul %281, %283, %cst_125 {dimension_numbers = #tpu.dot_dimension_numbers<[1], [0], [0], [1], [0, 0, 1, 1], [], []>} : vector<16x32xf32>, vector<32x64xf32>, vector<16x64xf32> -> vector<16x64xf32>
    %c1_126 = arith.constant 1 : index
    %c0_127 = arith.constant 0 : index
    %c0_128 = arith.constant 0 : index
    %285 = vector.load %arg10[%c1_126, %c0_127, %c0_128] : memref<2x1x64xf32, #tpu.memory_space<vmem>>, vector<1x1x64xf32>
    %286 = vector.shape_cast %285 : vector<1x1x64xf32> to vector<1x64xf32>
    %287 = vector.broadcast %286 : vector<1x64xf32> to vector<16x64xf32>
    %288 = arith.addf %284, %287 : vector<16x64xf32>
    %cst_129 = arith.constant 0.000000e+00 : f32
    %289 = vector.broadcast %cst_129 : f32 to vector<16x64xf32>
    %290 = arith.maximumf %288, %289 : vector<16x64xf32>
    %c1_130 = arith.constant 1 : index
    %c0_131 = arith.constant 0 : index
    %c0_132 = arith.constant 0 : index
    %291 = vector.load %arg11[%c1_130, %c0_131, %c0_132] : memref<2x64x32xf32, #tpu.memory_space<vmem>>, vector<1x64x32xf32>
    %292 = vector.shape_cast %291 : vector<1x64x32xf32> to vector<64x32xf32>
    %cst_133 = arith.constant dense<0.000000e+00> : vector<16x32xf32>
    %293 = tpu.matmul %290, %292, %cst_133 {dimension_numbers = #tpu.dot_dimension_numbers<[1], [0], [0], [1], [0, 0, 1, 1], [], []>} : vector<16x64xf32>, vector<64x32xf32>, vector<16x32xf32> -> vector<16x32xf32>
    %c1_134 = arith.constant 1 : index
    %c1_135 = arith.constant 1 : index
    %c0_136 = arith.constant 0 : index
    %294 = vector.load %arg8[%c1_134, %c1_135, %c0_136] : memref<2x6x32xf32, #tpu.memory_space<vmem>>, vector<1x1x32xf32>
    %295 = vector.shape_cast %294 : vector<1x1x32xf32> to vector<1x32xf32>
    %296 = vector.broadcast %295 : vector<1x32xf32> to vector<16x32xf32>
    %297 = arith.addf %293, %296 : vector<16x32xf32>
    %298 = arith.addf %281, %297 : vector<16x32xf32>
    %c1_137 = arith.constant 1 : index
    %c4_138 = arith.constant 4 : index
    %c0_139 = arith.constant 0 : index
    %299 = vector.load %arg8[%c1_137, %c4_138, %c0_139] : memref<2x6x32xf32, #tpu.memory_space<vmem>>, vector<1x1x32xf32>
    %300 = vector.shape_cast %299 : vector<1x1x32xf32> to vector<1x32xf32>
    %c1_140 = arith.constant 1 : index
    %c5_141 = arith.constant 5 : index
    %c0_142 = arith.constant 0 : index
    %301 = vector.load %arg8[%c1_140, %c5_141, %c0_142] : memref<2x6x32xf32, #tpu.memory_space<vmem>>, vector<1x1x32xf32>
    %302 = vector.shape_cast %301 : vector<1x1x32xf32> to vector<1x32xf32>
    %cst_143 = arith.constant dense<0.000000e+00> : vector<16xf32>
    %303 = vector.multi_reduction <add>, %298, %cst_143 [1] : vector<16x32xf32> to vector<16xf32>
    %304 = vector.shape_cast %303 : vector<16xf32> to vector<16x1xf32>
    %cst_144 = arith.constant 3.200000e+01 : f32
    %305 = vector.broadcast %cst_144 : f32 to vector<16x1xf32>
    %306 = arith.divf %304, %305 : vector<16x1xf32>
    %307 = vector.broadcast %306 : vector<16x1xf32> to vector<16x32xf32>
    %308 = arith.subf %298, %307 : vector<16x32xf32>
    %309 = arith.mulf %308, %308 : vector<16x32xf32>
    %cst_145 = arith.constant dense<0.000000e+00> : vector<16xf32>
    %310 = vector.multi_reduction <add>, %309, %cst_145 [1] : vector<16x32xf32> to vector<16xf32>
    %311 = vector.shape_cast %310 : vector<16xf32> to vector<16x1xf32>
    %cst_146 = arith.constant 3.200000e+01 : f32
    %312 = vector.broadcast %cst_146 : f32 to vector<16x1xf32>
    %313 = arith.divf %311, %312 : vector<16x1xf32>
    %cst_147 = arith.constant 9.99999974E-6 : f32
    %314 = vector.broadcast %cst_147 : f32 to vector<16x1xf32>
    %315 = arith.addf %313, %314 : vector<16x1xf32>
    %316 = math.rsqrt %315 : vector<16x1xf32>
    %317 = vector.broadcast %316 : vector<16x1xf32> to vector<16x32xf32>
    %318 = arith.mulf %308, %317 : vector<16x32xf32>
    %319 = vector.broadcast %300 : vector<1x32xf32> to vector<16x32xf32>
    %320 = arith.mulf %318, %319 : vector<16x32xf32>
    %321 = vector.broadcast %302 : vector<1x32xf32> to vector<16x32xf32>
    %322 = arith.addf %320, %321 : vector<16x32xf32>
    %c0_148 = arith.constant 0 : index
    %c0_149 = arith.constant 0 : index
    %323 = vector.load %arg12[%c0_148, %c0_149] : memref<2x32xf32, #tpu.memory_space<vmem>>, vector<1x32xf32>
    %c1_150 = arith.constant 1 : index
    %c0_151 = arith.constant 0 : index
    %324 = vector.load %arg12[%c1_150, %c0_151] : memref<2x32xf32, #tpu.memory_space<vmem>>, vector<1x32xf32>
    %cst_152 = arith.constant dense<0.000000e+00> : vector<16xf32>
    %325 = vector.multi_reduction <add>, %322, %cst_152 [1] : vector<16x32xf32> to vector<16xf32>
    %326 = vector.shape_cast %325 : vector<16xf32> to vector<16x1xf32>
    %cst_153 = arith.constant 3.200000e+01 : f32
    %327 = vector.broadcast %cst_153 : f32 to vector<16x1xf32>
    %328 = arith.divf %326, %327 : vector<16x1xf32>
    %329 = vector.broadcast %328 : vector<16x1xf32> to vector<16x32xf32>
    %330 = arith.subf %322, %329 : vector<16x32xf32>
    %331 = arith.mulf %330, %330 : vector<16x32xf32>
    %cst_154 = arith.constant dense<0.000000e+00> : vector<16xf32>
    %332 = vector.multi_reduction <add>, %331, %cst_154 [1] : vector<16x32xf32> to vector<16xf32>
    %333 = vector.shape_cast %332 : vector<16xf32> to vector<16x1xf32>
    %cst_155 = arith.constant 3.200000e+01 : f32
    %334 = vector.broadcast %cst_155 : f32 to vector<16x1xf32>
    %335 = arith.divf %333, %334 : vector<16x1xf32>
    %cst_156 = arith.constant 9.99999974E-6 : f32
    %336 = vector.broadcast %cst_156 : f32 to vector<16x1xf32>
    %337 = arith.addf %335, %336 : vector<16x1xf32>
    %338 = math.rsqrt %337 : vector<16x1xf32>
    %339 = vector.broadcast %338 : vector<16x1xf32> to vector<16x32xf32>
    %340 = arith.mulf %330, %339 : vector<16x32xf32>
    %341 = vector.broadcast %323 : vector<1x32xf32> to vector<16x32xf32>
    %342 = arith.mulf %340, %341 : vector<16x32xf32>
    %343 = vector.broadcast %324 : vector<1x32xf32> to vector<16x32xf32>
    %344 = arith.addf %342, %343 : vector<16x32xf32>
    %cst_157 = arith.constant 5.000000e-01 : f32
    %345 = vector.broadcast %cst_157 : f32 to vector<16x32xf32>
    %346 = arith.mulf %345, %344 : vector<16x32xf32>
    %cst_158 = arith.constant 0.707106769 : f32
    %347 = vector.broadcast %cst_158 : f32 to vector<16x32xf32>
    %348 = arith.mulf %344, %347 : vector<16x32xf32>
    %349 = math.absf %348 : vector<16x32xf32>
    %cst_159 = arith.constant 0.327591091 : f32
    %350 = vector.broadcast %cst_159 : f32 to vector<16x32xf32>
    %351 = arith.mulf %350, %349 : vector<16x32xf32>
    %cst_160 = arith.constant 1.000000e+00 : f32
    %352 = vector.broadcast %cst_160 : f32 to vector<16x32xf32>
    %353 = arith.addf %352, %351 : vector<16x32xf32>
    %cst_161 = arith.constant 1.000000e+00 : f32
    %354 = vector.broadcast %cst_161 : f32 to vector<16x32xf32>
    %355 = arith.divf %354, %353 : vector<16x32xf32>
    %cst_162 = arith.constant 1.06140542 : f32
    %356 = vector.broadcast %cst_162 : f32 to vector<16x32xf32>
    %357 = arith.mulf %355, %356 : vector<16x32xf32>
    %cst_163 = arith.constant -1.45315206 : f32
    %358 = vector.broadcast %cst_163 : f32 to vector<16x32xf32>
    %359 = arith.addf %358, %357 : vector<16x32xf32>
    %360 = arith.mulf %355, %359 : vector<16x32xf32>
    %cst_164 = arith.constant 1.42141378 : f32
    %361 = vector.broadcast %cst_164 : f32 to vector<16x32xf32>
    %362 = arith.addf %361, %360 : vector<16x32xf32>
    %363 = arith.mulf %355, %362 : vector<16x32xf32>
    %cst_165 = arith.constant -0.284496725 : f32
    %364 = vector.broadcast %cst_165 : f32 to vector<16x32xf32>
    %365 = arith.addf %364, %363 : vector<16x32xf32>
    %366 = arith.mulf %355, %365 : vector<16x32xf32>
    %cst_166 = arith.constant 0.254829586 : f32
    %367 = vector.broadcast %cst_166 : f32 to vector<16x32xf32>
    %368 = arith.addf %367, %366 : vector<16x32xf32>
    %369 = arith.mulf %355, %368 : vector<16x32xf32>
    %cst_167 = arith.constant 0.000000e+00 : f32
    %370 = vector.broadcast %cst_167 : f32 to vector<16x32xf32>
    %371 = arith.subf %370, %349 : vector<16x32xf32>
    %372 = arith.mulf %371, %349 : vector<16x32xf32>
    %373 = math.exp %372 : vector<16x32xf32>
    %374 = arith.mulf %369, %373 : vector<16x32xf32>
    %cst_168 = arith.constant 1.000000e+00 : f32
    %375 = vector.broadcast %cst_168 : f32 to vector<16x32xf32>
    %376 = arith.subf %375, %374 : vector<16x32xf32>
    %cst_169 = arith.constant 0.000000e+00 : f32
    %377 = vector.broadcast %cst_169 : f32 to vector<16x32xf32>
    %378 = arith.cmpf olt, %348, %377 : vector<16x32xf32>
    %cst_170 = arith.constant 0.000000e+00 : f32
    %379 = vector.broadcast %cst_170 : f32 to vector<16x32xf32>
    %380 = arith.subf %379, %376 : vector<16x32xf32>
    %381 = arith.select %378, %380, %376 : vector<16x32xi1>, vector<16x32xf32>
    %cst_171 = arith.constant 1.000000e+00 : f32
    %382 = vector.broadcast %cst_171 : f32 to vector<16x32xf32>
    %383 = arith.addf %382, %381 : vector<16x32xf32>
    %384 = arith.mulf %346, %383 : vector<16x32xf32>
    %c0_172 = arith.constant 0 : index
    %c0_173 = arith.constant 0 : index
    %385 = vector.load %arg2[%c0_172, %c0_173] : memref<16x1xf32, #tpu.memory_space<vmem>>, vector<16x1xf32>
    %386 = vector.broadcast %385 : vector<16x1xf32> to vector<16x32xf32>
    %387 = arith.mulf %384, %386 : vector<16x32xf32>
    %388 = vector.shape_cast %387 : vector<16x32xf32> to vector<2x8x32xf32>
    %c0_174 = arith.constant 0 : index
    %c0_175 = arith.constant 0 : index
    %c0_176 = arith.constant 0 : index
    %389 = vector.load %arg13[%c0_174, %c0_175, %c0_176] : memref<3x8x32xf32, #tpu.memory_space<vmem>>, vector<1x8x32xf32>
    %390 = vector.shape_cast %389 : vector<1x8x32xf32> to vector<8x32xf32>
    %391 = vector.shape_cast %390 : vector<8x32xf32> to vector<1x8x32xf32>
    %392 = vector.broadcast %391 : vector<1x8x32xf32> to vector<2x8x32xf32>
    %393 = arith.mulf %388, %392 : vector<2x8x32xf32>
    %cst_177 = arith.constant dense<0.000000e+00> : vector<2x8xf32>
    %394 = vector.multi_reduction <add>, %393, %cst_177 [2] : vector<2x8x32xf32> to vector<2x8xf32>
    %395 = vector.shape_cast %394 : vector<2x8xf32> to vector<2x8x1xf32>
    %cst_178 = arith.constant dense<0.000000e+00> : vector<2x1xf32>
    %396 = vector.multi_reduction <add>, %395, %cst_178 [1] : vector<2x8x1xf32> to vector<2x1xf32>
    %397 = vector.shape_cast %396 : vector<2x1xf32> to vector<2x1x1xf32>
    %c0_179 = arith.constant 0 : index
    %c0_180 = arith.constant 0 : index
    %398 = vector.load %arg14[%c0_179, %c0_180] : memref<3x128xf32, #tpu.memory_space<vmem>>, vector<1x128xf32>
    %399 = vector.shape_cast %398 : vector<1x128xf32> to vector<1x1x128xf32>
    %400 = vector.broadcast %397 : vector<2x1x1xf32> to vector<2x1x128xf32>
    %401 = vector.broadcast %399 : vector<1x1x128xf32> to vector<2x1x128xf32>
    %402 = arith.mulf %400, %401 : vector<2x1x128xf32>
    %c1_181 = arith.constant 1 : index
    %c0_182 = arith.constant 0 : index
    %c0_183 = arith.constant 0 : index
    %403 = vector.load %arg13[%c1_181, %c0_182, %c0_183] : memref<3x8x32xf32, #tpu.memory_space<vmem>>, vector<1x8x32xf32>
    %404 = vector.shape_cast %403 : vector<1x8x32xf32> to vector<8x32xf32>
    %405 = vector.shape_cast %404 : vector<8x32xf32> to vector<1x8x32xf32>
    %406 = vector.broadcast %405 : vector<1x8x32xf32> to vector<2x8x32xf32>
    %407 = arith.mulf %388, %406 : vector<2x8x32xf32>
    %cst_184 = arith.constant dense<0.000000e+00> : vector<2x8xf32>
    %408 = vector.multi_reduction <add>, %407, %cst_184 [2] : vector<2x8x32xf32> to vector<2x8xf32>
    %409 = vector.shape_cast %408 : vector<2x8xf32> to vector<2x8x1xf32>
    %cst_185 = arith.constant dense<0.000000e+00> : vector<2x1xf32>
    %410 = vector.multi_reduction <add>, %409, %cst_185 [1] : vector<2x8x1xf32> to vector<2x1xf32>
    %411 = vector.shape_cast %410 : vector<2x1xf32> to vector<2x1x1xf32>
    %c1_186 = arith.constant 1 : index
    %c0_187 = arith.constant 0 : index
    %412 = vector.load %arg14[%c1_186, %c0_187] : memref<3x128xf32, #tpu.memory_space<vmem>>, vector<1x128xf32>
    %413 = vector.shape_cast %412 : vector<1x128xf32> to vector<1x1x128xf32>
    %414 = vector.broadcast %411 : vector<2x1x1xf32> to vector<2x1x128xf32>
    %415 = vector.broadcast %413 : vector<1x1x128xf32> to vector<2x1x128xf32>
    %416 = arith.mulf %414, %415 : vector<2x1x128xf32>
    %417 = arith.addf %402, %416 : vector<2x1x128xf32>
    %c2_188 = arith.constant 2 : index
    %c0_189 = arith.constant 0 : index
    %c0_190 = arith.constant 0 : index
    %418 = vector.load %arg13[%c2_188, %c0_189, %c0_190] : memref<3x8x32xf32, #tpu.memory_space<vmem>>, vector<1x8x32xf32>
    %419 = vector.shape_cast %418 : vector<1x8x32xf32> to vector<8x32xf32>
    %420 = vector.shape_cast %419 : vector<8x32xf32> to vector<1x8x32xf32>
    %421 = vector.broadcast %420 : vector<1x8x32xf32> to vector<2x8x32xf32>
    %422 = arith.mulf %388, %421 : vector<2x8x32xf32>
    %cst_191 = arith.constant dense<0.000000e+00> : vector<2x8xf32>
    %423 = vector.multi_reduction <add>, %422, %cst_191 [2] : vector<2x8x32xf32> to vector<2x8xf32>
    %424 = vector.shape_cast %423 : vector<2x8xf32> to vector<2x8x1xf32>
    %cst_192 = arith.constant dense<0.000000e+00> : vector<2x1xf32>
    %425 = vector.multi_reduction <add>, %424, %cst_192 [1] : vector<2x8x1xf32> to vector<2x1xf32>
    %426 = vector.shape_cast %425 : vector<2x1xf32> to vector<2x1x1xf32>
    %c2_193 = arith.constant 2 : index
    %c0_194 = arith.constant 0 : index
    %427 = vector.load %arg14[%c2_193, %c0_194] : memref<3x128xf32, #tpu.memory_space<vmem>>, vector<1x128xf32>
    %428 = vector.shape_cast %427 : vector<1x128xf32> to vector<1x1x128xf32>
    %429 = vector.broadcast %426 : vector<2x1x1xf32> to vector<2x1x128xf32>
    %430 = vector.broadcast %428 : vector<1x1x128xf32> to vector<2x1x128xf32>
    %431 = arith.mulf %429, %430 : vector<2x1x128xf32>
    %432 = arith.addf %417, %431 : vector<2x1x128xf32>
    %c0_195 = arith.constant 0 : index
    %c0_196 = arith.constant 0 : index
    %433 = vector.load %arg15[%c0_195, %c0_196] : memref<1x128xf32, #tpu.memory_space<vmem>>, vector<1x128xf32>
    %434 = vector.shape_cast %433 : vector<1x128xf32> to vector<1x1x128xf32>
    %435 = vector.broadcast %434 : vector<1x1x128xf32> to vector<2x1x128xf32>
    %436 = arith.addf %432, %435 : vector<2x1x128xf32>
    %437 = arith.negf %436 : vector<2x1x128xf32>
    %438 = math.exp %437 : vector<2x1x128xf32>
    %cst_197 = arith.constant 1.000000e+00 : f32
    %439 = vector.broadcast %cst_197 : f32 to vector<2x1x128xf32>
    %440 = arith.addf %439, %438 : vector<2x1x128xf32>
    %441 = arith.divf %439, %440 : vector<2x1x128xf32>
    %c0_198 = arith.constant 0 : index
    %c0_199 = arith.constant 0 : index
    %c0_200 = arith.constant 0 : index
    %442 = vector.load %arg16[%c0_198, %c0_199, %c0_200] : memref<2x1x128xf32, #tpu.memory_space<vmem>>, vector<2x1x128xf32>
    tpu.vector_store %arg16[%c0_198, %c0_199, %c0_200], %441 {strides = array<i32>} : memref<2x1x128xf32, #tpu.memory_space<vmem>>, vector<2x1x128xf32>,
    return
  }
  func.func @transform_0(%arg0: i32) -> (i32, i32) {
    %c0_i32 = arith.constant 0 : i32
    %c0_i32_0 = arith.constant 0 : i32
    return %arg0, %c0_i32 : i32, i32
  }
  func.func @transform_1(%arg0: i32) -> (i32, i32) {
    %c0_i32 = arith.constant 0 : i32
    %c0_i32_0 = arith.constant 0 : i32
    return %arg0, %c0_i32 : i32, i32
  }
  func.func @transform_2(%arg0: i32) -> (i32, i32) {
    %c0_i32 = arith.constant 0 : i32
    %c0_i32_0 = arith.constant 0 : i32
    %c0_i32_1 = arith.constant 0 : i32
    return %c0_i32, %c0_i32_0 : i32, i32
  }
  func.func @transform_3(%arg0: i32) -> (i32, i32) {
    %c0_i32 = arith.constant 0 : i32
    %c0_i32_0 = arith.constant 0 : i32
    %c0_i32_1 = arith.constant 0 : i32
    return %c0_i32, %c0_i32_0 : i32, i32
  }
  func.func @transform_4(%arg0: i32) -> (i32, i32, i32) {
    %c0_i32 = arith.constant 0 : i32
    %c0_i32_0 = arith.constant 0 : i32
    %c0_i32_1 = arith.constant 0 : i32
    %c0_i32_2 = arith.constant 0 : i32
    return %c0_i32, %c0_i32_0, %c0_i32_1 : i32, i32, i32
  }
  func.func @transform_5(%arg0: i32) -> (i32, i32, i32) {
    %c0_i32 = arith.constant 0 : i32
    %c0_i32_0 = arith.constant 0 : i32
    %c0_i32_1 = arith.constant 0 : i32
    %c0_i32_2 = arith.constant 0 : i32
    return %c0_i32, %c0_i32_0, %c0_i32_1 : i32, i32, i32
  }
  func.func @transform_6(%arg0: i32) -> (i32, i32, i32) {
    %c0_i32 = arith.constant 0 : i32
    %c0_i32_0 = arith.constant 0 : i32
    %c0_i32_1 = arith.constant 0 : i32
    %c0_i32_2 = arith.constant 0 : i32
    return %c0_i32, %c0_i32_0, %c0_i32_1 : i32, i32, i32
  }
  func.func @transform_7(%arg0: i32) -> (i32, i32, i32) {
    %c0_i32 = arith.constant 0 : i32
    %c0_i32_0 = arith.constant 0 : i32
    %c0_i32_1 = arith.constant 0 : i32
    %c0_i32_2 = arith.constant 0 : i32
    return %c0_i32, %c0_i32_0, %c0_i32_1 : i32, i32, i32
  }
  func.func @transform_8(%arg0: i32) -> (i32, i32, i32) {
    %c0_i32 = arith.constant 0 : i32
    %c0_i32_0 = arith.constant 0 : i32
    %c0_i32_1 = arith.constant 0 : i32
    %c0_i32_2 = arith.constant 0 : i32
    return %c0_i32, %c0_i32_0, %c0_i32_1 : i32, i32, i32
  }
  func.func @transform_9(%arg0: i32) -> (i32, i32, i32) {
    %c0_i32 = arith.constant 0 : i32
    %c0_i32_0 = arith.constant 0 : i32
    %c0_i32_1 = arith.constant 0 : i32
    %c0_i32_2 = arith.constant 0 : i32
    return %c0_i32, %c0_i32_0, %c0_i32_1 : i32, i32, i32
  }
  func.func @transform_10(%arg0: i32) -> (i32, i32, i32) {
    %c0_i32 = arith.constant 0 : i32
    %c0_i32_0 = arith.constant 0 : i32
    %c0_i32_1 = arith.constant 0 : i32
    %c0_i32_2 = arith.constant 0 : i32
    return %c0_i32, %c0_i32_0, %c0_i32_1 : i32, i32, i32
  }
  func.func @transform_11(%arg0: i32) -> (i32, i32) {
    %c0_i32 = arith.constant 0 : i32
    %c0_i32_0 = arith.constant 0 : i32
    %c0_i32_1 = arith.constant 0 : i32
    return %c0_i32, %c0_i32_0 : i32, i32
  }
  func.func @transform_12(%arg0: i32) -> (i32, i32, i32) {
    %c0_i32 = arith.constant 0 : i32
    %c0_i32_0 = arith.constant 0 : i32
    %c0_i32_1 = arith.constant 0 : i32
    %c0_i32_2 = arith.constant 0 : i32
    return %c0_i32, %c0_i32_0, %c0_i32_1 : i32, i32, i32
  }
  func.func @transform_13(%arg0: i32) -> (i32, i32) {
    %c0_i32 = arith.constant 0 : i32
    %c0_i32_0 = arith.constant 0 : i32
    %c0_i32_1 = arith.constant 0 : i32
    return %c0_i32, %c0_i32_0 : i32, i32
  }
  func.func @transform_14(%arg0: i32) -> (i32, i32) {
    %c0_i32 = arith.constant 0 : i32
    %c0_i32_0 = arith.constant 0 : i32
    %c0_i32_1 = arith.constant 0 : i32
    return %c0_i32, %c0_i32_0 : i32, i32
  }
  func.func @transform_15(%arg0: i32) -> (i32, i32, i32) {
    %c0_i32 = arith.constant 0 : i32
    %c0_i32_0 = arith.constant 0 : i32
    %c0_i32_1 = arith.constant 0 : i32
    return %arg0, %c0_i32, %c0_i32_0 : i32, i32, i32
  }
}

</mosaic_0001>

<bundles_post_ra>
// kernel: informer_forward.1
= control target key start
LH: loop header
LB: loop body
LE: loop exit
PB: predicated region body
PF: predicated region fallthrough
CT: control target
= control target key end

     0   :  { %s3984_s0 = inlined_call_operand.vmem [shape: f32[32,12], index: 0, kind: input, shape index: {}]   ;;  %s3985_s1 = inlined_call_operand.vmem [shape: f32[32,1], index: 1, kind: input, shape index: {}]   ;;  %s3986_s2 = inlined_call_operand.vmem [shape: f32[12,32], index: 2, kind: input, shape index: {}]   ;;  %s3987_s3 = inlined_call_operand.vmem [shape: f32[16,32], index: 3, kind: input, shape index: {}]   ;;  %s3988_s4 = inlined_call_operand.vmem [shape: f32[2,32,96], index: 4, kind: input, shape index: {}]   ;;  %s3989_s5 = inlined_call_operand.vmem [shape: f32[2,1,96], index: 5, kind: input, shape index: {}]   ;;  %s3990_s6 = inlined_call_operand.vmem [shape: f32[2,32,32], index: 6, kind: input, shape index: {}]   ;;  %s3991_s7 = inlined_call_operand.vmem [shape: f32[2,6,32], index: 7, kind: input, shape index: {}]   ;;  %s3992_s8 = inlined_call_operand.vmem [shape: f32[2,32,64], index: 8, kind: input, shape index: {}]   ;;  %s3993_s9 = inlined_call_operand.vmem [shape: f32[2,1,64], index: 9, kind: input, shape index: {}]   ;;  %s3994_s10 = inlined_call_operand.vmem [shape: f32[2,64,32], index: 10, kind: input, shape index: {}]   ;;  %s3995_s11 = inlined_call_operand.vmem [shape: f32[2,32], index: 11, kind: input, shape index: {}]   ;;  %s3996_s12 = inlined_call_operand.vmem [shape: f32[3,8,32], index: 12, kind: input, shape index: {}]   ;;  %s3997_s13 = inlined_call_operand.vmem [shape: f32[3,128], index: 13, kind: input, shape index: {}]   ;;  %s3998_s14 = inlined_call_operand.vmem [shape: f32[1,128], index: 14, kind: input, shape index: {}]   ;;  %s3999_s15 = inlined_call_operand.hbm [shape: f32[4,1,128], index: 15, kind: output, shape index: {}]  }
   0x1   :  { %4023 = sst [smem:[#allocation9_spill]] %s3986_s2 }
   0x2   :  { %20 = vsyncpa [#allocation3], 0 }
   0x3   :  { %22 = vsyncpa [#allocation3 + $0x1], 0  ;;  %s3354_s18 = smov 0   ;;  %s3356_s19 = smov 0  }
   0x4   :  { %s3358_s20 = smov 0   ;;  %s3360_s21 = smov 0  }
   0x5 LB: > { %4024 = sst [smem:[#allocation5_spill]] %s3253_s20  ;;  %s2892_s22 = sadd.s32 4294967295, %s3257_s21   ;;  %s3257_s21 = sphi %s3360_s21, %s4042_s21   ;;  %s3253_s20 = sphi %s3358_s20, %s4044_s20   ;;  %s3249_s19 = sphi %s3356_s19, %s4046_s19   ;;  %s3245_s18 = sphi %s3354_s18, %s4045_s18  }
   0x6   : > { %s2893_s23 = sadd.s32 4294967294, %s3257_s21   ;;  %s3377_s24 = sadd.s32 1, %s3257_s21  }
   0x7   : > { %4025 = sst [smem:[#allocation6_spill]] %s3377_s24  ;;  %s360_s25 = sadd.s32 1, %s3253_s20 }
   0x8   : > { %s357_s26 = ssub.s32 %s3257_s21, %s3377_s24  ;;  %p370_p0 = scmp.ne.s32.totalorder %s3253_s20, %s3249_s19 }
   0x9   : > { %p358_p1 = scmp.eq.s32.totalorder %s357_s26, 0  ;;  %p371_p2 = scmp.eq.s32.totalorder %s2892_s22, 1 }
   0xa   : > { %p376_p3 = scmp.ne.s32.totalorder %s3249_s19, %s3245_s18  ;;  %p377_p4 = scmp.eq.s32.totalorder %s2893_s23, 1 }
   0xb   : > { %s3387_s27 = scalar_select %p358_p1, %s3253_s20, %s360_s25  }
   0xc   : > { %p3389_p5 = por %p371_p2, %p370_p0  ;;  %p3393_p6 = por %p377_p4, %p376_p3 }
   0xd   : > { %4026 = sst [smem:[#allocation7_spill]] %s3387_s27  ;;  %p2896_p7 = scmp.ge.s32.totalorder %s3257_s21, 1 }
   0xe   : > { %s4028_s29 = scalar_select %p3393_p6, 1, 0 }
   0xf   : > { %p452_p8 = scmp.lt.s32.totalorder %s3257_s21, 3 }
  0x10   : > { %4029 = sst [smem:[#allocation8_spill]] %s4028_s29 }
  0x11   : > { %p453_p9 = pnand %p2896_p7, %p452_p8 }
  0x12   : > { %s4030_s2 = sld [smem:[#allocation9_spill]] (!%p453_p9)  ;;  %s3405_s25 = sshll.u32 (!%p453_p9), %s2892_s22, 1 }
  0x13   : > { %456 = sbr.rel (%p453_p9) target bundleno = 5732 (0x1664), region = 80  ;;  %p506_p10 = scmp.lt.s32.totalorder (!%p453_p9), %s3405_s25, 3 }
  0x14   : > { %s3259_s29 = smov (!%p453_p9), 88   ;;  %s3260_s27 = smov (!%p453_p9), 96  }
  0x15   : > { %s4021_s26 = smov (!%p453_p9), 120   ;;  %s4005_s30 = smov (!%p453_p9), 64  }
  0x16   : > { %s4017_s16 = smov (!%p453_p9), 112   ;;  %s4015_s17 = smov (!%p453_p9), 80  }
  0x17   : > { %s4007_s23 = smov (!%p453_p9), 72   ;;  %s4011_s24 = smov (!%p453_p9), 40  }
  0x18   : > { %v521_v0 = vld [vmem:[%s4030_s2 + $0x8] sm:$0xf]  ;;  %vm531_vm0 = vcmask 1043456   ;;  %v520_v1 = vld [vmem:[%s4030_s2] sm:$0xff]  ;;  %v561_v2 = vld [vmem:[%s3988_s4 + $0x18] sm:$0xff]  ;;  %s3412_s20 = scalar_select %p506_p10, %s3405_s25, 3 }
  0x19   : > { %2902 = vmatpush.msk.msra.mxu0 %vm531_vm0, %v521_v0  ;;  %3017 = vmatpush.msk.msra.mxu1 %vm531_vm0, %v521_v0  ;;  %v560_v3 = vld [vmem:[%s3988_s4 + $0x10] sm:$0xff]  ;;  %vm524_vm1 = vcmask 97280   ;;  %v559_v6 = vld [vmem:[%s3988_s4 + $0x8] sm:$0xff]  ;;  %v558_v7 = vld [vmem:[%s3988_s4] sm:$0xff]  ;;  %vm566_vm2 = vcmask 261120   ;;  %vm603_vm3 = vcmask 64512  }
  0x1a   : > { %s4004_s22 = sshll.u32 %s3412_s20, 3  ;;  %v522_v8 = vld [vmem:[%s3987_s3] sm:$0xff]  ;;  %v523_v11 = vld [vmem:[%s3987_s3 + $0x8] sm:$0xff] }
  0x1b   : > { %550 = vmatpush.msra.mxu0 %v520_v1  ;;  %3018 = vmatpush.msra.mxu1 %v520_v1  ;;  %s509_s2 = scalar_lea.vmem %s3984_s0, %s4004_s22  ;;  %v3075_v14 = vld [vmem:[%s3989_s5] ss:$0 sm:$0xff]  ;;  %s4009_s22 = smov 104  }
  0x1c   : > { %v518_v4 = vld [vmem:[%s509_s2] sm:$0xff]  ;;  %v519_v5 = vld [vmem:[%s509_s2 + $0x8] sm:$0xff]  ;;  %s4019_s2 = smov 56  }
  0x1d   : > { %585 = vmatpush.msrb.mxu1 %v561_v2  ;;  %2903 = vmatmul.msk.f32.vlgmr.msra.gmra.mxu0 %vm524_vm1, %v518_v4  ;;  %v596_v1 = vld [vmem:[%s3990_s6] sm:$0xff] }
  0x1e   : > { %2904 = vmatmul.msk.f32.vlgmr.msra.gmra.mxu1 %vm524_vm1, %v519_v5 }
  0x1f   : > { %586 = vmatpush.msrb.mxu1 %v560_v3 }
  0x21   : > { %587 = vmatpush.msrb.mxu1 %v559_v6 }
  0x23   : > { %588 = vmatpush.msrb.mxu1 %v558_v7 }
  0x9a   : > { %v552_v9 = vpop.f32.mrf.mxu0 }
  0x9b   : > { %v3432_v10 = vadd.f32 %v552_v9, %v522_v8  ;;  %v555_v12 = vpop.f32.mrf.mxu1 }
  0x9c   : > { %v3439_v13 = vadd.f32 %v555_v12, %v523_v11 }
  0x9d   : > { %2905 = vmatmul.msk.f32.vlgmr.msrb.gmra.mxu1 %vm566_vm2, %v3432_v10 }
  0xa5   : > { %2906 = vmatmul.msk.f32.gmra.mxu1 %vm566_vm2, %v3439_v13 }
 0x11a   : > { %v590_v15 = vpop.f32.mrf.mxu1 }
 0x11b   : > { %v3446_v16 = vadd.f32 %v3075_v14, %v590_v15 }
 0x11d   : > { %759 = vrot.lane.b32.xlu1 %v3446_v16, %s3259_s29  ;;  %601 = vrot.lane.b32.xlu0 %v3446_v16, %s3260_s27 }
 0x122   : > { %v593_v17 = vpop.f32.mrf.mxu1 }
 0x123   : > { %v3452_v18 = vadd.f32 %v3075_v14, %v593_v17 }
 0x125   : > { %757 = vrot.lane.b32.xlu1 %v3446_v16, %s4021_s26  ;;  %629 = vrot.lane.b32.xlu0 %v3452_v18, %s3260_s27 }
 0x12d   : > { %705 = vrot.lane.b32.xlu0 %v3446_v16, %s4005_s30  ;;  %787 = vrot.lane.b32.xlu1 %v3452_v18, %s3259_s29 }
 0x18f   : > { %v760_v19 = vpop.permute.xlu1 %759  ;;  %v602_v20 = vpop.permute.xlu0 %601 }
 0x190   : > { %2907 = vmatpush.xpose.msk.msra.mxu2 %vm603_vm3, %v602_v20  ;;  %2913 = vmatpush.xpose.msk.msrb.mxu0 %vm603_vm3, %v760_v19 }
 0x193   : > { %2908 = vmatmul.msk.f32.vlgmr.msra.gmra.mxu2 %vm603_vm3, %v3446_v16 }
 0x197   : > { %v758_v21 = vpop.permute.xlu1 %757  ;;  %v630_v22 = vpop.permute.xlu0 %629 }
 0x198   : > { %2909 = vmatpush.xpose.msk.msra.mxu3 %vm603_vm3, %v630_v22  ;;  %2914 = vmatmul.msk.f32.vlgmr.msrb.gmra.mxu0 %vm603_vm3, %v758_v21 }
 0x19b   : > { %2910 = vmatmul.msk.f32.vlgmr.msra.gmra.mxu3 %vm603_vm3, %v3452_v18 }
 0x19f   : > { %v706_v23 = vpop.permute.xlu0 %705  ;;  %v788_v24 = vpop.permute.xlu1 %787 }
 0x1a0   : > { %726 = vmatpush.msrb.mxu2 %v706_v23 }
 0x1a2   : > { %2915 = vmatpush.xpose.msk.msra.mxu2 %vm603_vm3, %v788_v24 }
 0x215   : > { %v782_v25 = vpop.f32.mrf.mxu0 }
 0x216   : > { %v813_v26 = vmul.f32 0.35355338, %v782_v25  ;;  %v625_v27 = vpop.f32.mrf.mxu2 }
 0x217   : > { %v655_v28 = vmul.f32 0.35355338, %v625_v27 }
 0x218   : > { %v815_v29 = vsel %vm603_vm3, %v813_v26, -inf }
 0x219   : > { %816 = vmax.xlane.f32.xlu1 %v815_v29  ;;  %v657_v30 = vsel %vm603_vm3, %v655_v28, -inf }
 0x21a   : > { %658 = vmax.xlane.f32.xlu2 %v657_v30 }
 0x21e   : > { %v652_v31 = vpop.f32.mrf.mxu3 }
 0x21f   : > { %v656_v32 = vmul.f32 0.35355338, %v652_v31 }
 0x221   : > { %v660_v33 = vsel %vm603_vm3, %v656_v32, -inf }
 0x222   : > { %661 = vmax.xlane.f32.xlu0 %v660_v33 }
 0x232   : > { %731 = vrot.lane.b32.xlu1 %v3452_v18, %s4005_s30  ;;  %s4013_s30 = smov 48  }
 0x23a   : > { %973 = vrot.lane.b32.xlu1 %v3446_v16, %s4017_s16 }
 0x28c   : > { %v817_v34 = vpop.xlane.xlu1 %816 }
 0x28d   : > { %v821_v35 = vsub.f32 %v813_v26, %v817_v34  ;;  %v659_v36 = vpop.xlane.xlu2 %658 }
 0x28e   : > { %v663_v37 = vsub.f32 %v655_v28, %v659_v36 }
 0x28f   : > { %v823_v38 = vmul.f32 1.442695, %v821_v35 }
 0x290   : > { %v665_v39 = vmul.f32 1.442695, %v663_v37 }
 0x291   : > { %3093 = vpow2.f32 %v823_v38  ;;  %v597_v38 = vld [vmem:[%s3990_s6 + $0x8] sm:$0xff] }
 0x292   : > { %3095 = vpow2.f32 %v665_v39  ;;  %936 = vmatpush.msra.mxu0 %v597_v38 }
 0x295   : > { %v662_v45 = vpop.xlane.xlu0 %661 }
 0x296   : > { %v664_v46 = vsub.f32 %v656_v32, %v662_v45 }
 0x297   : > { %v3478_v40 = vpop.eup %3093 }
 0x298   : > { %v3096_v41 = vpop.eup %3095  ;;  %v827_v42 = vsel %vm603_vm3, %v3478_v40, 0.0  ;;  %v667_v47 = vmul.f32 1.442695, %v664_v46 }
 0x299   : > { %828 = vadd.xlane.f32.xlu0 %v827_v42  ;;  %v669_v43 = vsel %vm603_vm3, %v3096_v41, 0.0 }
 0x29a   : > { %670 = vadd.xlane.f32.xlu2 %v669_v43  ;;  %3097 = vpow2.f32 %v667_v47 }
 0x2a0   : > { %v3487_v48 = vpop.eup %3097 }
 0x2a1   : > { %v672_v49 = vsel %vm603_vm3, %v3487_v48, 0.0 }
 0x2a4   : > { %v732_v44 = vpop.permute.xlu1 %731 }
 0x2a5   : > { %752 = vmatpush.msrb.mxu3 %v732_v44 }
 0x2ac   : > { %v974_v33 = vpop.permute.xlu1 %973 }
 0x2ad   : > { %863 = vrot.lane.b32.xlu0 %v3446_v16, %s4019_s2 }
 0x2b2   : > { %785 = vrot.lane.b32.xlu2 %v3452_v18, %s4021_s26  ;;  %s4037_s26 = smov 72  }
 0x2db   : > { %673 = vadd.xlane.f32.xlu2 %v672_v49 }
 0x2f3   : > { %975 = vrot.lane.b32.xlu2 %v3446_v16, %s4015_s17 }
 0x2fb   : > { %889 = vrot.lane.b32.xlu2 %v3452_v18, %s4019_s2  ;;  %s3215_s2 = scalar_lea.hbm %s3999_s15, 4 }
 0x303   : > { %1003 = vrot.lane.b32.xlu2 %v3452_v18, %s4015_s17  ;;  %s4035_s17 = smov 64  }
 0x30b   : > { %1164 = vrot.lane.b32.xlu2 %v3446_v16, %s4007_s23 }
 0x30c   : > { %v829_v53 = vpop.xlane.xlu0 %828 }
 0x30d   : > { %v671_v50 = vpop.xlane.xlu2 %670  ;;  %v844_v23 = vand.u32 2147483648, %v829_v53  ;;  %vm838_vm13 = vweird.f32 %v829_v53  ;;  %v842_v25 = vand.u32 2147483647, %v829_v53 }
 0x30e   : > { %3099 = vrcp.f32 %v671_v50  ;;  %v686_v55 = vand.u32 2147483648, %v671_v50  ;;  %v684_v57 = vand.u32 2147483647, %v671_v50  ;;  %vm680_vm5 = vweird.f32 %v671_v50 }
 0x30f   : > { %3101 = vrcp.f32 %v829_v53  ;;  %v845_v28 = vor.u32 1.1754944e-38, %v844_v23  ;;  %vm843_vm15 = vcmp.eq.f32.partialorder %v842_v25, 8.507059e+37 }
 0x310   : > { %v687_v59 = vor.u32 1.1754944e-38, %v686_v55  ;;  %vm685_vm7 = vcmp.eq.f32.partialorder %v684_v57, 8.507059e+37 }
 0x313   : > { %1001 = vrot.lane.b32.xlu2 %v3452_v18, %s4017_s16  ;;  %s4034_s16 = smov 80  }
 0x314   : > { %v3100_v51 = vpop.eup %3099 }
 0x315   : > { %v676_v52 = vmul.f32 %v3100_v51, %v671_v50  ;;  %vm681_vm4 = vweird.f32 %v3100_v51  ;;  %v786_v0 = vpop.permute.xlu2 %785  ;;  %v3102_v3 = vpop.eup %3101 }
 0x316   : > { %vm682_vm6 = vmor %vm680_vm5, %vm681_vm4  ;;  %v834_v4 = vmul.f32 %v3102_v3, %v829_v53  ;;  %vm839_vm11 = vweird.f32 %v3102_v3 }
 0x317   : > { %v677_v54 = vsub.f32 1.0, %v676_v52  ;;  %vm840_vm14 = vmor %vm838_vm13, %vm839_vm11 }
 0x318   : > { %v835_v6 = vsub.f32 1.0, %v834_v4 }
 0x319   : > { %v678_v56 = vmul.f32 %v3100_v51, %v677_v54 }
 0x31a   : > { %v836_v12 = vmul.f32 %v3102_v3, %v835_v6 }
 0x31b   : > { %v679_v58 = vadd.f32 %v3100_v51, %v678_v56 }
 0x31c   : > { %v837_v20 = vadd.f32 %v3102_v3, %v836_v12 }
 0x31d   : > { %v683_v60 = vsel %vm682_vm6, %v3100_v51, %v679_v58 }
 0x31e   : > { %v688_v61 = vsel %vm685_vm7, %v687_v59, %v683_v60  ;;  %v841_v27 = vsel %vm840_vm14, %v3102_v3, %v837_v20 }
 0x31f   : > { %v864_v62 = vpop.permute.xlu0 %863  ;;  %v689_v63 = vmul.f32 %v3096_v41, %v688_v61  ;;  %v846_v29 = vsel %vm843_vm15, %v845_v28, %v841_v27 }
 0x320   : > { %884 = vmatpush.msra.mxu3 %v864_v62  ;;  %v847_v31 = vmul.f32 %v3478_v40, %v846_v29 }
 0x321   : > { %2911 = vmatmul.msk.f32.vlgmr.msrb.gmra.mxu2 %vm603_vm3, %v689_v63 }
 0x322   : > { %965 = vmatpush.msrb.mxu2 %v596_v1 }
 0x329   : > { %2916 = vmatmul.msk.f32.vlgmr.msra.gmra.mxu2 %vm603_vm3, %v786_v0 }
 0x34e   : > { %v674_v2 = vpop.xlane.xlu2 %673 }
 0x34f   : > { %3103 = vrcp.f32 %v674_v2  ;;  %v701_v11 = vand.u32 2147483648, %v674_v2  ;;  %v699_v15 = vand.u32 2147483647, %v674_v2  ;;  %vm695_vm9 = vweird.f32 %v674_v2 }
 0x351   : > { %v702_v19 = vor.u32 1.1754944e-38, %v701_v11  ;;  %vm700_vm12 = vcmp.eq.f32.partialorder %v699_v15, 8.507059e+37 }
 0x355   : > { %v3104_v5 = vpop.eup %3103 }
 0x356   : > { %v691_v7 = vmul.f32 %v3104_v5, %v674_v2  ;;  %v976_v8 = vpop.permute.xlu2 %975  ;;  %vm696_vm8 = vweird.f32 %v3104_v5 }
 0x357   : > { %vm697_vm10 = vmor %vm695_vm9, %vm696_vm8 }
 0x358   : > { %v692_v9 = vsub.f32 1.0, %v691_v7 }
 0x35a   : > { %v693_v14 = vmul.f32 %v3104_v5, %v692_v9 }
 0x35c   : > { %v694_v17 = vadd.f32 %v3104_v5, %v693_v14 }
 0x35e   : > { %v890_v21 = vpop.permute.xlu2 %889  ;;  %v698_v22 = vsel %vm697_vm10, %v3104_v5, %v694_v17 }
 0x35f   : > { %910 = vmatpush.msra.mxu1 %v890_v21  ;;  %v703_v24 = vsel %vm700_vm12, %v702_v19, %v698_v22 }
 0x360   : > { %v704_v26 = vmul.f32 %v3487_v48, %v703_v24 }
 0x362   : > { %2912 = vmatmul.msk.f32.vlgmr.msrb.gmra.mxu3 %vm603_vm3, %v704_v26 }
 0x363   : > { %2923 = vmatpush.xpose.msk.msrb.mxu3 %vm603_vm3, %v976_v8 }
 0x366   : > { %v1004_v30 = vpop.permute.xlu2 %1003 }
 0x367   : > { %2925 = vmatpush.xpose.msk.msrb.mxu1 %vm603_vm3, %v1004_v30 }
 0x36a   : > { %2917 = vmatmul.msk.f32.vlgmr.msra.gmra.mxu3 %vm603_vm3, %v847_v31 }
 0x36e   : > { %v1165_v32 = vpop.permute.xlu2 %1164 }
 0x36f   : > { %2931 = vmatpush.xpose.msk.msra.mxu2 %vm603_vm3, %v1165_v32 }
 0x372   : > { %2924 = vmatmul.msk.f32.vlgmr.msrb.gmra.mxu3 %vm603_vm3, %v974_v33 }
 0x376   : > { %v1002_v50 = vpop.permute.xlu2 %1001 }
 0x3a4   : > { %v728_v34 = vpop.f32.mrf.mxu2 }
 0x3a5   : > { %2921 = vmatmul.msk.f32.vlgmr.msrb.gmra.mxu2 %vm603_vm3, %v728_v34 }
 0x3ac   : > { %v810_v35 = vpop.f32.mrf.mxu2 }
 0x3ad   : > { %v814_v36 = vmul.f32 0.35355338, %v810_v35 }
 0x3af   : > { %v818_v37 = vsel %vm603_vm3, %v814_v36, -inf }
 0x3b0   : > { %819 = vmax.xlane.f32.xlu0 %v818_v37  ;;  %v598_v37 = vld [vmem:[%s3990_s6 + $0x10] sm:$0xff] }
 0x3b1   : > { %1152 = vmatpush.msrb.mxu0 %v598_v37 }
 0x3c4   : > { %1162 = vrot.lane.b32.xlu0 %v3446_v16, %s4009_s22 }
 0x3cc   : > { %1192 = vrot.lane.b32.xlu0 %v3452_v18, %s4007_s23  ;;  %s4031_s23 = smov 120  }
 0x3d4   : > { %1190 = vrot.lane.b32.xlu0 %v3452_v18, %s4009_s22  ;;  %s4033_s22 = smov 112  }
 0x3e5   : > { %v754_v39 = vpop.f32.mrf.mxu3 }
 0x3e6   : > { %2922 = vmatmul.msk.f32.gmra.mxu2 %vm603_vm3, %v754_v39 }
 0x3ed   : > { %v886_v40 = vpop.f32.mrf.mxu3 }
 0x3ee   : > { %2919 = vmatmul.msk.f32.vlgmr.msra.gmra.mxu0 %vm603_vm3, %v886_v40 }
 0x3f5   : > { %v998_v41 = vpop.f32.mrf.mxu3 }
 0x3f6   : > { %v1029_v42 = vmul.f32 0.35355338, %v998_v41 }
 0x3f8   : > { %v1031_v43 = vsel %vm603_vm3, %v1029_v42, -inf }
 0x3f9   : > { %1032 = vmax.xlane.f32.xlu2 %v1031_v43 }
 0x423   : > { %v820_v44 = vpop.xlane.xlu0 %819 }
 0x424   : > { %v822_v45 = vsub.f32 %v814_v36, %v820_v44 }
 0x426   : > { %v825_v46 = vmul.f32 1.442695, %v822_v45 }
 0x428   : > { %3105 = vpow2.f32 %v825_v46  ;;  %v3533_v58 = vpop.f32.mrf.mxu2 }
 0x42e   : > { %v3106_v47 = vpop.eup %3105 }
 0x42f   : > { %v830_v48 = vsel %vm603_vm3, %v3106_v47, 0.0 }
 0x430   : > { %831 = vadd.xlane.f32.xlu1 %v830_v48 }
 0x436   : > { %v1163_v49 = vpop.permute.xlu0 %1162 }
 0x437   : > { %2932 = vmatmul.msk.f32.vlgmr.msra.gmra.mxu2 %vm603_vm3, %v1163_v49 }
 0x43e   : > { %v1193_v24 = vpop.permute.xlu0 %1192 }
 0x446   : > { %v1191_v27 = vpop.permute.xlu0 %1190 }
 0x469   : > { %v3535_v1 = vpop.f32.mrf.mxu2 }
 0x46c   : > { %v1033_v51 = vpop.xlane.xlu2 %1032 }
 0x46d   : > { %v1037_v52 = vsub.f32 %v1029_v42, %v1033_v51 }
 0x46f   : > { %v1039_v53 = vmul.f32 1.442695, %v1037_v52 }
 0x471   : > { %3107 = vpow2.f32 %v1039_v53 }
 0x477   : > { %v3108_v54 = vpop.eup %3107 }
 0x478   : > { %v1043_v55 = vsel %vm603_vm3, %v3108_v54, 0.0 }
 0x479   : > { %1044 = vadd.xlane.f32.xlu1 %v1043_v55 }
 0x492   : > { %1079 = vrot.lane.b32.xlu1 %v3446_v16, %s4013_s30 }
 0x4a3   : > { %v832_v56 = vpop.xlane.xlu1 %831 }
 0x4a4   : > { %3109 = vrcp.f32 %v832_v56  ;;  %v859_v61 = vand.u32 2147483648, %v832_v56  ;;  %v857_v63 = vand.u32 2147483647, %v832_v56  ;;  %vm853_vm1 = vweird.f32 %v832_v56 }
 0x4a6   : > { %v860_v2 = vor.u32 1.1754944e-38, %v859_v61  ;;  %vm858_vm5 = vcmp.eq.f32.partialorder %v857_v63, 8.507059e+37 }
 0x4aa   : > { %v3110_v57 = vpop.eup %3109 }
 0x4ab   : > { %v849_v59 = vmul.f32 %v3110_v57, %v832_v56  ;;  %vm854_vm0 = vweird.f32 %v3110_v57 }
 0x4ac   : > { %vm855_vm4 = vmor %vm853_vm1, %vm854_vm0 }
 0x4ad   : > { %v850_v60 = vsub.f32 1.0, %v849_v59 }
 0x4af   : > { %v851_v62 = vmul.f32 %v3110_v57, %v850_v60 }
 0x4b1   : > { %v852_v0 = vadd.f32 %v3110_v57, %v851_v62 }
 0x4b3   : > { %v856_v3 = vsel %vm855_vm4, %v3110_v57, %v852_v0 }
 0x4b4   : > { %v861_v4 = vsel %vm858_vm5, %v860_v2, %v856_v3 }
 0x4b5   : > { %v862_v5 = vmul.f32 %v3106_v47, %v861_v4 }
 0x4b7   : > { %2918 = vmatmul.msk.f32.vlgmr.msra.gmra.mxu1 %vm603_vm3, %v862_v5 }
 0x4ba   : > { %v1187_v6 = vpop.f32.mrf.mxu2 }
 0x4bb   : > { %v1218_v7 = vmul.f32 0.35355338, %v1187_v6 }
 0x4bd   : > { %v1220_v8 = vsel %vm603_vm3, %v1218_v7, -inf }
 0x4be   : > { %1221 = vmax.xlane.f32.xlu1 %v1220_v8 }
 0x4bf   : > { %2926 = vmatmul.msk.f32.vlgmr.msrb.gmra.mxu1 %vm603_vm3, %v1002_v50 }
 0x4ec   : > { %v1045_v9 = vpop.xlane.xlu1 %1044 }
 0x4ed   : > { %3111 = vrcp.f32 %v1045_v9  ;;  %v1060_v19 = vand.u32 2147483648, %v1045_v9  ;;  %vm1054_vm7 = vweird.f32 %v1045_v9  ;;  %v1058_v20 = vand.u32 2147483647, %v1045_v9 }
 0x4ef   : > { %v1061_v22 = vor.u32 1.1754944e-38, %v1060_v19  ;;  %vm1059_vm9 = vcmp.eq.f32.partialorder %v1058_v20, 8.507059e+37 }
 0x4f3   : > { %v3112_v11 = vpop.eup %3111 }
 0x4f4   : > { %v1050_v12 = vmul.f32 %v3112_v11, %v1045_v9  ;;  %vm1055_vm6 = vweird.f32 %v3112_v11 }
 0x4f5   : > { %vm1056_vm8 = vmor %vm1054_vm7, %vm1055_vm6 }
 0x4f6   : > { %v1051_v14 = vsub.f32 1.0, %v1050_v12 }
 0x4f8   : > { %v1052_v15 = vmul.f32 %v3112_v11, %v1051_v14 }
 0x4fa   : > { %v1053_v17 = vadd.f32 %v3112_v11, %v1052_v15 }
 0x4fc   : > { %v1057_v21 = vsel %vm1056_vm8, %v3112_v11, %v1053_v17 }
 0x4fd   : > { %v1062_v23 = vsel %vm1059_vm9, %v1061_v22, %v1057_v21 }
 0x4fe   : > { %v1063_v26 = vmul.f32 %v3108_v54, %v1062_v23 }
 0x504   : > { %v1080_v25 = vpop.permute.xlu1 %1079 }
 0x505   : > { %1100 = vmatpush.msra.mxu3 %v1080_v25 }
 0x506   : > { %2927 = vmatmul.msk.f32.vlgmr.msra.gmra.mxu3 %vm603_vm3, %v1063_v26 }
 0x507   : > { %2933 = vmatpush.xpose.msk.msrb.mxu3 %vm603_vm3, %v1193_v24 }
 0x50e   : > { %2934 = vmatmul.msk.f32.vlgmr.msrb.gmra.mxu3 %vm603_vm3, %v1191_v27 }
 0x531   : > { %v1222_v28 = vpop.xlane.xlu1 %1221 }
 0x532   : > { %v1226_v29 = vsub.f32 %v1218_v7, %v1222_v28 }
 0x534   : > { %v1228_v30 = vmul.f32 1.442695, %v1226_v29  ;;  %v912_v31 = vpop.f32.mrf.mxu1 }
 0x535   : > { %2920 = vmatmul.msk.f32.gmra.mxu0 %vm603_vm3, %v912_v31  ;;  %v599_v31 = vld [vmem:[%s3990_s6 + $0x18] sm:$0xff] }
 0x536   : > { %3113 = vpow2.f32 %v1228_v30  ;;  %1341 = vmatpush.msra.mxu3 %v599_v31  ;;  %v1459_v31 = vld [vmem:[%s3994_s10 + $0x20] sm:$0xff] }
 0x53c   : > { %v3544_v32 = vpop.eup %3113  ;;  %v1026_v33 = vpop.f32.mrf.mxu1 }
 0x53d   : > { %v1030_v34 = vmul.f32 0.35355338, %v1026_v33  ;;  %v1232_v35 = vsel %vm603_vm3, %v3544_v32, 0.0 }
 0x53e   : > { %1233 = vadd.xlane.f32.xlu2 %v1232_v35  ;;  %v938_v35 = vpop.f32.mrf.mxu0 }
 0x53f   : > { %v1034_v36 = vsel %vm603_vm3, %v1030_v34, -inf }
 0x540   : > { %1035 = vmax.xlane.f32.xlu0 %v1034_v36 }
 0x554   : > { %1268 = vrot.lane.b32.xlu0 %v3446_v16, %s4011_s24 }
 0x589   : > { %v1102_v38 = vpop.f32.mrf.mxu3 }
 0x58a   : > { %2929 = vmatmul.msk.f32.vlgmr.msrb.gmra.mxu0 %vm603_vm3, %v1102_v38  ;;  %v968_v38 = vadd.f32 %v3533_v58, %v938_v35 }
 0x591   : > { %v1215_v39 = vpop.f32.mrf.mxu3 }
 0x592   : > { %v1219_v40 = vmul.f32 0.35355338, %v1215_v39 }
 0x594   : > { %v1223_v41 = vsel %vm603_vm3, %v1219_v40, -inf }
 0x595   : > { %1224 = vmax.xlane.f32.xlu1 %v1223_v41 }
 0x5ae   : > { %1294 = vrot.lane.b32.xlu1 %v3452_v18, %s4011_s24 }
 0x5b1   : > { %v1234_v52 = vpop.xlane.xlu2 %1233 }
 0x5b2   : > { %v1249_v7 = vand.u32 2147483648, %v1234_v52  ;;  %vm1243_vm15 = vweird.f32 %v1234_v52  ;;  %v1247_v9 = vand.u32 2147483647, %v1234_v52  ;;  %v941_v36 = vpop.f32.mrf.mxu0 }
 0x5b3   : > { %v1036_v42 = vpop.xlane.xlu0 %1035 }
 0x5b4   : > { %v1038_v43 = vsub.f32 %v1030_v34, %v1036_v42  ;;  %v1250_v14 = vor.u32 1.1754944e-38, %v1249_v7  ;;  %vm1248_vm1 = vcmp.eq.f32.partialorder %v1247_v9, 8.507059e+37 }
 0x5b6   : > { %v1041_v44 = vmul.f32 1.442695, %v1038_v43 }
 0x5b8   : > { %3115 = vpow2.f32 %v1041_v44 }
 0x5be   : > { %v3116_v16 = vpop.eup %3115 }
 0x5bf   : > { %v1046_v45 = vsel %vm603_vm3, %v3116_v16, 0.0 }
 0x5c0   : > { %1047 = vadd.xlane.f32.xlu2 %v1046_v45 }
 0x5c6   : > { %v1269_v60 = vpop.permute.xlu0 %1268 }
 0x5d8   : > { %1105 = vrot.lane.b32.xlu2 %v3452_v18, %s4013_s30 }
 0x607   : > { %v1154_v37 = vpop.f32.mrf.mxu0 }
 0x608   : > { %v1225_v46 = vpop.xlane.xlu1 %1224  ;;  %v1160_v39 = vadd.f32 %v1154_v37, %v968_v38 }
 0x609   : > { %v1227_v47 = vsub.f32 %v1219_v40, %v1225_v46  ;;  %v3076_v40 = vld [vmem:[%s3991_s7] ss:$0 sm:$0xff]  ;;  %v971_v46 = vadd.f32 %v3535_v1, %v941_v36 }
 0x60b   : > { %v1230_v48 = vmul.f32 1.442695, %v1227_v47 }
 0x60d   : > { %3117 = vpow2.f32 %v1230_v48 }
 0x60e   : > { %3119 = vrcp.f32 %v1234_v52 }
 0x613   : > { %v3118_v49 = vpop.eup %3117 }
 0x614   : > { %v1235_v50 = vsel %vm603_vm3, %v3118_v49, 0.0  ;;  %v3120_v54 = vpop.eup %3119 }
 0x615   : > { %1236 = vadd.xlane.f32.xlu2 %v1235_v50  ;;  %v1239_v55 = vmul.f32 %v3120_v54, %v1234_v52  ;;  %vm1244_vm13 = vweird.f32 %v3120_v54  ;;  %v3270_v52 = vmov 32.0  }
 0x616   : > { %vm1245_vm0 = vmor %vm1243_vm15, %vm1244_vm13  ;;  %vm1465_vm15 = vcmask 523264  }
 0x617   : > { %v1240_v57 = vsub.f32 1.0, %v1239_v55 }
 0x619   : > { %v1241_v63 = vmul.f32 %v3120_v54, %v1240_v57 }
 0x61b   : > { %v1242_v5 = vadd.f32 %v3120_v54, %v1241_v63 }
 0x61d   : > { %v1246_v12 = vsel %vm1245_vm0, %v3120_v54, %v1242_v5  ;;  %v1417_v5 = vld [vmem:[%s3992_s8 + $0x8] sm:$0xff] }
 0x61e   : > { %v1251_v15 = vsel %vm1248_vm1, %v1250_v14, %v1246_v12 }
 0x61f   : > { %v1252_v17 = vmul.f32 %v3544_v32, %v1251_v15 }
 0x620   : > { %v1295_v51 = vpop.permute.xlu1 %1294 }
 0x621   : > { %1315 = vmatpush.msrb.mxu2 %v1295_v51 }
 0x633   : > { %v1048_v53 = vpop.xlane.xlu2 %1047 }
 0x634   : > { %3121 = vrcp.f32 %v1048_v53  ;;  %v1075_v62 = vand.u32 2147483648, %v1048_v53  ;;  %v1073_v2 = vand.u32 2147483647, %v1048_v53  ;;  %vm1069_vm11 = vweird.f32 %v1048_v53 }
 0x636   : > { %v1076_v4 = vor.u32 1.1754944e-38, %v1075_v62  ;;  %vm1074_vm14 = vcmp.eq.f32.partialorder %v1073_v2, 8.507059e+37 }
 0x63a   : > { %v3122_v56 = vpop.eup %3121 }
 0x63b   : > { %v1065_v59 = vmul.f32 %v3122_v56, %v1048_v53  ;;  %v1106_v18 = vpop.permute.xlu2 %1105  ;;  %vm1070_vm10 = vweird.f32 %v3122_v56 }
 0x63c   : > { %1126 = vmatpush.msra.mxu1 %v1106_v18  ;;  %vm1071_vm12 = vmor %vm1069_vm11, %vm1070_vm10 }
 0x63d   : > { %v1066_v61 = vsub.f32 1.0, %v1065_v59 }
 0x63e   : > { %1289 = vmatpush.msrb.mxu1 %v1269_v60 }
 0x63f   : > { %v1067_v0 = vmul.f32 %v3122_v56, %v1066_v61 }
 0x641   : > { %v1068_v3 = vadd.f32 %v3122_v56, %v1067_v0 }
 0x643   : > { %v1072_v6 = vsel %vm1071_vm12, %v3122_v56, %v1068_v3  ;;  %v1419_v3 = vld [vmem:[%s3992_s8 + $0x18] sm:$0xff] }
 0x644   : > { %v1077_v8 = vsel %vm1074_vm14, %v1076_v4, %v1072_v6  ;;  %v1418_v4 = vld [vmem:[%s3992_s8 + $0x10] sm:$0xff]  ;;  %v1416_v6 = vld [vmem:[%s3992_s8] sm:$0xff] }
 0x645   : > { %v1078_v11 = vmul.f32 %v3116_v16, %v1077_v8 }
 0x647   : > { %2928 = vmatmul.msk.f32.vlgmr.msra.gmra.mxu1 %vm603_vm3, %v1078_v11 }
 0x648   : > { %1442 = vmatpush.msra.mxu1 %v1419_v3 }
 0x64a   : > { %1443 = vmatpush.msra.mxu1 %v1418_v4 }
 0x64c   : > { %1444 = vmatpush.msra.mxu1 %v1417_v5 }
 0x64e   : > { %1445 = vmatpush.msra.mxu1 %v1416_v6  ;;  %v2946_v6 = vld [vmem:[%s3988_s4 + $0x38] sm:$0xff] }
 0x64f   : > { %2935 = vmatmul.msk.f32.vlgmr.msrb.gmra.mxu1 %vm603_vm3, %v1252_v17  ;;  %1577 = vmatpush.msra.mxu2 %v2946_v6 }
 0x688   : > { %v1237_v19 = vpop.xlane.xlu2 %1236 }
 0x689   : > { %3123 = vrcp.f32 %v1237_v19  ;;  %v1264_v23 = vand.u32 2147483648, %v1237_v19  ;;  %v1262_v25 = vand.u32 2147483647, %v1237_v19  ;;  %vm1258_vm5 = vweird.f32 %v1237_v19 }
 0x68a   : > { %3125 = vrcp.f32 %v3270_v52  ;;  %v3080_v52 = vld [vmem:[%s3991_s7 + $0x1] ss:$0 sm:$0xff] }
 0x68b   : > { %v1265_v27 = vor.u32 1.1754944e-38, %v1264_v23  ;;  %vm1263_vm7 = vcmp.eq.f32.partialorder %v1262_v25, 8.507059e+37  ;;  %v3078_v23 = vld [vmem:[%s3991_s7 + $0x3] ss:$0 sm:$0xff] }
 0x68f   : > { %v3124_v20 = vpop.eup %3123 }
 0x690   : > { %v1254_v21 = vmul.f32 %v3124_v20, %v1237_v19  ;;  %vm1259_vm4 = vweird.f32 %v3124_v20  ;;  %v3126_v53 = vpop.eup %3125 }
 0x691   : > { %vm1260_vm6 = vmor %vm1258_vm5, %vm1259_vm4  ;;  %v1366_v54 = vmul.f32 32.0, %v3126_v53  ;;  %vm1370_vm8 = vweird.f32 %v3126_v53 }
 0x692   : > { %v1255_v22 = vsub.f32 1.0, %v1254_v21 }
 0x694   : > { %v1256_v24 = vmul.f32 %v3124_v20, %v1255_v22 }
 0x696   : > { %v1257_v26 = vadd.f32 %v3124_v20, %v1256_v24 }
 0x698   : > { %v1261_v28 = vsel %vm1260_vm6, %v3124_v20, %v1257_v26  ;;  %v3077_v20 = vld [vmem:[%s3991_s7 + $0x2] ss:$0 sm:$0xff]  ;;  %v1462_v26 = vld [vmem:[%s3994_s10 + $0x38] sm:$0xff] }
 0x699   : > { %v1266_v29 = vsel %vm1263_vm7, %v1265_v27, %v1261_v28  ;;  %v1461_v27 = vld [vmem:[%s3994_s10 + $0x30] sm:$0xff]  ;;  %1480 = vmatpush.msra.mxu0 %v1462_v26  ;;  %v1460_v28 = vld [vmem:[%s3994_s10 + $0x28] sm:$0xff]  ;;  %v3082_v26 = vld [vmem:[%s3991_s7 + $0x5] ss:$0 sm:$0xff] }
 0x69a   : > { %v1267_v30 = vmul.f32 %v3118_v49, %v1266_v29 }
 0x69b   : > { %1481 = vmatpush.msra.mxu0 %v1461_v27 }
 0x69c   : > { %2936 = vmatmul.msk.f32.vlgmr.msrb.gmra.mxu2 %vm603_vm3, %v1267_v30 }
 0x69d   : > { %1482 = vmatpush.msra.mxu0 %v1460_v28 }
 0x69f   : > { %1483 = vmatpush.msra.mxu0 %v1459_v31 }
 0x6c4   : > { %v1128_v32 = vpop.f32.mrf.mxu1 }
 0x6c5   : > { %2930 = vmatmul.msk.f32.gmra.mxu0 %vm603_vm3, %v1128_v32 }
 0x6cc   : > { %v1291_v33 = vpop.f32.mrf.mxu1 }
 0x6cd   : > { %2937 = vmatmul.msk.f32.vlgmr.msra.gmra.mxu3 %vm603_vm3, %v1291_v33  ;;  %v1458_v33 = vld [vmem:[%s3994_s10 + $0x18] sm:$0xff] }
 0x6ce   : > { %1484 = vmatpush.msra.mxu0 %v1458_v33 }
 0x71f   : > { %v1317_v34 = vpop.f32.mrf.mxu2 }
 0x720   : > { %2938 = vmatmul.msk.f32.gmra.mxu3 %vm603_vm3, %v1317_v34 }
 0x742   : > { %v1157_v45 = vpop.f32.mrf.mxu0 }
 0x743   : > { %v1161_v47 = vadd.f32 %v1157_v45, %v971_v46  ;;  %v1455_v45 = vld [vmem:[%s3994_s10] sm:$0xff] }
 0x744   : > { %v3079_v46 = vld [vmem:[%s3993_s9] ss:$0 sm:$0xff] }
 0x750   : > { %v1343_v41 = vpop.f32.mrf.mxu3 }
 0x751   : > { %v1349_v42 = vadd.f32 %v1343_v41, %v1160_v39 }
 0x753   : > { %v1353_v43 = vadd.f32 %v3076_v40, %v1349_v42 }
 0x755   : > { %v1355_v44 = vadd.f32 %v1353_v43, %v3432_v10  ;;  %v1367_v10 = vsub.f32 1.0, %v1366_v54 }
 0x757   : > { %v1359_v16 = vsel %vm566_vm2, %v1355_v44, 0.0  ;;  %v1368_v55 = vmul.f32 %v3126_v53, %v1367_v10 }
 0x758   : > { %1360 = vadd.xlane.f32.xlu0 %v1359_v16  ;;  %v1456_v16 = vld [vmem:[%s3994_s10 + $0x8] sm:$0xff] }
 0x759   : > { %v1369_v56 = vadd.f32 %v3126_v53, %v1368_v55 }
 0x75b   : > { %v3581_v57 = vsel %vm1370_vm8, %v3126_v53, %v1369_v56 }
 0x7a3   : > { %v1346_v48 = vpop.f32.mrf.mxu3 }
 0x7a4   : > { %v1350_v49 = vadd.f32 %v1346_v48, %v1161_v47 }
 0x7a6   : > { %v1354_v58 = vadd.f32 %v3076_v40, %v1350_v49 }
 0x7a8   : > { %v1356_v50 = vadd.f32 %v1354_v58, %v3439_v13 }
 0x7aa   : > { %v1362_v51 = vsel %vm566_vm2, %v1356_v50, 0.0 }
 0x7ab   : > { %1363 = vadd.xlane.f32.xlu2 %v1362_v51 }
 0x7cb   : > { %v1361_v1 = vpop.xlane.xlu0 %1360 }
 0x7cc   : > { %v1372_v59 = vmul.f32 %v3581_v57, %v1361_v1 }
 0x7ce   : > { %v1374_v18 = vsub.f32 %v1355_v44, %v1372_v59  ;;  %v1457_v44 = vld [vmem:[%s3994_s10 + $0x10] sm:$0xff] }
 0x7cf   : > { %1485 = vmatpush.msra.mxu0 %v1457_v44 }
 0x7d0   : > { %v1376_v60 = vmul.f32 %v1374_v18, %v1374_v18 }
 0x7d1   : > { %1486 = vmatpush.msra.mxu0 %v1456_v16 }
 0x7d2   : > { %v1378_v13 = vsel %vm566_vm2, %v1376_v60, 0.0 }
 0x7d3   : > { %1379 = vadd.xlane.f32.xlu1 %v1378_v13  ;;  %1487 = vmatpush.msra.mxu0 %v1455_v45 }
 0x81e   : > { %v1364_v61 = vpop.xlane.xlu2 %1363 }
 0x81f   : > { %v1373_v62 = vmul.f32 %v3581_v57, %v1364_v61 }
 0x821   : > { %v1375_v63 = vsub.f32 %v1356_v50, %v1373_v62 }
 0x823   : > { %v1377_v0 = vmul.f32 %v1375_v63, %v1375_v63 }
 0x825   : > { %v1381_v2 = vsel %vm566_vm2, %v1377_v0, 0.0 }
 0x826   : > { %1382 = vadd.xlane.f32.xlu2 %v1381_v2 }
 0x846   : > { %v1380_v7 = vpop.xlane.xlu1 %1379 }
 0x847   : > { %v1384_v8 = vmul.f32 %v1380_v7, %v3581_v57  ;;  %v2945_v7 = vld [vmem:[%s3988_s4 + $0x30] sm:$0xff] }
 0x848   : > { %1578 = vmatpush.msra.mxu2 %v2945_v7 }
 0x849   : > { %v1386_v9 = vadd.f32 1e-05, %v1384_v8  ;;  %v2944_v8 = vld [vmem:[%s3988_s4 + $0x28] sm:$0xff] }
 0x84a   : > { %1579 = vmatpush.msra.mxu2 %v2944_v8 }
 0x84b   : > { %3127 = vrsqrt.f32 %v1386_v9  ;;  %vm1394_vm10 = vweird.f32 %v1386_v9 }
 0x851   : > { %v3128_v11 = vpop.eup %3127 }
 0x852   : > { %v1389_v12 = vmul.f32 %v3128_v11, %v1386_v9  ;;  %vm1395_vm9 = vweird.f32 %v3128_v11  ;;  %v2943_v9 = vld [vmem:[%s3988_s4 + $0x20] sm:$0xff] }
 0x853   : > { %vm1396_vm11 = vmor %vm1394_vm10, %vm1395_vm9  ;;  %1580 = vmatpush.msra.mxu2 %v2943_v9 }
 0x854   : > { %v1390_v14 = vmul.f32 %v3128_v11, %v1389_v12 }
 0x856   : > { %v1391_v15 = vmul.f32 0.5, %v1390_v14 }
 0x858   : > { %v1392_v17 = vsub.f32 1.5, %v1391_v15 }
 0x85a   : > { %v1393_v19 = vmul.f32 %v3128_v11, %v1392_v17 }
 0x85c   : > { %v1397_v21 = vsel %vm1396_vm11, %v3128_v11, %v1393_v19 }
 0x85d   : > { %v1408_v22 = vmul.f32 %v1397_v21, %v1374_v18 }
 0x85f   : > { %v1411_v24 = vmul.f32 %v3077_v20, %v1408_v22 }
 0x861   : > { %v1414_v25 = vadd.f32 %v3078_v23, %v1411_v24 }
 0x863   : > { %2939 = vmatmul.msk.f32.vlgmr.msra.gmra.mxu1 %vm566_vm2, %v1414_v25 }
 0x899   : > { %v1383_v29 = vpop.xlane.xlu2 %1382 }
 0x89a   : > { %v1385_v30 = vmul.f32 %v1383_v29, %v3581_v57 }
 0x89c   : > { %v1387_v32 = vadd.f32 1e-05, %v1385_v30 }
 0x89e   : > { %3129 = vrsqrt.f32 %v1387_v32  ;;  %vm1404_vm13 = vweird.f32 %v1387_v32 }
 0x8a4   : > { %v3130_v34 = vpop.eup %3129 }
 0x8a5   : > { %v1399_v35 = vmul.f32 %v3130_v34, %v1387_v32  ;;  %vm1405_vm12 = vweird.f32 %v3130_v34 }
 0x8a6   : > { %vm1406_vm14 = vmor %vm1404_vm13, %vm1405_vm12 }
 0x8a7   : > { %v1400_v36 = vmul.f32 %v3130_v34, %v1399_v35 }
 0x8a9   : > { %v1401_v37 = vmul.f32 0.5, %v1400_v36 }
 0x8ab   : > { %v1402_v38 = vsub.f32 1.5, %v1401_v37 }
 0x8ad   : > { %v1403_v39 = vmul.f32 %v3130_v34, %v1402_v38 }
 0x8af   : > { %v1407_v40 = vsel %vm1406_vm14, %v3130_v34, %v1403_v39 }
 0x8b0   : > { %v1409_v41 = vmul.f32 %v1407_v40, %v1375_v63 }
 0x8b2   : > { %v1412_v42 = vmul.f32 %v3077_v20, %v1409_v41 }
 0x8b4   : > { %v1415_v43 = vadd.f32 %v3078_v23, %v1412_v42  ;;  %v3081_v23 = vld [vmem:[%s3991_s7 + $0x4] ss:$0 sm:$0xff]  ;;  %v3083_v42 = vld [vmem:[%s3989_s5 + $0x1] ss:$0 sm:$0xff] }
 0x8b6   : > { %2940 = vmatmul.msk.f32.gmra.mxu1 %vm566_vm2, %v1415_v43 }
 0x8e0   : > { %v1447_v47 = vpop.f32.mrf.mxu1 }
 0x8e1   : > { %v1448_v48 = vadd.f32 %v3079_v46, %v1447_v47 }
 0x8e3   : > { %v1453_v49 = vmax.f32 %v1448_v48, 0.0 }
 0x8e5   : > { %2941 = vmatmul.msk.f32.vlgmr.msra.gmra.mxu0 %vm1465_vm15, %v1453_v49 }
 0x933   : > { %v1450_v58 = vpop.f32.mrf.mxu1 }
 0x934   : > { %v1451_v50 = vadd.f32 %v3079_v46, %v1450_v58 }
 0x936   : > { %v1454_v51 = vmax.f32 %v1451_v50, 0.0 }
 0x938   : > { %2942 = vmatmul.msk.f32.gmra.mxu0 %vm1465_vm15, %v1454_v51 }
 0x962   : > { %v1489_v53 = vpop.f32.mrf.mxu0 }
 0x963   : > { %v1490_v54 = vadd.f32 %v3080_v52, %v1489_v53 }
 0x965   : > { %v1495_v10 = vadd.f32 %v1490_v54, %v1414_v25 }
 0x967   : > { %v1499_v55 = vsel %vm566_vm2, %v1495_v10, 0.0 }
 0x968   : > { %1500 = vadd.xlane.f32.xlu2 %v1499_v55 }
 0x9b5   : > { %v1492_v56 = vpop.f32.mrf.mxu0 }
 0x9b6   : > { %v1493_v1 = vadd.f32 %v3080_v52, %v1492_v56 }
 0x9b8   : > { %v1496_v59 = vadd.f32 %v1493_v1, %v1415_v43 }
 0x9ba   : > { %v1502_v18 = vsel %vm566_vm2, %v1496_v59, 0.0 }
 0x9bb   : > { %1503 = vadd.xlane.f32.xlu2 %v1502_v18 }
 0x9db   : > { %v1501_v60 = vpop.xlane.xlu2 %1500 }
 0x9dc   : > { %v1505_v13 = vmul.f32 %v1501_v60, %v3581_v57 }
 0x9de   : > { %v1507_v61 = vsub.f32 %v1495_v10, %v1505_v13 }
 0x9e0   : > { %v1509_v62 = vmul.f32 %v1507_v61, %v1507_v61 }
 0x9e2   : > { %v1511_v63 = vsel %vm566_vm2, %v1509_v62, 0.0 }
 0x9e3   : > { %1512 = vadd.xlane.f32.xlu0 %v1511_v63 }
 0xa2e   : > { %v1504_v0 = vpop.xlane.xlu2 %1503 }
 0xa2f   : > { %v1506_v2 = vmul.f32 %v1504_v0, %v3581_v57 }
 0xa31   : > { %v1508_v3 = vsub.f32 %v1496_v59, %v1506_v2 }
 0xa33   : > { %v1510_v4 = vmul.f32 %v1508_v3, %v1508_v3 }
 0xa35   : > { %v1514_v5 = vsel %vm566_vm2, %v1510_v4, 0.0 }
 0xa36   : > { %1515 = vadd.xlane.f32.xlu0 %v1514_v5 }
 0xa56   : > { %v1513_v11 = vpop.xlane.xlu0 %1512 }
 0xa57   : > { %v1517_v12 = vmul.f32 %v1513_v11, %v3581_v57 }
 0xa59   : > { %v1519_v14 = vadd.f32 1e-05, %v1517_v12 }
 0xa5b   : > { %3131 = vrsqrt.f32 %v1519_v14  ;;  %vm1527_vm1 = vweird.f32 %v1519_v14 }
 0xa61   : > { %v3132_v15 = vpop.eup %3131 }
 0xa62   : > { %v1522_v17 = vmul.f32 %v3132_v15, %v1519_v14  ;;  %vm1528_vm0 = vweird.f32 %v3132_v15 }
 0xa63   : > { %vm1529_vm4 = vmor %vm1527_vm1, %vm1528_vm0 }
 0xa64   : > { %v1523_v19 = vmul.f32 %v3132_v15, %v1522_v17 }
 0xa66   : > { %v1524_v20 = vmul.f32 0.5, %v1523_v19 }
 0xa68   : > { %v1525_v21 = vsub.f32 1.5, %v1524_v20 }
 0xa6a   : > { %v1526_v22 = vmul.f32 %v3132_v15, %v1525_v21 }
 0xa6c   : > { %v1530_v24 = vsel %vm1529_vm4, %v3132_v15, %v1526_v22 }
 0xa6d   : > { %v1541_v25 = vmul.f32 %v1530_v24, %v1507_v61 }
 0xa6f   : > { %v1544_v27 = vmul.f32 %v3081_v23, %v1541_v25 }
 0xa71   : > { %v3666_v28 = vadd.f32 %v3082_v26, %v1544_v27 }
 0xa73   : > { %2948 = vmatmul.msk.f32.vlgmr.msra.gmra.mxu2 %vm566_vm2, %v3666_v28 }
 0xaa9   : > { %v1516_v29 = vpop.xlane.xlu0 %1515 }
 0xaaa   : > { %v1518_v30 = vmul.f32 %v1516_v29, %v3581_v57 }
 0xaac   : > { %v1520_v31 = vadd.f32 1e-05, %v1518_v30 }
 0xaae   : > { %3133 = vrsqrt.f32 %v1520_v31  ;;  %vm1537_vm6 = vweird.f32 %v1520_v31 }
 0xab4   : > { %v3134_v32 = vpop.eup %3133 }
 0xab5   : > { %v1532_v33 = vmul.f32 %v3134_v32, %v1520_v31  ;;  %vm1538_vm5 = vweird.f32 %v3134_v32 }
 0xab6   : > { %vm1539_vm7 = vmor %vm1537_vm6, %vm1538_vm5 }
 0xab7   : > { %v1533_v34 = vmul.f32 %v3134_v32, %v1532_v33 }
 0xab9   : > { %v1534_v35 = vmul.f32 0.5, %v1533_v34 }
 0xabb   : > { %v1535_v36 = vsub.f32 1.5, %v1534_v35 }
 0xabd   : > { %v1536_v37 = vmul.f32 %v3134_v32, %v1535_v36 }
 0xabf   : > { %v1540_v38 = vsel %vm1539_vm7, %v3134_v32, %v1536_v37 }
 0xac0   : > { %v1542_v39 = vmul.f32 %v1540_v38, %v1508_v3 }
 0xac2   : > { %v1545_v40 = vmul.f32 %v3081_v23, %v1542_v39 }
 0xac4   : > { %v3671_v41 = vadd.f32 %v3082_v26, %v1545_v40 }
 0xac6   : > { %2949 = vmatmul.msk.f32.gmra.mxu2 %vm566_vm2, %v3671_v41 }
 0xaf6   : > { %v1582_v43 = vpop.f32.mrf.mxu2 }
 0xaf7   : > { %v3678_v44 = vadd.f32 %v3083_v42, %v1582_v43 }
 0xaf9   : > { %1751 = vrot.lane.b32.xlu2 %v3678_v44, %s3259_s29  ;;  %1594 = vrot.lane.b32.xlu1 %v3678_v44, %s3260_s27 }
 0xafa   : > { %1749 = vrot.lane.b32.xlu0 %v3678_v44, %s4031_s23 }
 0xb49   : > { %v1585_v16 = vpop.f32.mrf.mxu2 }
 0xb4a   : > { %v3686_v45 = vadd.f32 %v3083_v42, %v1585_v16 }
 0xb4c   : > { %1621 = vrot.lane.b32.xlu0 %v3686_v45, %s3260_s27  ;;  %s4032_s27 = smov 56  }
 0xb53   : > { %v1752_v47 = vpop.permute.xlu2 %1751 }
 0xb6b   : > { %v1595_v46 = vpop.permute.xlu1 %1594 }
 0xb6c   : > { %2954 = vmatpush.xpose.msk.msrb.mxu3 %vm603_vm3, %v1595_v46  ;;  %v1750_v48 = vpop.permute.xlu0 %1749 }
 0xb6f   : > { %2955 = vmatmul.msk.f32.vlgmr.msrb.gmra.mxu3 %vm603_vm3, %v3678_v44 }
 0xb70   : > { %2960 = vmatpush.xpose.msk.msra.mxu3 %vm603_vm3, %v1752_v47 }
 0xb77   : > { %2961 = vmatmul.msk.f32.vlgmr.msra.gmra.mxu3 %vm603_vm3, %v1750_v48 }
 0xbbe   : > { %v1622_v49 = vpop.permute.xlu0 %1621 }
 0xbbf   : > { %2956 = vmatpush.xpose.msk.msrb.mxu1 %vm603_vm3, %v1622_v49  ;;  %v2950_v49 = vld [vmem:[%s3990_s6 + $0x20] sm:$0xff] }
 0xbc2   : > { %2957 = vmatmul.msk.f32.vlgmr.msrb.gmra.mxu1 %vm603_vm3, %v3686_v45 }
 0xbf2   : > { %v1617_v58 = vpop.f32.mrf.mxu3 }
 0xbf3   : > { %v1647_v50 = vmul.f32 0.35355338, %v1617_v58  ;;  %v2951_v58 = vld [vmem:[%s3990_s6 + $0x28] sm:$0xff] }
 0xbf4   : > { %1928 = vmatpush.msrb.mxu3 %v2951_v58 }
 0xbf5   : > { %v1649_v51 = vsel %vm603_vm3, %v1647_v50, -inf }
 0xbf6   : > { %1650 = vmax.xlane.f32.xlu2 %v1649_v51 }
 0xbfa   : > { %v1774_v52 = vpop.f32.mrf.mxu3 }
 0xbfb   : > { %v1805_v53 = vmul.f32 0.35355338, %v1774_v52 }
 0xbfd   : > { %v1807_v54 = vsel %vm603_vm3, %v1805_v53, -inf }
 0xbfe   : > { %1808 = vmax.xlane.f32.xlu1 %v1807_v54 }
 0xc0e   : > { %1779 = vrot.lane.b32.xlu2 %v3686_v45, %s3259_s29  ;;  %s4036_s29 = smov 104  }
 0xc16   : > { %1855 = vrot.lane.b32.xlu2 %v3678_v44, %s4032_s27 }
 0xc17   : > { %1777 = vrot.lane.b32.xlu1 %v3686_v45, %s4031_s23 }
 0xc1e   : > { %1965 = vrot.lane.b32.xlu2 %v3678_v44, %s4033_s22 }
 0xc1f   : > { %1967 = vrot.lane.b32.xlu1 %v3678_v44, %s4034_s16 }
 0xc26   : > { %1723 = vrot.lane.b32.xlu2 %v3686_v45, %s4035_s17 }
 0xc3f   : > { %v1644_v5 = vpop.f32.mrf.mxu1 }
 0xc40   : > { %v1648_v6 = vmul.f32 0.35355338, %v1644_v5 }
 0xc42   : > { %v1652_v7 = vsel %vm603_vm3, %v1648_v6, -inf }
 0xc69   : > { %v1651_v10 = vpop.xlane.xlu2 %1650 }
 0xc6a   : > { %v1655_v55 = vsub.f32 %v1647_v50, %v1651_v10 }
 0xc6c   : > { %v1657_v56 = vmul.f32 1.442695, %v1655_v55 }
 0xc6e   : > { %3135 = vpow2.f32 %v1657_v56 }
 0xc71   : > { %v1809_v1 = vpop.xlane.xlu1 %1808  ;;  %v1780_v59 = vpop.permute.xlu2 %1779 }
 0xc72   : > { %v1813_v18 = vsub.f32 %v1805_v53, %v1809_v1  ;;  %2962 = vmatpush.xpose.msk.msra.mxu1 %vm603_vm3, %v1780_v59 }
 0xc74   : > { %v3136_v60 = vpop.eup %3135  ;;  %v1815_v13 = vmul.f32 1.442695, %v1813_v18 }
 0xc75   : > { %v1661_v61 = vsel %vm603_vm3, %v3136_v60, 0.0 }
 0xc76   : > { %3137 = vpow2.f32 %v1815_v13  ;;  %1662 = vadd.xlane.f32.xlu0 %v1661_v61  ;;  %1957 = vmatpush.msrb.mxu1 %v2950_v49 }
 0xc79   : > { %v1856_v62 = vpop.permute.xlu2 %1855 }
 0xc7c   : > { %v3138_v63 = vpop.eup %3137 }
 0xc7d   : > { %v1819_v0 = vsel %vm603_vm3, %v3138_v63, 0.0 }
 0xc7e   : > { %1820 = vadd.xlane.f32.xlu0 %v1819_v0 }
 0xc81   : > { %v1966_v2 = vpop.permute.xlu2 %1965 }
 0xc89   : > { %v1778_v3 = vpop.permute.xlu1 %1777  ;;  %v1724_v4 = vpop.permute.xlu2 %1723 }
 0xc8a   : > { %1744 = vmatpush.msrb.mxu2 %v1724_v4  ;;  %2963 = vmatmul.msk.f32.vlgmr.msra.gmra.mxu1 %vm603_vm3, %v1778_v3 }
 0xc91   : > { %v1968_v35 = vpop.permute.xlu1 %1967 }
 0xc92   : > { %1697 = vrot.lane.b32.xlu0 %v3678_v44, %s4035_s17 }
 0xcbc   : > { %1653 = vmax.xlane.f32.xlu0 %v1652_v7 }
 0xce9   : > { %v1663_v8 = vpop.xlane.xlu0 %1662 }
 0xcea   : > { %3139 = vrcp.f32 %v1663_v8  ;;  %v1678_v21 = vand.u32 2147483648, %v1663_v8  ;;  %vm1672_vm9 = vweird.f32 %v1663_v8  ;;  %v1676_v23 = vand.u32 2147483647, %v1663_v8 }
 0xcec   : > { %v1679_v26 = vor.u32 1.1754944e-38, %v1678_v21  ;;  %vm1677_vm11 = vcmp.eq.f32.partialorder %v1676_v23, 8.507059e+37 }
 0xcf0   : > { %v3140_v9 = vpop.eup %3139 }
 0xcf1   : > { %v1668_v11 = vmul.f32 %v3140_v9, %v1663_v8  ;;  %v1821_v12 = vpop.xlane.xlu0 %1820  ;;  %vm1673_vm8 = vweird.f32 %v3140_v9 }
 0xcf2   : > { %3141 = vrcp.f32 %v1821_v12  ;;  %vm1674_vm10 = vmor %vm1672_vm9, %vm1673_vm8  ;;  %v1836_v30 = vand.u32 2147483648, %v1821_v12  ;;  %vm1830_vm13 = vweird.f32 %v1821_v12  ;;  %v1834_v31 = vand.u32 2147483647, %v1821_v12 }
 0xcf3   : > { %v1669_v14 = vsub.f32 1.0, %v1668_v11 }
 0xcf4   : > { %v1837_v36 = vor.u32 1.1754944e-38, %v1836_v30  ;;  %vm1835_vm0 = vcmp.eq.f32.partialorder %v1834_v31, 8.507059e+37 }
 0xcf5   : > { %v1670_v15 = vmul.f32 %v3140_v9, %v1669_v14 }
 0xcf7   : > { %v1671_v20 = vadd.f32 %v3140_v9, %v1670_v15 }
 0xcf8   : > { %v3142_v17 = vpop.eup %3141 }
 0xcf9   : > { %v1826_v19 = vmul.f32 %v3142_v17, %v1821_v12  ;;  %v1675_v24 = vsel %vm1674_vm10, %v3140_v9, %v1671_v20  ;;  %vm1831_vm12 = vweird.f32 %v3142_v17 }
 0xcfa   : > { %v1680_v27 = vsel %vm1677_vm11, %v1679_v26, %v1675_v24  ;;  %vm1832_vm14 = vmor %vm1830_vm13, %vm1831_vm12 }
 0xcfb   : > { %v1827_v22 = vsub.f32 1.0, %v1826_v19  ;;  %v1681_v33 = vmul.f32 %v3136_v60, %v1680_v27 }
 0xcfd   : > { %v1828_v25 = vmul.f32 %v3142_v17, %v1827_v22 }
 0xcff   : > { %v1829_v29 = vadd.f32 %v3142_v17, %v1828_v25 }
 0xd01   : > { %v1833_v34 = vsel %vm1832_vm14, %v3142_v17, %v1829_v29 }
 0xd02   : > { %v1838_v39 = vsel %vm1835_vm0, %v1837_v36, %v1833_v34 }
 0xd03   : > { %v1839_v42 = vmul.f32 %v3138_v63, %v1838_v39 }
 0xd04   : > { %v1698_v32 = vpop.permute.xlu0 %1697 }
 0xd05   : > { %1718 = vmatpush.msrb.mxu0 %v1698_v32 }
 0xd06   : > { %2958 = vmatmul.msk.f32.vlgmr.msrb.gmra.mxu0 %vm603_vm3, %v1681_v33 }
 0xd07   : > { %1876 = vmatpush.msra.mxu0 %v1856_v62  ;;  %v1802_v37 = vpop.f32.mrf.mxu1 }
 0xd08   : > { %v1806_v38 = vmul.f32 0.35355338, %v1802_v37 }
 0xd09   : > { %2970 = vmatpush.xpose.msk.msrb.mxu0 %vm603_vm3, %v1968_v35 }
 0xd0a   : > { %v1810_v40 = vsel %vm603_vm3, %v1806_v38, -inf }
 0xd0b   : > { %1811 = vmax.xlane.f32.xlu2 %v1810_v40 }
 0xd0e   : > { %2964 = vmatmul.msk.f32.vlgmr.msra.gmra.mxu0 %vm603_vm3, %v1839_v42 }
 0xd16   : > { %2971 = vmatmul.msk.f32.vlgmr.msrb.gmra.mxu0 %vm603_vm3, %v1966_v2 }
 0xd23   : > { %1993 = vrot.lane.b32.xlu2 %v3686_v45, %s4033_s22  ;;  %s4038_s22 = smov 48  }
 0xd2b   : > { %2154 = vrot.lane.b32.xlu2 %v3678_v44, %s4036_s29 }
 0xd2f   : > { %v1654_v43 = vpop.xlane.xlu0 %1653 }
 0xd30   : > { %v1656_v16 = vsub.f32 %v1648_v6, %v1654_v43 }
 0xd32   : > { %v1659_v46 = vmul.f32 1.442695, %v1656_v16 }
 0xd33   : > { %2184 = vrot.lane.b32.xlu2 %v3686_v45, %s4037_s26 }
 0xd34   : > { %3143 = vpow2.f32 %v1659_v46 }
 0xd3a   : > { %v3144_v47 = vpop.eup %3143 }
 0xd3b   : > { %v1664_v48 = vsel %vm603_vm3, %v3144_v47, 0.0 }
 0xd3c   : > { %1665 = vadd.xlane.f32.xlu1 %v1664_v48 }
 0xd7e   : > { %v1812_v50 = vpop.xlane.xlu2 %1811 }
 0xd7f   : > { %v1814_v51 = vsub.f32 %v1806_v38, %v1812_v50 }
 0xd81   : > { %v1817_v52 = vmul.f32 1.442695, %v1814_v51 }
 0xd83   : > { %3145 = vpow2.f32 %v1817_v52  ;;  %v1720_v53 = vpop.f32.mrf.mxu0 }
 0xd84   : > { %2968 = vmatmul.msk.f32.vlgmr.msrb.gmra.mxu1 %vm603_vm3, %v1720_v53 }
 0xd86   : > { %v1994_v19 = vpop.permute.xlu2 %1993 }
 0xd89   : > { %v3146_v54 = vpop.eup %3145 }
 0xd8a   : > { %v1822_v10 = vsel %vm603_vm3, %v3146_v54, 0.0 }
 0xd8b   : > { %v1878_v55 = vpop.f32.mrf.mxu0  ;;  %1823 = vadd.xlane.f32.xlu1 %v1822_v10 }
 0xd8c   : > { %2966 = vmatmul.msk.f32.vlgmr.msrb.gmra.mxu3 %vm603_vm3, %v1878_v55 }
 0xd8e   : > { %v2155_v30 = vpop.permute.xlu2 %2154 }
 0xd93   : > { %v1990_v56 = vpop.f32.mrf.mxu0 }
 0xd94   : > { %v2021_v1 = vmul.f32 0.35355338, %v1990_v56 }
 0xd96   : > { %v2023_v59 = vsel %vm603_vm3, %v2021_v1, -inf  ;;  %v2185_v35 = vpop.permute.xlu2 %2184 }
 0xd97   : > { %2024 = vmax.xlane.f32.xlu0 %v2023_v59 }
 0xda4   : > { %1995 = vrot.lane.b32.xlu1 %v3686_v45, %s4034_s16 }
 0xdab   : > { %1881 = vrot.lane.b32.xlu0 %v3686_v45, %s4032_s27  ;;  %s4039_s27 = smov 40  }
 0xdac   : > { %2156 = vrot.lane.b32.xlu1 %v3678_v44, %s4037_s26 }
 0xdaf   : > { %v1666_v18 = vpop.xlane.xlu1 %1665 }
 0xdb0   : > { %3147 = vrcp.f32 %v1666_v18  ;;  %v1693_v62 = vand.u32 2147483648, %v1666_v18  ;;  %v1691_v0 = vand.u32 2147483647, %v1666_v18  ;;  %vm1687_vm4 = vweird.f32 %v1666_v18 }
 0xdb2   : > { %v1694_v3 = vor.u32 1.1754944e-38, %v1693_v62  ;;  %vm1692_vm6 = vcmp.eq.f32.partialorder %v1691_v0, 8.507059e+37 }
 0xdb4   : > { %2071 = vrot.lane.b32.xlu1 %v3678_v44, %s4038_s22 }
 0xdb6   : > { %v3148_v60 = vpop.eup %3147 }
 0xdb7   : > { %v1683_v13 = vmul.f32 %v3148_v60, %v1666_v18  ;;  %vm1688_vm1 = vweird.f32 %v3148_v60  ;;  %v2952_v18 = vld [vmem:[%s3990_s6 + $0x30] sm:$0xff] }
 0xdb8   : > { %vm1689_vm5 = vmor %vm1687_vm4, %vm1688_vm1  ;;  %2144 = vmatpush.msra.mxu3 %v2952_v18  ;;  %v2953_v18 = vld [vmem:[%s3990_s6 + $0x38] sm:$0xff] }
 0xdb9   : > { %v1684_v61 = vsub.f32 1.0, %v1683_v13 }
 0xdbb   : > { %v1685_v63 = vmul.f32 %v3148_v60, %v1684_v61 }
 0xdbc   : > { %2182 = vrot.lane.b32.xlu1 %v3686_v45, %s4036_s29  ;;  %s4040_s29 = sshll.u32 %s3412_s20, 3  ;;  %s2815_s20 = scalar_lea.hbm %s3999_s15, %s3405_s25 }
 0xdbd   : > { %v1686_v2 = vadd.f32 %v3148_v60, %v1685_v63  ;;  %s515_s30 = scalar_lea.vmem %s3985_s1, %s4040_s29  ;;  %s502_s29 = sand.u32 1, %s3249_s19  }
 0xdbe   : > { %s2897_s26 = sshll.u32 %s502_s29, 1  ;;  %s3948_s23 = sshll.u32 %s2815_s20, 4  ;;  %s2819_s23 = int_to_ptr.hbm [resolvable:$true] %s3948_s23 }
 0xdbf   : > { %v1690_v4 = vsel %vm1689_vm5, %v3148_v60, %v1686_v2  ;;  %s504_s24 = scalar_lea.vmem [#allocation2], %s2897_s26  ;;  %s2805_s25 = scalar_lea.sflag [#allocation3], %s502_s29 }
 0xdc0   : > { %v1695_v5 = vsel %vm1692_vm6, %v1694_v3, %v1690_v4 }
 0xdc1   : > { %v1696_v6 = vmul.f32 %v3144_v47, %v1695_v5 }
 0xdc3   : > { %2959 = vmatmul.msk.f32.vlgmr.msrb.gmra.mxu2 %vm603_vm3, %v1696_v6 }
 0xdfe   : > { %v1824_v7 = vpop.xlane.xlu1 %1823 }
 0xdff   : > { %3149 = vrcp.f32 %v1824_v7  ;;  %v1851_v21 = vand.u32 2147483648, %v1824_v7  ;;  %vm1845_vm8 = vweird.f32 %v1824_v7  ;;  %v1849_v23 = vand.u32 2147483647, %v1824_v7 }
 0xe01   : > { %v1852_v27 = vor.u32 1.1754944e-38, %v1851_v21  ;;  %vm1850_vm10 = vcmp.eq.f32.partialorder %v1849_v23, 8.507059e+37  ;;  %v3764_v10 = vpop.f32.mrf.mxu1 }
 0xe05   : > { %v3150_v8 = vpop.eup %3149 }
 0xe06   : > { %v1841_v9 = vmul.f32 %v3150_v8, %v1824_v7  ;;  %vm1846_vm7 = vweird.f32 %v3150_v8 }
 0xe07   : > { %vm1847_vm9 = vmor %vm1845_vm8, %vm1846_vm7 }
 0xe08   : > { %v1842_v12 = vsub.f32 1.0, %v1841_v9 }
 0xe0a   : > { %v2025_v11 = vpop.xlane.xlu0 %2024  ;;  %v1843_v17 = vmul.f32 %v3150_v8, %v1842_v12 }
 0xe0b   : > { %v2029_v14 = vsub.f32 %v2021_v1, %v2025_v11 }
 0xe0c   : > { %v1844_v20 = vadd.f32 %v3150_v8, %v1843_v17 }
 0xe0d   : > { %v2031_v15 = vmul.f32 1.442695, %v2029_v14 }
 0xe0e   : > { %v1848_v26 = vsel %vm1847_vm9, %v3150_v8, %v1844_v20 }
 0xe0f   : > { %3151 = vpow2.f32 %v2031_v15  ;;  %v1853_v29 = vsel %vm1850_vm10, %v1852_v27, %v1848_v26 }
 0xe10   : > { %v1854_v32 = vmul.f32 %v3146_v54, %v1853_v29 }
 0xe15   : > { %v3152_v22 = vpop.eup %3151 }
 0xe16   : > { %v1996_v24 = vpop.permute.xlu1 %1995  ;;  %v2035_v25 = vsel %vm603_vm3, %v3152_v22, 0.0 }
 0xe17   : > { %2036 = vadd.xlane.f32.xlu0 %v2035_v25 }
 0xe1d   : > { %v1882_v31 = vpop.permute.xlu0 %1881 }
 0xe1e   : > { %1902 = vmatpush.msra.mxu2 %v1882_v31  ;;  %v2157_v33 = vpop.permute.xlu1 %2156 }
 0xe1f   : > { %2965 = vmatmul.msk.f32.vlgmr.msra.gmra.mxu2 %vm603_vm3, %v1854_v32  ;;  %2978 = vmatpush.xpose.msk.msra.mxu1 %vm603_vm3, %v2157_v33 }
 0xe20   : > { %2972 = vmatpush.xpose.msk.msrb.mxu2 %vm603_vm3, %v1996_v24 }
 0xe26   : > { %v2072_v34 = vpop.permute.xlu1 %2071 }
 0xe27   : > { %2973 = vmatmul.msk.f32.vlgmr.msrb.gmra.mxu2 %vm603_vm3, %v1994_v19  ;;  %2092 = vmatpush.msra.mxu0 %v2072_v34 }
 0xe29   : > { %2980 = vmatpush.xpose.msk.msrb.mxu0 %vm603_vm3, %v2185_v35 }
 0xe2e   : > { %v2183_v51 = vpop.permute.xlu1 %2182 }
 0xe46   : > { %v1746_v36 = vpop.f32.mrf.mxu2 }
 0xe47   : > { %2969 = vmatmul.msk.f32.gmra.mxu1 %vm603_vm3, %v1746_v36 }
 0xe4f   : > { %2979 = vmatmul.msk.f32.vlgmr.msra.gmra.mxu1 %vm603_vm3, %v2155_v30 }
 0xe8a   : > { %v2037_v37 = vpop.xlane.xlu0 %2036 }
 0xe8b   : > { %3153 = vrcp.f32 %v2037_v37  ;;  %v2052_v42 = vand.u32 2147483648, %v2037_v37  ;;  %v2050_v16 = vand.u32 2147483647, %v2037_v37  ;;  %vm2046_vm12 = vweird.f32 %v2037_v37 }
 0xe8d   : > { %v2053_v47 = vor.u32 1.1754944e-38, %v2052_v42  ;;  %vm2051_vm14 = vcmp.eq.f32.partialorder %v2050_v16, 8.507059e+37 }
 0xe91   : > { %v3154_v38 = vpop.eup %3153 }
 0xe92   : > { %v2042_v39 = vmul.f32 %v3154_v38, %v2037_v37  ;;  %vm2047_vm11 = vweird.f32 %v3154_v38 }
 0xe93   : > { %vm2048_vm13 = vmor %vm2046_vm12, %vm2047_vm11 }
 0xe94   : > { %v2043_v40 = vsub.f32 1.0, %v2042_v39 }
 0xe96   : > { %v2044_v43 = vmul.f32 %v3154_v38, %v2043_v40 }
 0xe98   : > { %v2045_v46 = vadd.f32 %v3154_v38, %v2044_v43 }
 0xe9a   : > { %v2049_v48 = vsel %vm2048_vm13, %v3154_v38, %v2045_v46 }
 0xe9b   : > { %v2054_v49 = vsel %vm2051_vm14, %v2053_v47, %v2049_v48 }
 0xe9c   : > { %v2055_v58 = vmul.f32 %v3152_v22, %v2054_v49 }
 0xe9e   : > { %2974 = vmatmul.msk.f32.vlgmr.msra.gmra.mxu0 %vm603_vm3, %v2055_v58 }
 0xe9f   : > { %2333 = vmatpush.msra.mxu0 %v2953_v18 }
 0xea2   : > { %v1904_v50 = vpop.f32.mrf.mxu2 }
 0xea3   : > { %2967 = vmatmul.msk.f32.gmra.mxu3 %vm603_vm3, %v1904_v50 }
 0xea6   : > { %2981 = vmatmul.msk.f32.vlgmr.msrb.gmra.mxu0 %vm603_vm3, %v2183_v51 }
 0xeaa   : > { %v2018_v52 = vpop.f32.mrf.mxu2 }
 0xeab   : > { %v2022_v53 = vmul.f32 0.35355338, %v2018_v52 }
 0xead   : > { %v2026_v54 = vsel %vm603_vm3, %v2022_v53, -inf }
 0xeae   : > { %2027 = vmax.xlane.f32.xlu2 %v2026_v54 }
 0xec4   : > { %v3766_v55 = vpop.f32.mrf.mxu1 }
 0xecc   : > { %v2179_v56 = vpop.f32.mrf.mxu1 }
 0xecd   : > { %v2210_v1 = vmul.f32 0.35355338, %v2179_v56 }
 0xecf   : > { %v2212_v59 = vsel %vm603_vm3, %v2210_v1, -inf }
 0xed0   : > { %2213 = vmax.xlane.f32.xlu1 %v2212_v59 }
 0xee9   : > { %2260 = vrot.lane.b32.xlu1 %v3678_v44, %s4039_s27 }
 0xf1b   : > { %v2094_v60 = vpop.f32.mrf.mxu0 }
 0xf1c   : > { %2976 = vmatmul.msk.f32.vlgmr.msra.gmra.mxu3 %vm603_vm3, %v2094_v60 }
 0xf21   : > { %v2028_v13 = vpop.xlane.xlu2 %2027 }
 0xf22   : > { %v2030_v61 = vsub.f32 %v2022_v53, %v2028_v13 }
 0xf23   : > { %v2207_v2 = vpop.f32.mrf.mxu0 }
 0xf24   : > { %v2033_v62 = vmul.f32 1.442695, %v2030_v61  ;;  %v2211_v3 = vmul.f32 0.35355338, %v2207_v2 }
 0xf26   : > { %3155 = vpow2.f32 %v2033_v62  ;;  %v2215_v44 = vsel %vm603_vm3, %v2211_v3, -inf  ;;  %v1930_v62 = vpop.f32.mrf.mxu3 }
 0xf27   : > { %v1960_v2 = vadd.f32 %v3764_v10, %v1930_v62 }
 0xf2c   : > { %v3156_v63 = vpop.eup %3155 }
 0xf2d   : > { %v2038_v0 = vsel %vm603_vm3, %v3156_v63, 0.0 }
 0xf2e   : > { %2039 = vadd.xlane.f32.xlu0 %v2038_v0 }
 0xf36   : > { %2216 = vmax.xlane.f32.xlu0 %v2215_v44  ;;  %v3084_v44 = vld [vmem:[%s3991_s7 + $0x8] ss:$0 sm:$0xff] }
 0xf43   : > { %v2214_v4 = vpop.xlane.xlu1 %2213 }
 0xf44   : > { %v2218_v5 = vsub.f32 %v2210_v1, %v2214_v4 }
 0xf46   : > { %v2220_v6 = vmul.f32 1.442695, %v2218_v5 }
 0xf48   : > { %3157 = vpow2.f32 %v2220_v6 }
 0xf4e   : > { %v3158_v7 = vpop.eup %3157 }
 0xf4f   : > { %v2224_v8 = vsel %vm603_vm3, %v3158_v7, 0.0 }
 0xf50   : > { %2225 = vadd.xlane.f32.xlu0 %v2224_v8 }
 0xf5b   : > { %v2261_v40 = vpop.permute.xlu1 %2260 }
 0xf64   : > { %2097 = vrot.lane.b32.xlu0 %v3686_v45, %s4038_s22  ;;  %s2816_s22 = sshll.u32 %s504_s24, 4  ;;  %s2817_s22 = int_to_ptr.vmem [resolvable:$true] %s2816_s22 }
 0xfa1   : > { %v2040_v9 = vpop.xlane.xlu0 %2039 }
 0xfa2   : > { %v2067_v27 = vand.u32 2147483648, %v2040_v9  ;;  %vm2061_vm1 = vweird.f32 %v2040_v9  ;;  %v2065_v30 = vand.u32 2147483647, %v2040_v9 }
 0xfa4   : > { %v2068_v33 = vor.u32 1.1754944e-38, %v2067_v27  ;;  %vm2066_vm5 = vcmp.eq.f32.partialorder %v2065_v30, 8.507059e+37  ;;  %v2990_v30 = vld [vmem:[%s3992_s8 + $0x28] sm:$0xff] }
 0xfa9   : > { %v2217_v11 = vpop.xlane.xlu0 %2216 }
 0xfaa   : > { %v2219_v12 = vsub.f32 %v2211_v3, %v2217_v11 }
 0xfac   : > { %v2222_v14 = vmul.f32 1.442695, %v2219_v12 }
 0xfae   : > { %3159 = vpow2.f32 %v2222_v14 }
 0xfaf   : > { %3161 = vrcp.f32 %v2040_v9 }
 0xfb4   : > { %v3160_v15 = vpop.eup %3159 }
 0xfb5   : > { %v2227_v17 = vsel %vm603_vm3, %v3160_v15, 0.0  ;;  %v3162_v19 = vpop.eup %3161 }
 0xfb6   : > { %2228 = vadd.xlane.f32.xlu2 %v2227_v17  ;;  %v2057_v20 = vmul.f32 %v3162_v19, %v2040_v9  ;;  %vm2062_vm0 = vweird.f32 %v3162_v19 }
 0xfb7   : > { %vm2063_vm4 = vmor %vm2061_vm1, %vm2062_vm0 }
 0xfb8   : > { %v2058_v22 = vsub.f32 1.0, %v2057_v20 }
 0xfba   : > { %v2059_v23 = vmul.f32 %v3162_v19, %v2058_v22 }
 0xfbc   : > { %v2060_v26 = vadd.f32 %v3162_v19, %v2059_v23 }
 0xfbe   : > { %v2064_v31 = vsel %vm2063_vm4, %v3162_v19, %v2060_v26 }
 0xfbf   : > { %v2069_v34 = vsel %vm2066_vm5, %v2068_v33, %v2064_v31  ;;  %v2989_v31 = vld [vmem:[%s3992_s8 + $0x20] sm:$0xff] }
 0xfc0   : > { %v2070_v39 = vmul.f32 %v3156_v63, %v2069_v34  ;;  %v1933_v63 = vpop.f32.mrf.mxu3 }
 0xfc1   : > { %v1963_v11 = vadd.f32 %v3766_v55, %v1933_v63 }
 0xfc3   : > { %v2226_v21 = vpop.xlane.xlu0 %2225 }
 0xfc4   : > { %3163 = vrcp.f32 %v2226_v21  ;;  %v2241_v36 = vand.u32 2147483648, %v2226_v21  ;;  %vm2235_vm7 = vweird.f32 %v2226_v21  ;;  %v2239_v37 = vand.u32 2147483647, %v2226_v21 }
 0xfc6   : > { %vm2240_vm9 = vcmp.eq.f32.partialorder %v2239_v37, 8.507059e+37 }
 0xfc8   : > { %v2146_v0 = vpop.f32.mrf.mxu3 }
 0xfc9   : > { %v2152_v3 = vadd.f32 %v2146_v0, %v1960_v2  ;;  %v2998_v2 = vld [vmem:[%s3994_s10 + $0x50] sm:$0xff] }
 0xfca   : > { %v3164_v24 = vpop.eup %3163 }
 0xfcb   : > { %v2231_v25 = vmul.f32 %v3164_v24, %v2226_v21  ;;  %vm2236_vm6 = vweird.f32 %v3164_v24 }
 0xfcc   : > { %vm2237_vm8 = vmor %vm2235_vm7, %vm2236_vm6 }
 0xfcd   : > { %v2232_v29 = vsub.f32 1.0, %v2231_v25 }
 0xfce   : > { %2286 = vrot.lane.b32.xlu2 %v3686_v45, %s4039_s27  ;;  %v2242_v45 = vor.u32 1.1754944e-38, %v2241_v36  ;;  %s3209_s27 = sshra.s32 %s2819_s23, 4  ;;  %s3210_s27 = int_to_ptr.hbm [resolvable:$true] %s3209_s27 }
 0xfcf   : > { %v2233_v32 = vmul.f32 %v3164_v24, %v2232_v29  ;;  %v2991_v29 = vld [vmem:[%s3992_s8 + $0x30] sm:$0xff]  ;;  %s3211_s16 = scalar_lea.hbm %s3210_s27, 2  ;;  %p3216_p0 = scmp.lt.s32.totalorder %s3210_s27, %s3999_s15 }
 0xfd0   : > { %p3212_p11 = scmp.ne.s32.totalorder %s3210_s27, %s3211_s16  ;;  %p3217_p1 = scmp.lt.s32.totalorder %s3215_s2, %s3211_s16 }
 0xfd1   : > { %v2234_v35 = vadd.f32 %v3164_v24, %v2233_v32 }
 0xfd2   : > { %p3213_p12 = pnand %p3212_p11, %p3389_p5  ;;  %p3218_p2 = por %p3217_p1, %p3216_p0 }
 0xfd3   : > { %v2238_v42 = vsel %vm2237_vm8, %v3164_v24, %v2234_v35 }
 0xfd4   : > { %v2243_v43 = vsel %vm2240_vm9, %v2242_v45, %v2238_v42  ;;  %v3085_v42 = vld [vmem:[%s3991_s7 + $0xa] ss:$0 sm:$0xff]  ;;  %p3214_p13 = pneg %p3213_p12 }
 0xfd5   : > { %v2244_v16 = vmul.f32 %v3158_v7, %v2243_v43 }
 0xfd6   : > { %v2098_v38 = vpop.permute.xlu0 %2097  ;;  %p3219_p3 = pnand %p3218_p2, %p3214_p13 }
 0xfd7   : > { %2118 = vmatpush.msra.mxu2 %v2098_v38 }
 0xfd8   : > { %2975 = vmatmul.msk.f32.vlgmr.msra.gmra.mxu2 %vm603_vm3, %v2070_v39 }
 0xfd9   : > { %2281 = vmatpush.msrb.mxu2 %v2261_v40 }
 0xfe0   : > { %2982 = vmatmul.msk.f32.vlgmr.msrb.gmra.mxu2 %vm603_vm3, %v2244_v16  ;;  %v3086_v16 = vld [vmem:[%s3991_s7 + $0xb] ss:$0 sm:$0xff] }
0x1029   : > { %v2229_v46 = vpop.xlane.xlu2 %2228 }
0x102a   : > { %3165 = vrcp.f32 %v2229_v46  ;;  %v2256_v50 = vand.u32 2147483648, %v2229_v46  ;;  %v2254_v52 = vand.u32 2147483647, %v2229_v46  ;;  %vm2250_vm11 = vweird.f32 %v2229_v46 }
0x102c   : > { %v2257_v54 = vor.u32 1.1754944e-38, %v2256_v50  ;;  %vm2255_vm13 = vcmp.eq.f32.partialorder %v2254_v52, 8.507059e+37  ;;  %v3000_v52 = vld [vmem:[%s3994_s10 + $0x60] sm:$0xff] }
0x1030   : > { %v3166_v47 = vpop.eup %3165 }
0x1031   : > { %v2246_v48 = vmul.f32 %v3166_v47, %v2229_v46  ;;  %v2287_v49 = vpop.permute.xlu2 %2286  ;;  %vm2251_vm10 = vweird.f32 %v3166_v47 }
0x1032   : > { %2307 = vmatpush.msrb.mxu1 %v2287_v49  ;;  %vm2252_vm12 = vmor %vm2250_vm11, %vm2251_vm10  ;;  %v3002_v49 = vld [vmem:[%s3994_s10 + $0x70] sm:$0xff] }
0x1033   : > { %v2247_v58 = vsub.f32 1.0, %v2246_v48  ;;  %v3003_v48 = vld [vmem:[%s3994_s10 + $0x78] sm:$0xff] }
0x1034   : > { %2468 = vmatpush.msrb.mxu3 %v3003_v48 }
0x1035   : > { %v2248_v51 = vmul.f32 %v3166_v47, %v2247_v58  ;;  %v3001_v58 = vld [vmem:[%s3994_s10 + $0x68] sm:$0xff] }
0x1036   : > { %2469 = vmatpush.msrb.mxu3 %v3002_v49 }
0x1037   : > { %v2249_v53 = vadd.f32 %v3166_v47, %v2248_v51 }
0x1038   : > { %2470 = vmatpush.msrb.mxu3 %v3001_v58 }
0x1039   : > { %v2253_v56 = vsel %vm2252_vm12, %v3166_v47, %v2249_v53 }
0x103a   : > { %v2258_v1 = vsel %vm2255_vm13, %v2257_v54, %v2253_v56  ;;  %v2999_v54 = vld [vmem:[%s3994_s10 + $0x58] sm:$0xff]  ;;  %2471 = vmatpush.msrb.mxu3 %v3000_v52 }
0x103b   : > { %v2259_v59 = vmul.f32 %v3160_v15, %v2258_v1 }
0x103c   : > { %2472 = vmatpush.msrb.mxu3 %v2999_v54 }
0x103d   : > { %2983 = vmatmul.msk.f32.vlgmr.msrb.gmra.mxu1 %vm603_vm3, %v2259_v59 }
0x103e   : > { %2473 = vmatpush.msrb.mxu3 %v2998_v2 }
0x105b   : > { %v2120_v60 = vpop.f32.mrf.mxu2 }
0x105c   : > { %2977 = vmatmul.msk.f32.gmra.mxu3 %vm603_vm3, %v2120_v60 }
0x1063   : > { %v2283_v13 = vpop.f32.mrf.mxu2 }
0x1064   : > { %2984 = vmatmul.msk.f32.vlgmr.msra.gmra.mxu0 %vm603_vm3, %v2283_v13 }
0x10ba   : > { %v2309_v61 = vpop.f32.mrf.mxu1 }
0x10bb   : > { %2985 = vmatmul.msk.f32.gmra.mxu0 %vm603_vm3, %v2309_v61 }
0x10df   : > { %v2149_v9 = vpop.f32.mrf.mxu3 }
0x10e0   : > { %v2153_v12 = vadd.f32 %v2149_v9, %v1963_v11 }
0x10e1   : > { %v2335_v4 = vpop.f32.mrf.mxu0 }
0x10e2   : > { %v2341_v5 = vadd.f32 %v2335_v4, %v2152_v3  ;;  %v2997_v3 = vld [vmem:[%s3994_s10 + $0x48] sm:$0xff]  ;;  %v3087_v4 = vld [vmem:[%s3993_s9 + $0x1] ss:$0 sm:$0xff] }
0x10e3   : > { %2474 = vmatpush.msrb.mxu3 %v2997_v3  ;;  %v2669_v3 = vld [vmem:[%s515_s30] sm:$0xff] }
0x10e4   : > { %v2346_v6 = vadd.f32 %v3084_v44, %v2341_v5 }
0x10e6   : > { %v2348_v7 = vadd.f32 %v2346_v6, %v3666_v28 }
0x10e8   : > { %v2352_v8 = vsel %vm566_vm2, %v2348_v7, 0.0 }
0x10e9   : > { %2353 = vadd.xlane.f32.xlu0 %v2352_v8 }
0x1138   : > { %v2338_v14 = vpop.f32.mrf.mxu0 }
0x1139   : > { %v2342_v15 = vadd.f32 %v2338_v14, %v2153_v12  ;;  %v3088_v12 = vld [vmem:[%s3991_s7 + $0x9] ss:$0 sm:$0xff] }
0x113b   : > { %v2347_v10 = vadd.f32 %v3084_v44, %v2342_v15  ;;  %v2996_v44 = vld [vmem:[%s3994_s10 + $0x40] sm:$0xff] }
0x113c   : > { %2475 = vmatpush.msrb.mxu3 %v2996_v44  ;;  %v3271_v44 = vmov 0  }
0x113d   : > { %v2349_v17 = vadd.f32 %v2347_v10, %v3671_v41  ;;  %v2992_v41 = vld [vmem:[%s3992_s8 + $0x38] sm:$0xff]  ;;  %3073 = vset.pattern.permute.xlu2 %v3271_v44  ;;  %3074 = vset.pattern.permute.xlu0 %v3271_v44  ;;  %v3009_v44 = vld [vmem:[%s3996_s12 + $0x8] sm:$0xff] }
0x113e   : > { %2430 = vmatpush.msra.mxu2 %v2992_v41 }
0x113f   : > { %v2355_v19 = vsel %vm566_vm2, %v2349_v17, 0.0 }
0x1140   : > { %2356 = vadd.xlane.f32.xlu1 %v2355_v19  ;;  %2431 = vmatpush.msra.mxu2 %v2991_v29 }
0x1142   : > { %2432 = vmatpush.msra.mxu2 %v2990_v30 }
0x1144   : > { %2433 = vmatpush.msra.mxu2 %v2989_v31 }
0x115c   : > { %v2354_v20 = vpop.xlane.xlu0 %2353 }
0x115d   : > { %v2358_v21 = vmul.f32 %v2354_v20, %v3581_v57 }
0x115f   : > { %v2360_v22 = vsub.f32 %v2348_v7, %v2358_v21 }
0x1161   : > { %v2362_v28 = vmul.f32 %v2360_v22, %v2360_v22 }
0x1163   : > { %v2364_v23 = vsel %vm566_vm2, %v2362_v28, 0.0 }
0x1164   : > { %2365 = vadd.xlane.f32.xlu2 %v2364_v23 }
0x11b3   : > { %v2357_v24 = vpop.xlane.xlu1 %2356 }
0x11b4   : > { %v2359_v55 = vmul.f32 %v2357_v24, %v3581_v57 }
0x11b6   : > { %v2361_v25 = vsub.f32 %v2349_v17, %v2359_v55 }
0x11b8   : > { %v2363_v26 = vmul.f32 %v2361_v25, %v2361_v25 }
0x11ba   : > { %v2367_v27 = vsel %vm566_vm2, %v2363_v26, 0.0 }
0x11bb   : > { %2368 = vadd.xlane.f32.xlu0 %v2367_v27 }
0x11d7   : > { %v2366_v32 = vpop.xlane.xlu2 %2365 }
0x11d8   : > { %v2370_v33 = vmul.f32 %v2366_v32, %v3581_v57 }
0x11da   : > { %v2372_v34 = vadd.f32 1e-05, %v2370_v33 }
0x11dc   : > { %3167 = vrsqrt.f32 %v2372_v34  ;;  %vm2380_vm14 = vweird.f32 %v2372_v34 }
0x11e2   : > { %v3168_v35 = vpop.eup %3167 }
0x11e3   : > { %v2375_v36 = vmul.f32 %v3168_v35, %v2372_v34  ;;  %vm2381_vm3 = vweird.f32 %v3168_v35 }
0x11e4   : > { %vm2382_vm0 = vmor %vm2380_vm14, %vm2381_vm3 }
0x11e5   : > { %v2376_v37 = vmul.f32 %v3168_v35, %v2375_v36 }
0x11e7   : > { %v2377_v38 = vmul.f32 0.5, %v2376_v37 }
0x11e9   : > { %v2378_v39 = vsub.f32 1.5, %v2377_v38 }
0x11eb   : > { %v2379_v40 = vmul.f32 %v3168_v35, %v2378_v39 }
0x11ed   : > { %v2383_v45 = vsel %vm2382_vm0, %v3168_v35, %v2379_v40  ;;  %v3089_v40 = vld [vmem:[%s3991_s7 + $0xc] ss:$0 sm:$0xff] }
0x11ee   : > { %v2394_v43 = vmul.f32 %v2383_v45, %v2360_v22 }
0x11f0   : > { %v2397_v46 = vmul.f32 %v3085_v42, %v2394_v43  ;;  %v3090_v43 = vld [vmem:[%s3991_s7 + $0xd] ss:$0 sm:$0xff] }
0x11f2   : > { %v2400_v47 = vadd.f32 %v3086_v16, %v2397_v46 }
0x11f4   : > { %2994 = vmatmul.msk.f32.vlgmr.msra.gmra.mxu2 %vm566_vm2, %v2400_v47 }
0x122e   : > { %v2369_v50 = vpop.xlane.xlu0 %2368 }
0x122f   : > { %v2371_v51 = vmul.f32 %v2369_v50, %v3581_v57 }
0x1231   : > { %v2373_v53 = vadd.f32 1e-05, %v2371_v51 }
0x1233   : > { %3169 = vrsqrt.f32 %v2373_v53  ;;  %vm2390_vm4 = vweird.f32 %v2373_v53 }
0x1239   : > { %v3170_v56 = vpop.eup %3169 }
0x123a   : > { %v2385_v1 = vmul.f32 %v3170_v56, %v2373_v53  ;;  %vm2391_vm1 = vweird.f32 %v3170_v56 }
0x123b   : > { %vm2392_vm5 = vmor %vm2390_vm4, %vm2391_vm1 }
0x123c   : > { %v2386_v59 = vmul.f32 %v3170_v56, %v2385_v1 }
0x123e   : > { %v2387_v18 = vmul.f32 0.5, %v2386_v59 }
0x1240   : > { %v2388_v60 = vsub.f32 1.5, %v2387_v18 }
0x1242   : > { %v2389_v13 = vmul.f32 %v3170_v56, %v2388_v60 }
0x1244   : > { %v2393_v61 = vsel %vm2392_vm5, %v3170_v56, %v2389_v13 }
0x1245   : > { %v2395_v62 = vmul.f32 %v2393_v61, %v2361_v25 }
0x1247   : > { %v2398_v63 = vmul.f32 %v3085_v42, %v2395_v62 }
0x1249   : > { %v2401_v0 = vadd.f32 %v3086_v16, %v2398_v63 }
0x124b   : > { %2995 = vmatmul.msk.f32.gmra.mxu2 %vm566_vm2, %v2401_v0 }
0x1277   : > { %v2435_v5 = vpop.f32.mrf.mxu2 }
0x1278   : > { %v2436_v6 = vadd.f32 %v3087_v4, %v2435_v5 }
0x127a   : > { %v2441_v7 = vmax.f32 %v2436_v6, 0.0 }
0x127c   : > { %3005 = vmatmul.msk.f32.vlgmr.msrb.gmra.mxu3 %vm1465_vm15, %v2441_v7 }
0x12ce   : > { %v2438_v8 = vpop.f32.mrf.mxu2 }
0x12cf   : > { %v2439_v9 = vadd.f32 %v3087_v4, %v2438_v8 }
0x12d1   : > { %v2442_v11 = vmax.f32 %v2439_v9, 0.0  ;;  %v2670_v9 = vld [vmem:[%s515_s30 + $0x8] sm:$0xff] }
0x12d3   : > { %3006 = vmatmul.msk.f32.gmra.mxu3 %vm1465_vm15, %v2442_v11 }
0x12ff   : > { %v2477_v14 = vpop.f32.mrf.mxu3 }
0x1300   : > { %v2478_v15 = vadd.f32 %v3088_v12, %v2477_v14 }
0x1302   : > { %v2483_v10 = vadd.f32 %v2478_v15, %v2400_v47 }
0x1304   : > { %v2487_v17 = vsel %vm566_vm2, %v2483_v10, 0.0 }
0x1305   : > { %2488 = vadd.xlane.f32.xlu0 %v2487_v17 }
0x1356   : > { %v2480_v19 = vpop.f32.mrf.mxu3 }
0x1357   : > { %v2481_v20 = vadd.f32 %v3088_v12, %v2480_v19 }
0x1359   : > { %v2484_v21 = vadd.f32 %v2481_v20, %v2401_v0 }
0x135b   : > { %v2490_v22 = vsel %vm566_vm2, %v2484_v21, 0.0 }
0x135c   : > { %2491 = vadd.xlane.f32.xlu1 %v2490_v22  ;;  %v3892_v22 = vld [vmem:[%s3995_s11] ss:$0 sm:$0xff] }
0x1378   : > { %v2489_v28 = vpop.xlane.xlu0 %2488 }
0x1379   : > { %v2493_v23 = vmul.f32 %v2489_v28, %v3581_v57 }
0x137b   : > { %v2495_v24 = vsub.f32 %v2483_v10, %v2493_v23 }
0x137d   : > { %v2497_v55 = vmul.f32 %v2495_v24, %v2495_v24 }
0x137f   : > { %v2499_v25 = vsel %vm566_vm2, %v2497_v55, 0.0 }
0x1380   : > { %2500 = vadd.xlane.f32.xlu2 %v2499_v25 }
0x13cf   : > { %v2492_v26 = vpop.xlane.xlu1 %2491 }
0x13d0   : > { %v2494_v27 = vmul.f32 %v2492_v26, %v3581_v57 }
0x13d2   : > { %v2496_v41 = vsub.f32 %v2484_v21, %v2494_v27 }
0x13d4   : > { %v2498_v29 = vmul.f32 %v2496_v41, %v2496_v41 }
0x13d6   : > { %v2502_v30 = vsel %vm566_vm2, %v2498_v29, 0.0 }
0x13d7   : > { %2503 = vadd.xlane.f32.xlu0 %v2502_v30 }
0x13f3   : > { %v2501_v31 = vpop.xlane.xlu2 %2500 }
0x13f4   : > { %v2505_v32 = vmul.f32 %v2501_v31, %v3581_v57 }
0x13f6   : > { %v2507_v33 = vadd.f32 1e-05, %v2505_v32 }
0x13f8   : > { %3171 = vrsqrt.f32 %v2507_v33  ;;  %vm2515_vm6 = vweird.f32 %v2507_v33 }
0x13fe   : > { %v3172_v34 = vpop.eup %3171 }
0x13ff   : > { %v2510_v35 = vmul.f32 %v3172_v34, %v2507_v33  ;;  %vm2516_vm15 = vweird.f32 %v3172_v34 }
0x1400   : > { %vm2517_vm7 = vmor %vm2515_vm6, %vm2516_vm15 }
0x1401   : > { %v2511_v36 = vmul.f32 %v3172_v34, %v2510_v35 }
0x1403   : > { %v2512_v37 = vmul.f32 0.5, %v2511_v36 }
0x1405   : > { %v2513_v38 = vsub.f32 1.5, %v2512_v37 }
0x1407   : > { %v2514_v39 = vmul.f32 %v3172_v34, %v2513_v38 }
0x1409   : > { %v2518_v42 = vsel %vm2517_vm7, %v3172_v34, %v2514_v39 }
0x140a   : > { %v2529_v45 = vmul.f32 %v2518_v42, %v2495_v24  ;;  %v3897_v24 = vld [vmem:[%s3995_s11 + $0x1] ss:$0 sm:$0xff] }
0x140c   : > { %v2532_v16 = vmul.f32 %v3089_v40, %v2529_v45 }
0x140e   : > { %v2535_v46 = vadd.f32 %v3090_v43, %v2532_v16 }
0x1410   : > { %v2539_v47 = vsel %vm566_vm2, %v2535_v46, 0.0 }
0x1411   : > { %2540 = vadd.xlane.f32.xlu1 %v2539_v47 }
0x144a   : > { %v2504_v48 = vpop.xlane.xlu0 %2503 }
0x144b   : > { %v2506_v49 = vmul.f32 %v2504_v48, %v3581_v57 }
0x144d   : > { %v2508_v58 = vadd.f32 1e-05, %v2506_v49 }
0x144f   : > { %3173 = vrsqrt.f32 %v2508_v58  ;;  %vm2525_vm9 = vweird.f32 %v2508_v58 }
0x1455   : > { %v3174_v50 = vpop.eup %3173 }
0x1456   : > { %v2520_v51 = vmul.f32 %v3174_v50, %v2508_v58  ;;  %vm2526_vm8 = vweird.f32 %v3174_v50 }
0x1457   : > { %vm2527_vm10 = vmor %vm2525_vm9, %vm2526_vm8 }
0x1458   : > { %v2521_v52 = vmul.f32 %v3174_v50, %v2520_v51 }
0x145a   : > { %v2522_v53 = vmul.f32 0.5, %v2521_v52 }
0x145c   : > { %v2523_v54 = vsub.f32 1.5, %v2522_v53 }
0x145e   : > { %v2524_v56 = vmul.f32 %v3174_v50, %v2523_v54 }
0x1460   : > { %v2528_v1 = vsel %vm2527_vm10, %v3174_v50, %v2524_v56 }
0x1461   : > { %v2530_v59 = vmul.f32 %v2528_v1, %v2496_v41 }
0x1463   : > { %v2533_v18 = vmul.f32 %v3089_v40, %v2530_v59 }
0x1465   : > { %v2536_v60 = vadd.f32 %v3090_v43, %v2533_v18 }
0x1467   : > { %v2542_v13 = vsel %vm566_vm2, %v2536_v60, 0.0 }
0x1468   : > { %2543 = vadd.xlane.f32.xlu2 %v2542_v13 }
0x1480   : > { %2673 = vperm.xlu2 %3073, %v2669_v3  }
0x1484   : > { %v2541_v61 = vpop.xlane.xlu1 %2540 }
0x1485   : > { %v2545_v62 = vmul.f32 %v2541_v61, %v3581_v57  ;;  %v3904_v61 = vld [vmem:[%s3996_s12] sm:$0xff] }
0x1487   : > { %v2547_v63 = vsub.f32 %v2535_v46, %v2545_v62 }
0x1489   : > { %v2549_v0 = vmul.f32 %v2547_v63, %v2547_v63 }
0x148b   : > { %v2551_v2 = vsel %vm566_vm2, %v2549_v0, 0.0 }
0x148c   : > { %2552 = vadd.xlane.f32.xlu0 %v2551_v2 }
0x14a0   : > { %2678 = vperm.xlu0 %3074, %v2670_v9  }
0x14db   : > { %v2544_v4 = vpop.xlane.xlu2 %2543 }
0x14dc   : > { %v2546_v5 = vmul.f32 %v2544_v4, %v3581_v57 }
0x14de   : > { %v3883_v6 = vsub.f32 %v2536_v60, %v2546_v5 }
0x14e0   : > { %v2550_v7 = vmul.f32 %v3883_v6, %v3883_v6 }
0x14e2   : > { %v2554_v8 = vsel %vm566_vm2, %v2550_v7, 0.0 }
0x14e3   : > { %2555 = vadd.xlane.f32.xlu1 %v2554_v8  ;;  %v2674_v60 = vpop.permute.xlu2 %2673 }
0x14ff   : > { %v2553_v11 = vpop.xlane.xlu0 %2552 }
0x1500   : > { %v2557_v12 = vmul.f32 %v2553_v11, %v3581_v57 }
0x1502   : > { %v2559_v14 = vadd.f32 1e-05, %v2557_v12 }
0x1504   : > { %3175 = vrsqrt.f32 %v2559_v14  ;;  %vm2567_vm12 = vweird.f32 %v2559_v14 }
0x150a   : > { %v3176_v15 = vpop.eup %3175 }
0x150b   : > { %v2562_v10 = vmul.f32 %v3176_v15, %v2559_v14  ;;  %vm2568_vm11 = vweird.f32 %v3176_v15 }
0x150c   : > { %vm2569_vm13 = vmor %vm2567_vm12, %vm2568_vm11 }
0x150d   : > { %v2563_v17 = vmul.f32 %v3176_v15, %v2562_v10 }
0x150f   : > { %v2564_v19 = vmul.f32 0.5, %v2563_v17 }
0x1511   : > { %v2565_v20 = vsub.f32 1.5, %v2564_v19 }
0x1513   : > { %v2566_v21 = vmul.f32 %v3176_v15, %v2565_v20 }
0x1515   : > { %v2570_v28 = vsel %vm2569_vm13, %v3176_v15, %v2566_v21 }
0x1516   : > { %v2581_v23 = vmul.f32 %v2570_v28, %v2547_v63 }
0x1518   : > { %v2584_v55 = vmul.f32 %v3892_v22, %v2581_v23 }
0x151a   : > { %v2587_v25 = vadd.f32 %v3897_v24, %v2584_v55 }
0x151c   : > { %v2591_v26 = vmul.f32 0.70710677, %v2587_v25  ;;  %v2589_v59 = vmul.f32 0.5, %v2587_v25 }
0x151e   : > { %v2593_v27 = vand.u32 2147483647, %v2591_v26  ;;  %vm2659_vm4 = vcmp.lt.f32.partialorder %v2591_v26, 0.0 }
0x1520   : > { %v2595_v41 = vmul.f32 0.3275911, %v2593_v27  ;;  %v2647_v40 = vsub.f32 0.0, %v2593_v27 }
0x1522   : > { %v2597_v29 = vadd.f32 1.0, %v2595_v41  ;;  %v2649_v43 = vmul.f32 %v2647_v40, %v2593_v27 }
0x1524   : > { %3177 = vrcp.f32 %v2597_v29  ;;  %v2610_v33 = vand.u32 2147483648, %v2597_v29  ;;  %v2608_v35 = vand.u32 2147483647, %v2597_v29  ;;  %vm2604_vm14 = vweird.f32 %v2597_v29 }
0x1525   : > { %v2651_v47 = vmul.f32 1.442695, %v2649_v43 }
0x1526   : > { %v2611_v37 = vor.u32 1.1754944e-38, %v2610_v33  ;;  %vm2609_vm1 = vcmp.eq.f32.partialorder %v2608_v35, 8.507059e+37 }
0x1527   : > { %3179 = vpow2.f32 %v2651_v47 }
0x152a   : > { %v3178_v30 = vpop.eup %3177 }
0x152b   : > { %v2600_v31 = vmul.f32 %v3178_v30, %v2597_v29  ;;  %vm2605_vm3 = vweird.f32 %v3178_v30 }
0x152c   : > { %vm2606_vm0 = vmor %vm2604_vm14, %vm2605_vm3 }
0x152d   : > { %v2601_v32 = vsub.f32 1.0, %v2600_v31  ;;  %v3180_v52 = vpop.eup %3179 }
0x152f   : > { %v2602_v34 = vmul.f32 %v3178_v30, %v2601_v32 }
0x1531   : > { %v2603_v36 = vadd.f32 %v3178_v30, %v2602_v34 }
0x1533   : > { %v2607_v38 = vsel %vm2606_vm0, %v3178_v30, %v2603_v36 }
0x1534   : > { %v2612_v39 = vsel %vm2609_vm1, %v2611_v37, %v2607_v38 }
0x1535   : > { %v2629_v42 = vmul.f32 1.0614054, %v2612_v39 }
0x1537   : > { %v2631_v45 = vadd.f32 -1.4531521, %v2629_v42 }
0x1539   : > { %v2633_v16 = vmul.f32 %v2631_v45, %v2612_v39 }
0x153b   : > { %v2635_v46 = vadd.f32 1.4214138, %v2633_v16 }
0x153d   : > { %v2637_v48 = vmul.f32 %v2635_v46, %v2612_v39 }
0x153f   : > { %v2639_v49 = vadd.f32 -0.28449672, %v2637_v48 }
0x1541   : > { %v2641_v58 = vmul.f32 %v2639_v49, %v2612_v39 }
0x1543   : > { %v2643_v50 = vadd.f32 0.2548296, %v2641_v58 }
0x1545   : > { %v2645_v51 = vmul.f32 %v2643_v50, %v2612_v39  ;;  %v2679_v50 = vpop.permute.xlu0 %2678 }
0x1547   : > { %v2655_v53 = vmul.f32 %v3180_v52, %v2645_v51 }
0x1549   : > { %v2657_v54 = vsub.f32 1.0, %v2655_v53 }
0x154b   : > { %v2661_v56 = vsub.f32 0.0, %v2657_v54 }
0x154d   : > { %v2663_v1 = vsel %vm2659_vm4, %v2661_v56, %v2657_v54 }
0x154e   : > { %v2665_v18 = vadd.f32 1.0, %v2663_v1 }
0x1550   : > { %v2667_v13 = vmul.f32 %v2665_v18, %v2589_v59  ;;  %v3010_v59 = vld [vmem:[%s3996_s12 + $0x10] sm:$0xff] }
0x1552   : > { %v3906_v62 = vmul.f32 %v2674_v60, %v2667_v13 }
0x1554   : > { %v2684_v63 = vmul.f32 %v3904_v61, %v3906_v62  ;;  %v2709_v5 = vmul.f32 %v3009_v44, %v3906_v62  ;;  %v2736_v18 = vmul.f32 %v3010_v59, %v3906_v62 }
0x1556   : > { %v2556_v0 = vpop.xlane.xlu1 %2555  ;;  %v2686_v2 = vsel %vm566_vm2, %v2684_v63, 0.0  ;;  %v2711_v7 = vsel %vm566_vm2, %v2709_v5, 0.0  ;;  %v2738_v60 = vsel %vm566_vm2, %v2736_v18, 0.0 }
0x1557   : > { %v2558_v3 = vmul.f32 %v2556_v0, %v3581_v57  ;;  %2687 = vadd.xlane.f32.xlu1 %v2686_v2 }
0x1559   : > { %v2560_v4 = vadd.f32 1e-05, %v2558_v3 }
0x155b   : > { %3181 = vrsqrt.f32 %v2560_v4  ;;  %vm2577_vm15 = vweird.f32 %v2560_v4 }
0x155f   : > { %2712 = vadd.xlane.f32.xlu1 %v2711_v7 }
0x1561   : > { %v3182_v8 = vpop.eup %3181 }
0x1562   : > { %v2572_v9 = vmul.f32 %v3182_v8, %v2560_v4  ;;  %vm2578_vm5 = vweird.f32 %v3182_v8 }
0x1563   : > { %vm2579_vm6 = vmor %vm2577_vm15, %vm2578_vm5 }
0x1564   : > { %v2573_v11 = vmul.f32 %v3182_v8, %v2572_v9 }
0x1566   : > { %v2574_v12 = vmul.f32 0.5, %v2573_v11 }
0x1568   : > { %v2575_v14 = vsub.f32 1.5, %v2574_v12 }
0x156a   : > { %v2576_v15 = vmul.f32 %v3182_v8, %v2575_v14 }
0x156c   : > { %v2580_v57 = vsel %vm2579_vm6, %v3182_v8, %v2576_v15 }
0x156d   : > { %v2582_v10 = vmul.f32 %v2580_v57, %v3883_v6 }
0x156f   : > { %v2585_v17 = vmul.f32 %v3892_v22, %v2582_v10 }
0x1571   : > { %v2588_v19 = vadd.f32 %v3897_v24, %v2585_v17 }
0x1573   : > { %v2592_v20 = vmul.f32 0.70710677, %v2588_v19  ;;  %v2590_v49 = vmul.f32 0.5, %v2588_v19 }
0x1575   : > { %v2594_v21 = vand.u32 2147483647, %v2592_v20  ;;  %vm2660_vm11 = vcmp.lt.f32.partialorder %v2592_v20, 0.0 }
0x1577   : > { %v2596_v28 = vmul.f32 0.3275911, %v2594_v21  ;;  %v2648_v24 = vsub.f32 0.0, %v2594_v21 }
0x1579   : > { %v2598_v23 = vadd.f32 1.0, %v2596_v28  ;;  %v2650_v34 = vmul.f32 %v2648_v24, %v2594_v21 }
0x157b   : > { %3183 = vrcp.f32 %v2598_v23  ;;  %v2625_v27 = vand.u32 2147483648, %v2598_v23  ;;  %v2623_v29 = vand.u32 2147483647, %v2598_v23  ;;  %vm2619_vm8 = vweird.f32 %v2598_v23 }
0x157c   : > { %v2653_v37 = vmul.f32 1.442695, %v2650_v34 }
0x157d   : > { %v2626_v6 = vor.u32 1.1754944e-38, %v2625_v27  ;;  %vm2624_vm10 = vcmp.eq.f32.partialorder %v2623_v29, 8.507059e+37 }
0x157e   : > { %3185 = vpow2.f32 %v2653_v37 }
0x1581   : > { %v3184_v55 = vpop.eup %3183 }
0x1582   : > { %v2615_v25 = vmul.f32 %v3184_v55, %v2598_v23  ;;  %vm2620_vm7 = vweird.f32 %v3184_v55 }
0x1583   : > { %vm2621_vm9 = vmor %vm2619_vm8, %vm2620_vm7 }
0x1584   : > { %v2616_v26 = vsub.f32 1.0, %v2615_v25  ;;  %v3186_v43 = vpop.eup %3185  ;;  %v2729_v25 = vld [vmem:[%s3997_s13 + $0x1] sm:$0x1] }
0x1586   : > { %v2617_v41 = vmul.f32 %v3184_v55, %v2616_v26 }
0x1588   : > { %v2618_v30 = vadd.f32 %v3184_v55, %v2617_v41 }
0x158a   : > { %v2622_v31 = vsel %vm2621_vm9, %v3184_v55, %v2618_v30  ;;  %v2704_v30 = vld [vmem:[%s3997_s13] sm:$0x1] }
0x158b   : > { %v2627_v22 = vsel %vm2624_vm10, %v2626_v6, %v2622_v31 }
0x158c   : > { %v2630_v32 = vmul.f32 1.0614054, %v2627_v22 }
0x158e   : > { %v2632_v33 = vadd.f32 -1.4531521, %v2630_v32 }
0x1590   : > { %v2634_v35 = vmul.f32 %v2632_v33, %v2627_v22 }
0x1592   : > { %v2636_v36 = vadd.f32 1.4214138, %v2634_v35 }
0x1594   : > { %v2638_v38 = vmul.f32 %v2636_v36, %v2627_v22  ;;  %v2756_v36 = vld [vmem:[%s3997_s13 + $0x2] sm:$0x1] }
0x1596   : > { %v2640_v39 = vadd.f32 -0.28449672, %v2638_v38 }
0x1598   : > { %v2642_v40 = vmul.f32 %v2640_v39, %v2627_v22 }
0x159a   : > { %v2644_v42 = vadd.f32 0.2548296, %v2642_v40 }
0x159c   : > { %v2646_v45 = vmul.f32 %v2644_v42, %v2627_v22 }
0x159e   : > { %v2656_v16 = vmul.f32 %v3186_v43, %v2646_v45 }
0x15a0   : > { %v2658_v46 = vsub.f32 1.0, %v2656_v16  ;;  %v2761_v16 = vld [vmem:[%s3998_s14] sm:$0x1] }
0x15a2   : > { %v2662_v47 = vsub.f32 0.0, %v2658_v46 }
0x15a4   : > { %v2664_v48 = vsel %vm2660_vm11, %v2662_v47, %v2658_v46 }
0x15a5   : > { %v2666_v58 = vadd.f32 1.0, %v2664_v48 }
0x15a7   : > { %v2668_v51 = vmul.f32 %v2666_v58, %v2590_v49 }
0x15a9   : > { %v2682_v52 = vmul.f32 %v2679_v50, %v2668_v51 }
0x15ab   : > { %v2710_v53 = vmul.f32 %v3009_v44, %v2682_v52  ;;  %v2685_v54 = vmul.f32 %v3904_v61, %v2682_v52  ;;  %v2737_v13 = vmul.f32 %v3010_v59, %v2682_v52 }
0x15ad   : > { %v2714_v56 = vsel %vm566_vm2, %v2710_v53, 0.0  ;;  %v2689_v1 = vsel %vm566_vm2, %v2685_v54, 0.0  ;;  %v2741_v63 = vsel %vm566_vm2, %v2737_v13, 0.0 }
0x15ae   : > { %2715 = vadd.xlane.f32.xlu2 %v2714_v56  ;;  %2690 = vadd.xlane.f32.xlu1 %v2689_v1 }
0x15b6   : > { %2739 = vadd.xlane.f32.xlu1 %v2738_v60 }
0x15be   : > { %2742 = vadd.xlane.f32.xlu1 %v2741_v63 }
0x15ca   : > { %v2688_v61 = vpop.xlane.xlu1 %2687 }
0x15cb   : > { %v2692_v3 = vrot.slane %v2688_v61, 4 }
0x15cd   : > { %v2693_v4 = vadd.f32 %v2692_v3, %v2688_v61 }
0x15cf   : > { %v2694_v12 = vrot.slane %v2693_v4, 2 }
0x15d1   : > { %v2695_v57 = vadd.f32 %v2694_v12, %v2693_v4 }
0x15d2   : > { %v2713_v0 = vpop.xlane.xlu1 %2712 }
0x15d3   : > { %v2717_v2 = vrot.slane %v2713_v0, 4  ;;  %v2696_v28 = vrot.slane %v2695_v57, 1 }
0x15d5   : > { %v2718_v44 = vadd.f32 %v2717_v2, %v2713_v0  ;;  %v2697_v29 = vadd.f32 %v2696_v28, %v2695_v57 }
0x15d7   : > { %v2719_v5 = vrot.slane %v2718_v44, 2  ;;  %v2705_v35 = vmul.f32 %v2704_v30, %v2697_v29 }
0x15d9   : > { %v2720_v62 = vadd.f32 %v2719_v5, %v2718_v44 }
0x15db   : > { %v2721_v10 = vrot.slane %v2720_v62, 1 }
0x15dd   : > { %v2722_v55 = vadd.f32 %v2721_v10, %v2720_v62 }
0x15df   : > { %v2730_v31 = vmul.f32 %v2729_v25, %v2722_v55 }
0x15e1   : > { %v2732_v39 = vadd.f32 %v2730_v31, %v2705_v35 }
0x1621   : > { %v2716_v7 = vpop.xlane.xlu2 %2715  ;;  %v2691_v8 = vpop.xlane.xlu1 %2690 }
0x1622   : > { %v2723_v9 = vrot.slane %v2716_v7, 4  ;;  %v2698_v11 = vrot.slane %v2691_v8, 4 }
0x1624   : > { %v2724_v14 = vadd.f32 %v2723_v9, %v2716_v7  ;;  %v2699_v15 = vadd.f32 %v2698_v11, %v2691_v8 }
0x1626   : > { %v2725_v19 = vrot.slane %v2724_v14, 2  ;;  %v2700_v20 = vrot.slane %v2699_v15, 2 }
0x1628   : > { %v2726_v26 = vadd.f32 %v2725_v19, %v2724_v14  ;;  %v2701_v27 = vadd.f32 %v2700_v20, %v2699_v15 }
0x1629   : > { %v2740_v17 = vpop.xlane.xlu1 %2739 }
0x162a   : > { %v2744_v21 = vrot.slane %v2740_v17, 4  ;;  %v2727_v24 = vrot.slane %v2726_v26, 1  ;;  %v2702_v32 = vrot.slane %v2701_v27, 1 }
0x162c   : > { %v2745_v23 = vadd.f32 %v2744_v21, %v2740_v17  ;;  %v2728_v40 = vadd.f32 %v2727_v24, %v2726_v26  ;;  %v2703_v42 = vadd.f32 %v2702_v32, %v2701_v27 }
0x162e   : > { %v2746_v41 = vrot.slane %v2745_v23, 2  ;;  %v2731_v48 = vmul.f32 %v2729_v25, %v2728_v40  ;;  %v2706_v49 = vmul.f32 %v2704_v30, %v2703_v42 }
0x1630   : > { %v2747_v6 = vadd.f32 %v2746_v41, %v2745_v23  ;;  %v2733_v53 = vadd.f32 %v2731_v48, %v2706_v49 }
0x1631   : > { %v2743_v22 = vpop.xlane.xlu1 %2742 }
0x1632   : > { %v2748_v33 = vrot.slane %v2747_v6, 1  ;;  %v2750_v34 = vrot.slane %v2743_v22, 4 }
0x1634   : > { %v2749_v37 = vadd.f32 %v2748_v33, %v2747_v6  ;;  %v2751_v38 = vadd.f32 %v2750_v34, %v2743_v22 }
0x1636   : > { %v2757_v45 = vmul.f32 %v2756_v36, %v2749_v37  ;;  %v2752_v43 = vrot.slane %v2751_v38, 2 }
0x1638   : > { %v2759_v46 = vadd.f32 %v2757_v45, %v2732_v39  ;;  %v2753_v47 = vadd.f32 %v2752_v43, %v2751_v38 }
0x163a   : > { %v2762_v58 = vadd.f32 %v2761_v16, %v2759_v46  ;;  %v2754_v50 = vrot.slane %v2753_v47, 1 }
0x163c   : > { %v3011_v51 = vmul.f32 -1.442695, %v2762_v58  ;;  %v2755_v52 = vadd.f32 %v2754_v50, %v2753_v47 }
0x163e   : > { %3187 = vpow2.f32 %v3011_v51  ;;  %v2758_v54 = vmul.f32 %v2756_v36, %v2755_v52 }
0x1640   : > { %v2760_v56 = vadd.f32 %v2758_v54, %v2733_v53 }
0x1642   : > { %v2763_v1 = vadd.f32 %v2761_v16, %v2760_v56 }
0x1644   : > { %v3188_v59 = vpop.eup %3187  ;;  %v3012_v18 = vmul.f32 -1.442695, %v2763_v1 }
0x1645   : > { %v2770_v60 = vadd.f32 1.0, %v3188_v59 }
0x1646   : > { %3189 = vpow2.f32 %v3012_v18 }
0x1647   : > { %3191 = vrcp.f32 %v2770_v60  ;;  %v2783_v3 = vand.u32 2147483648, %v2770_v60  ;;  %v2781_v4 = vand.u32 2147483647, %v2770_v60  ;;  %vm2777_vm12 = vweird.f32 %v2770_v60 }
0x1649   : > { %v2784_v8 = vor.u32 1.1754944e-38, %v2783_v3  ;;  %vm2782_vm3 = vcmp.eq.f32.partialorder %v2781_v4, 8.507059e+37 }
0x164c   : > { %v3190_v13 = vpop.eup %3189 }
0x164d   : > { %v3192_v63 = vpop.eup %3191  ;;  %v2771_v61 = vadd.f32 1.0, %v3190_v13 }
0x164e   : > { %v2773_v0 = vmul.f32 %v3192_v63, %v2770_v60  ;;  %vm2778_vm2 = vweird.f32 %v3192_v63 }
0x164f   : > { %3193 = vrcp.f32 %v2771_v61  ;;  %vm2779_vm13 = vmor %vm2777_vm12, %vm2778_vm2  ;;  %v2798_v14 = vand.u32 2147483648, %v2771_v61  ;;  %v2796_v57 = vand.u32 2147483647, %v2771_v61  ;;  %vm2792_vm0 = vweird.f32 %v2771_v61 }
0x1650   : > { %v2774_v2 = vsub.f32 1.0, %v2773_v0 }
0x1651   : > { %v2799_v17 = vor.u32 1.1754944e-38, %v2798_v14  ;;  %vm2797_vm4 = vcmp.eq.f32.partialorder %v2796_v57, 8.507059e+37 }
0x1652   : > { %v2775_v44 = vmul.f32 %v3192_v63, %v2774_v2 }
0x1654   : > { %v2776_v5 = vadd.f32 %v3192_v63, %v2775_v44 }
0x1655   : > { %v3194_v7 = vpop.eup %3193 }
0x1656   : > { %v2780_v9 = vsel %vm2779_vm13, %v3192_v63, %v2776_v5  ;;  %v2788_v11 = vmul.f32 %v3194_v7, %v2771_v61  ;;  %vm2793_vm14 = vweird.f32 %v3194_v7 }
0x1657   : > { %v2785_v12 = vsel %vm2782_vm3, %v2784_v8, %v2780_v9  ;;  %vm2794_vm1 = vmor %vm2792_vm0, %vm2793_vm14 }
0x1658   : > { %v2789_v62 = vsub.f32 1.0, %v2788_v11  ;;  %2802 = vst [vmem:[%s504_s24] sm:$0x1] %v2785_v12 }
0x165a   : > { %v2790_v15 = vmul.f32 %v3194_v7, %v2789_v62 }
0x165c   : > { %v2791_v10 = vadd.f32 %v3194_v7, %v2790_v15 }
0x165e   : > { %v2795_v19 = vsel %vm2794_vm1, %v3194_v7, %v2791_v10 }
0x165f   : > { %v2800_v20 = vsel %vm2797_vm4, %v2799_v17, %v2795_v19 }
0x1660   : > { %2803 = vst [vmem:[%s504_s24 + $0x1] sm:$0x1] %v2800_v20 }
0x1661   : > { %3222 = shalt.err (!%p3219_p3)
}
0x1662   : > { %s3272_s29 = smov 16   ;;  %s3273_s24 = smov 1  }
0x1663   : > { %3019 = dma.vmem_to_hbm [thread:$0]  (%p3389_p5), %s2817_s22, 32, %s2819_s23, %s2805_s25, %s3272_s29, %s3272_s29, %s3273_s24  }
0x1664 PF: > { %p3025_p4 = scmp.ge.s32.totalorder %s3257_s21, 2  ;;  %s2833_s26 = sand.u32 1, %s3245_s18  }
0x1665   : > { %s2834_s27 = scalar_lea.sflag [#allocation3], %s2833_s26 }
0x1666   : > { %p3022_p7 = pnand %p3025_p4, %p3393_p6 }
0x1668   : > { %p3023_p8 = pneg %p3022_p7 }
0x166a   : > { %3240 = dma.done.wait (%p3023_p8), %s2834_s27, 32  }
0x166b   : > { %3242 = vsyncadd (%p3023_p8), %s2834_s27, 4294967264  ;;  %s4042_s21 = sld [smem:[#allocation6_spill]]  ;;  %s4045_s18 = smov %s3249_s19 }
0x166c   : > { %s4043_s16 = sld [smem:[#allocation5_spill]] }
0x166d   : > { %s4044_s20 = sld [smem:[#allocation7_spill]] }
0x1671   : > { %p25_p9 = scmp.ge.s32.totalorder %s4042_s21, 4  }
0x1672   : > { %s4046_s19 = smov %s4043_s16 }
0x1673   :  { %27 = sbr.rel (!%p25_p9) target bundleno = 5 (0x5), region = 127 }
0x1678   :  { %2840 = vsyncpa [#allocation3], 1 }
0x1679   :  { %2842 = vsyncpa [#allocation3 + $0x1], 1 }

</bundles_post_ra>
